<compile_context>
chip_gen: v6e
topology: v6e:2x2x1
jax: 0.10.0
libtpu: 0.0.40
codegen_flags: <defaults>
</compile_context>

<pallas_src>
import functools

import jax
import jax.numpy as jnp
from jax.experimental import pallas as pl
from jax.experimental.pallas import tpu as pltpu


def _upconv_kernel(x_ref, w_ref, shift_ref, o_ref, *, c_out, w2, half_rows):
    """One batch image / one block of 2*half_rows output rows.

    x_ref:     (C_in, H+2, 2W+2)   width-upsampled, zero-padded input (resident per image)
    w_ref:     (3, 3, 2*C_out, C_in) phase-folded weights; [..., :C_out, :] -> even output
               rows, [..., C_out:, :] -> odd output rows (BN scale already folded in)
    shift_ref: (2*C_out, 1)        folded conv-bias + BN shift (f32)
    o_ref:     (C_out, 2*half_rows, 2W)  NCHW output block
    """
    i = pl.program_id(1)
    row0 = i * half_rows                       # first source row (original-H resolution + pad)

    shift = shift_ref[...]                     # (2*C_out, 1)
    wmats = [[w_ref[u, dx] for dx in range(3)] for u in range(3)]   # each (2*C_out, C_in)

    # Static unroll over output row-pairs inside the block.
    for t in range(half_rows):
        acc = jnp.zeros((2 * c_out, w2), jnp.float32)
        for u in range(3):                     # row taps (source rows row0+t .. row0+t+2)
            row = x_ref[:, pl.ds(row0 + t + u, 1), :][:, 0, :]      # (C_in, 2W+2)
            for dx in range(3):                # column taps on the width-upsampled row
                acc += jnp.dot(wmats[u][dx], row[:, dx:dx + w2],
                               preferred_element_type=jnp.float32)
        y = jnp.maximum(acc + shift, 0.0)      # fused bias/BN shift + ReLU (f32 epilogue)
        o_ref[:, 2 * t, :] = y[:c_out].astype(o_ref.dtype)          # even output row
        o_ref[:, 2 * t + 1, :] = y[c_out:].astype(o_ref.dtype)      # odd output row


def up_conv_forward(x, conv_w, conv_b, bn_gamma, bn_beta, bn_mean, bn_var,
                    eps=1e-5, compute_dtype=jnp.float32):
    """x: (N, C_in, H, W) float32 NCHW (same as PyTorch). Returns (N, C_out, 2H, 2W) f32 NCHW."""
    N, C_in, H, W = x.shape
    C_out = conv_w.shape[0]
    H2, W2 = 2 * H, 2 * W

    # ---- glue (small): width-only 2x nearest upsample + zero pad --------------------------
    xw = jnp.repeat(x, 2, axis=3)                                    # (N, C_in, H, 2W)
    xcp = jnp.pad(xw, ((0, 0), (0, 0), (1, 1), (1, 1)))              # (N, C_in, H+2, 2W+2)
    xcp = xcp.astype(compute_dtype)

    # ---- fold eval-mode BatchNorm + conv bias; phase-expand the 3x3 kernel over rows ------
    scale = bn_gamma / jnp.sqrt(bn_var + eps)                        # (C_out,)
    shift = (conv_b - bn_mean) * scale + bn_beta                     # (C_out,)
    wf = conv_w.astype(jnp.float32) * scale[:, None, None, None]     # (C_out, C_in, 3, 3)

    # Nearest 2x upsample along H collapses the 3 dy taps onto 2 source rows per output row:
    #   even row 2i : src row i   gets W[dy=0]        ; src row i+1 gets W[dy=1]+W[dy=2]
    #   odd  row 2i+1: src row i+1 gets W[dy=0]+W[dy=1]; src row i+2 gets W[dy=2]
    zero = jnp.zeros_like(wf[:, :, 0, :])
    k_even = jnp.stack([wf[:, :, 0, :], wf[:, :, 1, :] + wf[:, :, 2, :], zero], axis=0)
    k_odd = jnp.stack([zero, wf[:, :, 0, :] + wf[:, :, 1, :], wf[:, :, 2, :]], axis=0)
    w_pack = jnp.concatenate([k_even, k_odd], axis=1)                # (3, 2*C_out, C_in, 3)
    w_pack = jnp.transpose(w_pack, (0, 3, 1, 2)).astype(compute_dtype)  # (3=u, 3=dx, 2C_out, C_in)

    shift_pack = jnp.concatenate([shift, shift]).reshape(2 * C_out, 1).astype(jnp.float32)

    # ---- output-row block size (second-to-last dim of the output block: mult of 8 or full) -
    TR = H2
    for cand in (16, 8):
        if H2 % cand == 0:
            TR = cand
            break
    half_rows = TR // 2
    n_row_blocks = H2 // TR

    kernel = functools.partial(_upconv_kernel, c_out=C_out, w2=W2, half_rows=half_rows)

    out = pl.pallas_call(
        kernel,
        out_shape=jax.ShapeDtypeStruct((N, C_out, H2, W2), jnp.float32),
        grid=(N, n_row_blocks),
        in_specs=[
            # Full padded input image; block index depends only on the batch axis, so it is
            # DMA'd once per image and stays resident across all row blocks of that image.
            pl.BlockSpec((None, C_in, H + 2, W2 + 2), lambda n, i: (n, 0, 0, 0)),
            pl.BlockSpec((3, 3, 2 * C_out, C_in), lambda n, i: (0, 0, 0, 0)),
            pl.BlockSpec((2 * C_out, 1), lambda n, i: (0, 0)),
        ],
        out_specs=pl.BlockSpec((None, C_out, TR, W2), lambda n, i: (n, 0, i, 0)),
        compiler_params=pltpu.CompilerParams(
            dimension_semantics=("parallel", "arbitrary"),   # batch axis shards across TCs (v7x)
            vmem_limit_bytes=48 * 1024 * 1024,               # headroom below v7x's 64 MiB
        ),
    )(xcp, w_pack, shift_pack)
    return out                                               # already NCHW; no transpose


def _reference(x, conv_w, conv_b, bn_gamma, bn_beta, bn_mean, bn_var, eps=1e-5):
    xu = jnp.repeat(jnp.repeat(x, 2, axis=2), 2, axis=3)
    conv = jax.lax.conv_general_dilated(
        xu, conv_w, window_strides=(1, 1), padding=((1, 1), (1, 1)),
        dimension_numbers=("NCHW", "OIHW", "NCHW"),
        precision=jax.lax.Precision.HIGHEST)
    conv = conv + conv_b[None, :, None, None]
    y = (conv - bn_mean[None, :, None, None]) / jnp.sqrt(bn_var + eps)[None, :, None, None]
    y = y * bn_gamma[None, :, None, None] + bn_beta[None, :, None, None]
    return jnp.maximum(y, 0.0)


if __name__ == "__main__":
    key = jax.random.PRNGKey(0)
    kx, kw, kb, kg, kbe, km, kv = jax.random.split(key, 7)

    N, C_in, H, W = 2, 4, 16, 16
    C_out = 8

    x = jax.random.normal(kx, (N, C_in, H, W), jnp.float32)
    conv_w = 0.1 * jax.random.normal(kw, (C_out, C_in, 3, 3), jnp.float32)
    conv_b = 0.1 * jax.random.normal(kb, (C_out,), jnp.float32)
    bn_gamma = 1.0 + 0.1 * jax.random.normal(kg, (C_out,), jnp.float32)
    bn_beta = 0.1 * jax.random.normal(kbe, (C_out,), jnp.float32)
    bn_mean = 0.1 * jax.random.normal(km, (C_out,), jnp.float32)
    bn_var = jnp.abs(jax.random.normal(kv, (C_out,), jnp.float32)) + 0.5

    ref = jax.block_until_ready(
        _reference(x, conv_w, conv_b, bn_gamma, bn_beta, bn_mean, bn_var))

    # f32 streams (exact mode)
    out = jax.block_until_ready(
        up_conv_forward(x, conv_w, conv_b, bn_gamma, bn_beta, bn_mean, bn_var))
    assert out.shape == (N, C_out, 2 * H, 2 * W), out.shape
    assert jnp.allclose(out, ref, atol=1e-3, rtol=1e-3), float(jnp.max(jnp.abs(out - ref)))

    # bf16 activation/weight streams (halves the dominant HBM traffic); MXU accumulation and
    # the BN/ReLU epilogue stay in f32.
    out_bf16 = jax.block_until_ready(
        up_conv_forward(x, conv_w, conv_b, bn_gamma, bn_beta, bn_mean, bn_var,
                        compute_dtype=jnp.bfloat16))
    assert jnp.allclose(out_bf16, ref, atol=3e-2, rtol=3e-2), \
        float(jnp.max(jnp.abs(out_bf16 - ref)))

    print("KERNEL_OK")
</pallas_src>

<mosaic_0001>
module attributes {stable_mosaic.version = 11 : i64} {
  func.func @_upconv_kernel(%arg0: i32, %arg1: i32, %arg2: memref<1x4x18x34xf32, #tpu.memory_space<vmem>>, %arg3: memref<3x3x16x4xf32, #tpu.memory_space<vmem>>, %arg4: memref<16x1xf32, #tpu.memory_space<vmem>>, %arg5: memref<1x8x16x32xf32, #tpu.memory_space<vmem>>) attributes {dimension_semantics = [#tpu.dimension_semantics<parallel>, #tpu.dimension_semantics<arbitrary>], iteration_bounds = array<i64: 2, 2>, scalar_prefetch = 0 : i64, scratch_operands = 0 : i64, tpu.core_type = #tpu.core_type<tc>, window_params = [{transform_indices = @transform_0, window_bounds = array<i64: 1, 4, 18, 34>}, {pipeline_mode = #tpu.pipeline_mode<synchronous>, transform_indices = @transform_1, window_bounds = array<i64: 3, 3, 16, 4>}, {pipeline_mode = #tpu.pipeline_mode<synchronous>, transform_indices = @transform_2, window_bounds = array<i64: 16, 1>}, {transform_indices = @transform_3, window_bounds = array<i64: 1, 8, 16, 32>}]} {
    %c8_i32 = arith.constant 8 : i32
    %0 = arith.muli %arg1, %c8_i32 : i32
    %c0 = arith.constant 0 : index
    %c0_0 = arith.constant 0 : index
    %1 = vector.load %arg4[%c0, %c0_0] : memref<16x1xf32, #tpu.memory_space<vmem>>, vector<16x1xf32>
    %c0_1 = arith.constant 0 : index
    %c0_2 = arith.constant 0 : index
    %c0_3 = arith.constant 0 : index
    %c0_4 = arith.constant 0 : index
    %2 = vector.load %arg3[%c0_1, %c0_2, %c0_3, %c0_4] : memref<3x3x16x4xf32, #tpu.memory_space<vmem>>, vector<1x1x16x4xf32>
    %3 = vector.shape_cast %2 : vector<1x1x16x4xf32> to vector<16x4xf32>
    %c0_5 = arith.constant 0 : index
    %c1 = arith.constant 1 : index
    %c0_6 = arith.constant 0 : index
    %c0_7 = arith.constant 0 : index
    %4 = vector.load %arg3[%c0_5, %c1, %c0_6, %c0_7] : memref<3x3x16x4xf32, #tpu.memory_space<vmem>>, vector<1x1x16x4xf32>
    %5 = vector.shape_cast %4 : vector<1x1x16x4xf32> to vector<16x4xf32>
    %c0_8 = arith.constant 0 : index
    %c2 = arith.constant 2 : index
    %c0_9 = arith.constant 0 : index
    %c0_10 = arith.constant 0 : index
    %6 = vector.load %arg3[%c0_8, %c2, %c0_9, %c0_10] : memref<3x3x16x4xf32, #tpu.memory_space<vmem>>, vector<1x1x16x4xf32>
    %7 = vector.shape_cast %6 : vector<1x1x16x4xf32> to vector<16x4xf32>
    %c1_11 = arith.constant 1 : index
    %c0_12 = arith.constant 0 : index
    %c0_13 = arith.constant 0 : index
    %c0_14 = arith.constant 0 : index
    %8 = vector.load %arg3[%c1_11, %c0_12, %c0_13, %c0_14] : memref<3x3x16x4xf32, #tpu.memory_space<vmem>>, vector<1x1x16x4xf32>
    %9 = vector.shape_cast %8 : vector<1x1x16x4xf32> to vector<16x4xf32>
    %c1_15 = arith.constant 1 : index
    %c1_16 = arith.constant 1 : index
    %c0_17 = arith.constant 0 : index
    %c0_18 = arith.constant 0 : index
    %10 = vector.load %arg3[%c1_15, %c1_16, %c0_17, %c0_18] : memref<3x3x16x4xf32, #tpu.memory_space<vmem>>, vector<1x1x16x4xf32>
    %11 = vector.shape_cast %10 : vector<1x1x16x4xf32> to vector<16x4xf32>
    %c1_19 = arith.constant 1 : index
    %c2_20 = arith.constant 2 : index
    %c0_21 = arith.constant 0 : index
    %c0_22 = arith.constant 0 : index
    %12 = vector.load %arg3[%c1_19, %c2_20, %c0_21, %c0_22] : memref<3x3x16x4xf32, #tpu.memory_space<vmem>>, vector<1x1x16x4xf32>
    %13 = vector.shape_cast %12 : vector<1x1x16x4xf32> to vector<16x4xf32>
    %c2_23 = arith.constant 2 : index
    %c0_24 = arith.constant 0 : index
    %c0_25 = arith.constant 0 : index
    %c0_26 = arith.constant 0 : index
    %14 = vector.load %arg3[%c2_23, %c0_24, %c0_25, %c0_26] : memref<3x3x16x4xf32, #tpu.memory_space<vmem>>, vector<1x1x16x4xf32>
    %15 = vector.shape_cast %14 : vector<1x1x16x4xf32> to vector<16x4xf32>
    %c2_27 = arith.constant 2 : index
    %c1_28 = arith.constant 1 : index
    %c0_29 = arith.constant 0 : index
    %c0_30 = arith.constant 0 : index
    %16 = vector.load %arg3[%c2_27, %c1_28, %c0_29, %c0_30] : memref<3x3x16x4xf32, #tpu.memory_space<vmem>>, vector<1x1x16x4xf32>
    %17 = vector.shape_cast %16 : vector<1x1x16x4xf32> to vector<16x4xf32>
    %c2_31 = arith.constant 2 : index
    %c2_32 = arith.constant 2 : index
    %c0_33 = arith.constant 0 : index
    %c0_34 = arith.constant 0 : index
    %18 = vector.load %arg3[%c2_31, %c2_32, %c0_33, %c0_34] : memref<3x3x16x4xf32, #tpu.memory_space<vmem>>, vector<1x1x16x4xf32>
    %19 = vector.shape_cast %18 : vector<1x1x16x4xf32> to vector<16x4xf32>
    %cst = arith.constant 0.000000e+00 : f32
    %20 = vector.broadcast %cst : f32 to vector<16x32xf32>
    %c0_i32 = arith.constant 0 : i32
    %21 = arith.addi %0, %c0_i32 : i32
    %c0_i32_35 = arith.constant 0 : i32
    %22 = arith.addi %21, %c0_i32_35 : i32
    %c0_36 = arith.constant 0 : index
    %c0_37 = arith.constant 0 : index
    %23 = arith.index_cast %22 : i32 to index
    %c0_38 = arith.constant 0 : index
    %24 = vector.load %arg2[%c0_36, %c0_37, %23, %c0_38] : memref<1x4x18x34xf32, #tpu.memory_space<vmem>>, vector<1x4x1x34xf32>
    %25 = vector.shape_cast %24 : vector<1x4x1x34xf32> to vector<4x1x34xf32>
    %26 = vector.shape_cast %25 : vector<4x1x34xf32> to vector<4x34xf32>
    %27 = vector.extract_strided_slice %26 {offsets = [0, 0], sizes = [4, 32], strides = [1, 1]} : vector<4x34xf32> to vector<4x32xf32>
    %cst_39 = arith.constant dense<0.000000e+00> : vector<16x32xf32>
    %28 = tpu.matmul %3, %27, %cst_39 {dimension_numbers = #tpu.dot_dimension_numbers<[1], [0], [0], [1], [0, 0, 1, 1], [], []>} : vector<16x4xf32>, vector<4x32xf32>, vector<16x32xf32> -> vector<16x32xf32>
    %29 = arith.addf %20, %28 : vector<16x32xf32>
    %30 = vector.extract_strided_slice %26 {offsets = [0, 1], sizes = [4, 32], strides = [1, 1]} : vector<4x34xf32> to vector<4x32xf32>
    %cst_40 = arith.constant dense<0.000000e+00> : vector<16x32xf32>
    %31 = tpu.matmul %5, %30, %cst_40 {dimension_numbers = #tpu.dot_dimension_numbers<[1], [0], [0], [1], [0, 0, 1, 1], [], []>} : vector<16x4xf32>, vector<4x32xf32>, vector<16x32xf32> -> vector<16x32xf32>
    %32 = arith.addf %29, %31 : vector<16x32xf32>
    %33 = vector.extract_strided_slice %26 {offsets = [0, 2], sizes = [4, 32], strides = [1, 1]} : vector<4x34xf32> to vector<4x32xf32>
    %cst_41 = arith.constant dense<0.000000e+00> : vector<16x32xf32>
    %34 = tpu.matmul %7, %33, %cst_41 {dimension_numbers = #tpu.dot_dimension_numbers<[1], [0], [0], [1], [0, 0, 1, 1], [], []>} : vector<16x4xf32>, vector<4x32xf32>, vector<16x32xf32> -> vector<16x32xf32>
    %35 = arith.addf %32, %34 : vector<16x32xf32>
    %c0_i32_42 = arith.constant 0 : i32
    %36 = arith.addi %0, %c0_i32_42 : i32
    %c1_i32 = arith.constant 1 : i32
    %37 = arith.addi %36, %c1_i32 : i32
    %c0_43 = arith.constant 0 : index
    %c0_44 = arith.constant 0 : index
    %38 = arith.index_cast %37 : i32 to index
    %c0_45 = arith.constant 0 : index
    %39 = vector.load %arg2[%c0_43, %c0_44, %38, %c0_45] : memref<1x4x18x34xf32, #tpu.memory_space<vmem>>, vector<1x4x1x34xf32>
    %40 = vector.shape_cast %39 : vector<1x4x1x34xf32> to vector<4x1x34xf32>
    %41 = vector.shape_cast %40 : vector<4x1x34xf32> to vector<4x34xf32>
    %42 = vector.extract_strided_slice %41 {offsets = [0, 0], sizes = [4, 32], strides = [1, 1]} : vector<4x34xf32> to vector<4x32xf32>
    %cst_46 = arith.constant dense<0.000000e+00> : vector<16x32xf32>
    %43 = tpu.matmul %9, %42, %cst_46 {dimension_numbers = #tpu.dot_dimension_numbers<[1], [0], [0], [1], [0, 0, 1, 1], [], []>} : vector<16x4xf32>, vector<4x32xf32>, vector<16x32xf32> -> vector<16x32xf32>
    %44 = arith.addf %35, %43 : vector<16x32xf32>
    %45 = vector.extract_strided_slice %41 {offsets = [0, 1], sizes = [4, 32], strides = [1, 1]} : vector<4x34xf32> to vector<4x32xf32>
    %cst_47 = arith.constant dense<0.000000e+00> : vector<16x32xf32>
    %46 = tpu.matmul %11, %45, %cst_47 {dimension_numbers = #tpu.dot_dimension_numbers<[1], [0], [0], [1], [0, 0, 1, 1], [], []>} : vector<16x4xf32>, vector<4x32xf32>, vector<16x32xf32> -> vector<16x32xf32>
    %47 = arith.addf %44, %46 : vector<16x32xf32>
    %48 = vector.extract_strided_slice %41 {offsets = [0, 2], sizes = [4, 32], strides = [1, 1]} : vector<4x34xf32> to vector<4x32xf32>
    %cst_48 = arith.constant dense<0.000000e+00> : vector<16x32xf32>
    %49 = tpu.matmul %13, %48, %cst_48 {dimension_numbers = #tpu.dot_dimension_numbers<[1], [0], [0], [1], [0, 0, 1, 1], [], []>} : vector<16x4xf32>, vector<4x32xf32>, vector<16x32xf32> -> vector<16x32xf32>
    %50 = arith.addf %47, %49 : vector<16x32xf32>
    %c0_i32_49 = arith.constant 0 : i32
    %51 = arith.addi %0, %c0_i32_49 : i32
    %c2_i32 = arith.constant 2 : i32
    %52 = arith.addi %51, %c2_i32 : i32
    %c0_50 = arith.constant 0 : index
    %c0_51 = arith.constant 0 : index
    %53 = arith.index_cast %52 : i32 to index
    %c0_52 = arith.constant 0 : index
    %54 = vector.load %arg2[%c0_50, %c0_51, %53, %c0_52] : memref<1x4x18x34xf32, #tpu.memory_space<vmem>>, vector<1x4x1x34xf32>
    %55 = vector.shape_cast %54 : vector<1x4x1x34xf32> to vector<4x1x34xf32>
    %56 = vector.shape_cast %55 : vector<4x1x34xf32> to vector<4x34xf32>
    %57 = vector.extract_strided_slice %56 {offsets = [0, 0], sizes = [4, 32], strides = [1, 1]} : vector<4x34xf32> to vector<4x32xf32>
    %cst_53 = arith.constant dense<0.000000e+00> : vector<16x32xf32>
    %58 = tpu.matmul %15, %57, %cst_53 {dimension_numbers = #tpu.dot_dimension_numbers<[1], [0], [0], [1], [0, 0, 1, 1], [], []>} : vector<16x4xf32>, vector<4x32xf32>, vector<16x32xf32> -> vector<16x32xf32>
    %59 = arith.addf %50, %58 : vector<16x32xf32>
    %60 = vector.extract_strided_slice %56 {offsets = [0, 1], sizes = [4, 32], strides = [1, 1]} : vector<4x34xf32> to vector<4x32xf32>
    %cst_54 = arith.constant dense<0.000000e+00> : vector<16x32xf32>
    %61 = tpu.matmul %17, %60, %cst_54 {dimension_numbers = #tpu.dot_dimension_numbers<[1], [0], [0], [1], [0, 0, 1, 1], [], []>} : vector<16x4xf32>, vector<4x32xf32>, vector<16x32xf32> -> vector<16x32xf32>
    %62 = arith.addf %59, %61 : vector<16x32xf32>
    %63 = vector.extract_strided_slice %56 {offsets = [0, 2], sizes = [4, 32], strides = [1, 1]} : vector<4x34xf32> to vector<4x32xf32>
    %cst_55 = arith.constant dense<0.000000e+00> : vector<16x32xf32>
    %64 = tpu.matmul %19, %63, %cst_55 {dimension_numbers = #tpu.dot_dimension_numbers<[1], [0], [0], [1], [0, 0, 1, 1], [], []>} : vector<16x4xf32>, vector<4x32xf32>, vector<16x32xf32> -> vector<16x32xf32>
    %65 = arith.addf %62, %64 : vector<16x32xf32>
    %66 = vector.broadcast %1 : vector<16x1xf32> to vector<16x32xf32>
    %67 = arith.addf %65, %66 : vector<16x32xf32>
    %cst_56 = arith.constant 0.000000e+00 : f32
    %68 = vector.broadcast %cst_56 : f32 to vector<16x32xf32>
    %69 = arith.maximumf %67, %68 : vector<16x32xf32>
    %70 = vector.extract_strided_slice %69 {offsets = [0, 0], sizes = [8, 32], strides = [1, 1]} : vector<16x32xf32> to vector<8x32xf32>
    %c0_57 = arith.constant 0 : index
    %c0_58 = arith.constant 0 : index
    %c0_59 = arith.constant 0 : index
    %c0_60 = arith.constant 0 : index
    %71 = vector.load %arg5[%c0_57, %c0_58, %c0_59, %c0_60] : memref<1x8x16x32xf32, #tpu.memory_space<vmem>>, vector<1x8x1x32xf32>
    %72 = vector.shape_cast %71 : vector<1x8x1x32xf32> to vector<8x32xf32>
    %73 = vector.shape_cast %70 : vector<8x32xf32> to vector<1x8x1x32xf32>
    tpu.vector_store %arg5[%c0_57, %c0_58, %c0_59, %c0_60], %73 {strides = array<i32>} : memref<1x8x16x32xf32, #tpu.memory_space<vmem>>, vector<1x8x1x32xf32>,
    %74 = vector.extract_strided_slice %69 {offsets = [8, 0], sizes = [8, 32], strides = [1, 1]} : vector<16x32xf32> to vector<8x32xf32>
    %c0_61 = arith.constant 0 : index
    %c0_62 = arith.constant 0 : index
    %c1_63 = arith.constant 1 : index
    %c0_64 = arith.constant 0 : index
    %75 = vector.load %arg5[%c0_61, %c0_62, %c1_63, %c0_64] : memref<1x8x16x32xf32, #tpu.memory_space<vmem>>, vector<1x8x1x32xf32>
    %76 = vector.shape_cast %75 : vector<1x8x1x32xf32> to vector<8x32xf32>
    %77 = vector.shape_cast %74 : vector<8x32xf32> to vector<1x8x1x32xf32>
    tpu.vector_store %arg5[%c0_61, %c0_62, %c1_63, %c0_64], %77 {strides = array<i32>} : memref<1x8x16x32xf32, #tpu.memory_space<vmem>>, vector<1x8x1x32xf32>,
    %cst_65 = arith.constant 0.000000e+00 : f32
    %78 = vector.broadcast %cst_65 : f32 to vector<16x32xf32>
    %c1_i32_66 = arith.constant 1 : i32
    %79 = arith.addi %0, %c1_i32_66 : i32
    %c0_i32_67 = arith.constant 0 : i32
    %80 = arith.addi %79, %c0_i32_67 : i32
    %c0_68 = arith.constant 0 : index
    %c0_69 = arith.constant 0 : index
    %81 = arith.index_cast %80 : i32 to index
    %c0_70 = arith.constant 0 : index
    %82 = vector.load %arg2[%c0_68, %c0_69, %81, %c0_70] : memref<1x4x18x34xf32, #tpu.memory_space<vmem>>, vector<1x4x1x34xf32>
    %83 = vector.shape_cast %82 : vector<1x4x1x34xf32> to vector<4x1x34xf32>
    %84 = vector.shape_cast %83 : vector<4x1x34xf32> to vector<4x34xf32>
    %85 = vector.extract_strided_slice %84 {offsets = [0, 0], sizes = [4, 32], strides = [1, 1]} : vector<4x34xf32> to vector<4x32xf32>
    %cst_71 = arith.constant dense<0.000000e+00> : vector<16x32xf32>
    %86 = tpu.matmul %3, %85, %cst_71 {dimension_numbers = #tpu.dot_dimension_numbers<[1], [0], [0], [1], [0, 0, 1, 1], [], []>} : vector<16x4xf32>, vector<4x32xf32>, vector<16x32xf32> -> vector<16x32xf32>
    %87 = arith.addf %78, %86 : vector<16x32xf32>
    %88 = vector.extract_strided_slice %84 {offsets = [0, 1], sizes = [4, 32], strides = [1, 1]} : vector<4x34xf32> to vector<4x32xf32>
    %cst_72 = arith.constant dense<0.000000e+00> : vector<16x32xf32>
    %89 = tpu.matmul %5, %88, %cst_72 {dimension_numbers = #tpu.dot_dimension_numbers<[1], [0], [0], [1], [0, 0, 1, 1], [], []>} : vector<16x4xf32>, vector<4x32xf32>, vector<16x32xf32> -> vector<16x32xf32>
    %90 = arith.addf %87, %89 : vector<16x32xf32>
    %91 = vector.extract_strided_slice %84 {offsets = [0, 2], sizes = [4, 32], strides = [1, 1]} : vector<4x34xf32> to vector<4x32xf32>
    %cst_73 = arith.constant dense<0.000000e+00> : vector<16x32xf32>
    %92 = tpu.matmul %7, %91, %cst_73 {dimension_numbers = #tpu.dot_dimension_numbers<[1], [0], [0], [1], [0, 0, 1, 1], [], []>} : vector<16x4xf32>, vector<4x32xf32>, vector<16x32xf32> -> vector<16x32xf32>
    %93 = arith.addf %90, %92 : vector<16x32xf32>
    %c1_i32_74 = arith.constant 1 : i32
    %94 = arith.addi %0, %c1_i32_74 : i32
    %c1_i32_75 = arith.constant 1 : i32
    %95 = arith.addi %94, %c1_i32_75 : i32
    %c0_76 = arith.constant 0 : index
    %c0_77 = arith.constant 0 : index
    %96 = arith.index_cast %95 : i32 to index
    %c0_78 = arith.constant 0 : index
    %97 = vector.load %arg2[%c0_76, %c0_77, %96, %c0_78] : memref<1x4x18x34xf32, #tpu.memory_space<vmem>>, vector<1x4x1x34xf32>
    %98 = vector.shape_cast %97 : vector<1x4x1x34xf32> to vector<4x1x34xf32>
    %99 = vector.shape_cast %98 : vector<4x1x34xf32> to vector<4x34xf32>
    %100 = vector.extract_strided_slice %99 {offsets = [0, 0], sizes = [4, 32], strides = [1, 1]} : vector<4x34xf32> to vector<4x32xf32>
    %cst_79 = arith.constant dense<0.000000e+00> : vector<16x32xf32>
    %101 = tpu.matmul %9, %100, %cst_79 {dimension_numbers = #tpu.dot_dimension_numbers<[1], [0], [0], [1], [0, 0, 1, 1], [], []>} : vector<16x4xf32>, vector<4x32xf32>, vector<16x32xf32> -> vector<16x32xf32>
    %102 = arith.addf %93, %101 : vector<16x32xf32>
    %103 = vector.extract_strided_slice %99 {offsets = [0, 1], sizes = [4, 32], strides = [1, 1]} : vector<4x34xf32> to vector<4x32xf32>
    %cst_80 = arith.constant dense<0.000000e+00> : vector<16x32xf32>
    %104 = tpu.matmul %11, %103, %cst_80 {dimension_numbers = #tpu.dot_dimension_numbers<[1], [0], [0], [1], [0, 0, 1, 1], [], []>} : vector<16x4xf32>, vector<4x32xf32>, vector<16x32xf32> -> vector<16x32xf32>
    %105 = arith.addf %102, %104 : vector<16x32xf32>
    %106 = vector.extract_strided_slice %99 {offsets = [0, 2], sizes = [4, 32], strides = [1, 1]} : vector<4x34xf32> to vector<4x32xf32>
    %cst_81 = arith.constant dense<0.000000e+00> : vector<16x32xf32>
    %107 = tpu.matmul %13, %106, %cst_81 {dimension_numbers = #tpu.dot_dimension_numbers<[1], [0], [0], [1], [0, 0, 1, 1], [], []>} : vector<16x4xf32>, vector<4x32xf32>, vector<16x32xf32> -> vector<16x32xf32>
    %108 = arith.addf %105, %107 : vector<16x32xf32>
    %c1_i32_82 = arith.constant 1 : i32
    %109 = arith.addi %0, %c1_i32_82 : i32
    %c2_i32_83 = arith.constant 2 : i32
    %110 = arith.addi %109, %c2_i32_83 : i32
    %c0_84 = arith.constant 0 : index
    %c0_85 = arith.constant 0 : index
    %111 = arith.index_cast %110 : i32 to index
    %c0_86 = arith.constant 0 : index
    %112 = vector.load %arg2[%c0_84, %c0_85, %111, %c0_86] : memref<1x4x18x34xf32, #tpu.memory_space<vmem>>, vector<1x4x1x34xf32>
    %113 = vector.shape_cast %112 : vector<1x4x1x34xf32> to vector<4x1x34xf32>
    %114 = vector.shape_cast %113 : vector<4x1x34xf32> to vector<4x34xf32>
    %115 = vector.extract_strided_slice %114 {offsets = [0, 0], sizes = [4, 32], strides = [1, 1]} : vector<4x34xf32> to vector<4x32xf32>
    %cst_87 = arith.constant dense<0.000000e+00> : vector<16x32xf32>
    %116 = tpu.matmul %15, %115, %cst_87 {dimension_numbers = #tpu.dot_dimension_numbers<[1], [0], [0], [1], [0, 0, 1, 1], [], []>} : vector<16x4xf32>, vector<4x32xf32>, vector<16x32xf32> -> vector<16x32xf32>
    %117 = arith.addf %108, %116 : vector<16x32xf32>
    %118 = vector.extract_strided_slice %114 {offsets = [0, 1], sizes = [4, 32], strides = [1, 1]} : vector<4x34xf32> to vector<4x32xf32>
    %cst_88 = arith.constant dense<0.000000e+00> : vector<16x32xf32>
    %119 = tpu.matmul %17, %118, %cst_88 {dimension_numbers = #tpu.dot_dimension_numbers<[1], [0], [0], [1], [0, 0, 1, 1], [], []>} : vector<16x4xf32>, vector<4x32xf32>, vector<16x32xf32> -> vector<16x32xf32>
    %120 = arith.addf %117, %119 : vector<16x32xf32>
    %121 = vector.extract_strided_slice %114 {offsets = [0, 2], sizes = [4, 32], strides = [1, 1]} : vector<4x34xf32> to vector<4x32xf32>
    %cst_89 = arith.constant dense<0.000000e+00> : vector<16x32xf32>
    %122 = tpu.matmul %19, %121, %cst_89 {dimension_numbers = #tpu.dot_dimension_numbers<[1], [0], [0], [1], [0, 0, 1, 1], [], []>} : vector<16x4xf32>, vector<4x32xf32>, vector<16x32xf32> -> vector<16x32xf32>
    %123 = arith.addf %120, %122 : vector<16x32xf32>
    %124 = vector.broadcast %1 : vector<16x1xf32> to vector<16x32xf32>
    %125 = arith.addf %123, %124 : vector<16x32xf32>
    %cst_90 = arith.constant 0.000000e+00 : f32
    %126 = vector.broadcast %cst_90 : f32 to vector<16x32xf32>
    %127 = arith.maximumf %125, %126 : vector<16x32xf32>
    %128 = vector.extract_strided_slice %127 {offsets = [0, 0], sizes = [8, 32], strides = [1, 1]} : vector<16x32xf32> to vector<8x32xf32>
    %c0_91 = arith.constant 0 : index
    %c0_92 = arith.constant 0 : index
    %c2_93 = arith.constant 2 : index
    %c0_94 = arith.constant 0 : index
    %129 = vector.load %arg5[%c0_91, %c0_92, %c2_93, %c0_94] : memref<1x8x16x32xf32, #tpu.memory_space<vmem>>, vector<1x8x1x32xf32>
    %130 = vector.shape_cast %129 : vector<1x8x1x32xf32> to vector<8x32xf32>
    %131 = vector.shape_cast %128 : vector<8x32xf32> to vector<1x8x1x32xf32>
    tpu.vector_store %arg5[%c0_91, %c0_92, %c2_93, %c0_94], %131 {strides = array<i32>} : memref<1x8x16x32xf32, #tpu.memory_space<vmem>>, vector<1x8x1x32xf32>,
    %132 = vector.extract_strided_slice %127 {offsets = [8, 0], sizes = [8, 32], strides = [1, 1]} : vector<16x32xf32> to vector<8x32xf32>
    %c0_95 = arith.constant 0 : index
    %c0_96 = arith.constant 0 : index
    %c3 = arith.constant 3 : index
    %c0_97 = arith.constant 0 : index
    %133 = vector.load %arg5[%c0_95, %c0_96, %c3, %c0_97] : memref<1x8x16x32xf32, #tpu.memory_space<vmem>>, vector<1x8x1x32xf32>
    %134 = vector.shape_cast %133 : vector<1x8x1x32xf32> to vector<8x32xf32>
    %135 = vector.shape_cast %132 : vector<8x32xf32> to vector<1x8x1x32xf32>
    tpu.vector_store %arg5[%c0_95, %c0_96, %c3, %c0_97], %135 {strides = array<i32>} : memref<1x8x16x32xf32, #tpu.memory_space<vmem>>, vector<1x8x1x32xf32>,
    %cst_98 = arith.constant 0.000000e+00 : f32
    %136 = vector.broadcast %cst_98 : f32 to vector<16x32xf32>
    %c2_i32_99 = arith.constant 2 : i32
    %137 = arith.addi %0, %c2_i32_99 : i32
    %c0_i32_100 = arith.constant 0 : i32
    %138 = arith.addi %137, %c0_i32_100 : i32
    %c0_101 = arith.constant 0 : index
    %c0_102 = arith.constant 0 : index
    %139 = arith.index_cast %138 : i32 to index
    %c0_103 = arith.constant 0 : index
    %140 = vector.load %arg2[%c0_101, %c0_102, %139, %c0_103] : memref<1x4x18x34xf32, #tpu.memory_space<vmem>>, vector<1x4x1x34xf32>
    %141 = vector.shape_cast %140 : vector<1x4x1x34xf32> to vector<4x1x34xf32>
    %142 = vector.shape_cast %141 : vector<4x1x34xf32> to vector<4x34xf32>
    %143 = vector.extract_strided_slice %142 {offsets = [0, 0], sizes = [4, 32], strides = [1, 1]} : vector<4x34xf32> to vector<4x32xf32>
    %cst_104 = arith.constant dense<0.000000e+00> : vector<16x32xf32>
    %144 = tpu.matmul %3, %143, %cst_104 {dimension_numbers = #tpu.dot_dimension_numbers<[1], [0], [0], [1], [0, 0, 1, 1], [], []>} : vector<16x4xf32>, vector<4x32xf32>, vector<16x32xf32> -> vector<16x32xf32>
    %145 = arith.addf %136, %144 : vector<16x32xf32>
    %146 = vector.extract_strided_slice %142 {offsets = [0, 1], sizes = [4, 32], strides = [1, 1]} : vector<4x34xf32> to vector<4x32xf32>
    %cst_105 = arith.constant dense<0.000000e+00> : vector<16x32xf32>
    %147 = tpu.matmul %5, %146, %cst_105 {dimension_numbers = #tpu.dot_dimension_numbers<[1], [0], [0], [1], [0, 0, 1, 1], [], []>} : vector<16x4xf32>, vector<4x32xf32>, vector<16x32xf32> -> vector<16x32xf32>
    %148 = arith.addf %145, %147 : vector<16x32xf32>
    %149 = vector.extract_strided_slice %142 {offsets = [0, 2], sizes = [4, 32], strides = [1, 1]} : vector<4x34xf32> to vector<4x32xf32>
    %cst_106 = arith.constant dense<0.000000e+00> : vector<16x32xf32>
    %150 = tpu.matmul %7, %149, %cst_106 {dimension_numbers = #tpu.dot_dimension_numbers<[1], [0], [0], [1], [0, 0, 1, 1], [], []>} : vector<16x4xf32>, vector<4x32xf32>, vector<16x32xf32> -> vector<16x32xf32>
    %151 = arith.addf %148, %150 : vector<16x32xf32>
    %c2_i32_107 = arith.constant 2 : i32
    %152 = arith.addi %0, %c2_i32_107 : i32
    %c1_i32_108 = arith.constant 1 : i32
    %153 = arith.addi %152, %c1_i32_108 : i32
    %c0_109 = arith.constant 0 : index
    %c0_110 = arith.constant 0 : index
    %154 = arith.index_cast %153 : i32 to index
    %c0_111 = arith.constant 0 : index
    %155 = vector.load %arg2[%c0_109, %c0_110, %154, %c0_111] : memref<1x4x18x34xf32, #tpu.memory_space<vmem>>, vector<1x4x1x34xf32>
    %156 = vector.shape_cast %155 : vector<1x4x1x34xf32> to vector<4x1x34xf32>
    %157 = vector.shape_cast %156 : vector<4x1x34xf32> to vector<4x34xf32>
    %158 = vector.extract_strided_slice %157 {offsets = [0, 0], sizes = [4, 32], strides = [1, 1]} : vector<4x34xf32> to vector<4x32xf32>
    %cst_112 = arith.constant dense<0.000000e+00> : vector<16x32xf32>
    %159 = tpu.matmul %9, %158, %cst_112 {dimension_numbers = #tpu.dot_dimension_numbers<[1], [0], [0], [1], [0, 0, 1, 1], [], []>} : vector<16x4xf32>, vector<4x32xf32>, vector<16x32xf32> -> vector<16x32xf32>
    %160 = arith.addf %151, %159 : vector<16x32xf32>
    %161 = vector.extract_strided_slice %157 {offsets = [0, 1], sizes = [4, 32], strides = [1, 1]} : vector<4x34xf32> to vector<4x32xf32>
    %cst_113 = arith.constant dense<0.000000e+00> : vector<16x32xf32>
    %162 = tpu.matmul %11, %161, %cst_113 {dimension_numbers = #tpu.dot_dimension_numbers<[1], [0], [0], [1], [0, 0, 1, 1], [], []>} : vector<16x4xf32>, vector<4x32xf32>, vector<16x32xf32> -> vector<16x32xf32>
    %163 = arith.addf %160, %162 : vector<16x32xf32>
    %164 = vector.extract_strided_slice %157 {offsets = [0, 2], sizes = [4, 32], strides = [1, 1]} : vector<4x34xf32> to vector<4x32xf32>
    %cst_114 = arith.constant dense<0.000000e+00> : vector<16x32xf32>
    %165 = tpu.matmul %13, %164, %cst_114 {dimension_numbers = #tpu.dot_dimension_numbers<[1], [0], [0], [1], [0, 0, 1, 1], [], []>} : vector<16x4xf32>, vector<4x32xf32>, vector<16x32xf32> -> vector<16x32xf32>
    %166 = arith.addf %163, %165 : vector<16x32xf32>
    %c2_i32_115 = arith.constant 2 : i32
    %167 = arith.addi %0, %c2_i32_115 : i32
    %c2_i32_116 = arith.constant 2 : i32
    %168 = arith.addi %167, %c2_i32_116 : i32
    %c0_117 = arith.constant 0 : index
    %c0_118 = arith.constant 0 : index
    %169 = arith.index_cast %168 : i32 to index
    %c0_119 = arith.constant 0 : index
    %170 = vector.load %arg2[%c0_117, %c0_118, %169, %c0_119] : memref<1x4x18x34xf32, #tpu.memory_space<vmem>>, vector<1x4x1x34xf32>
    %171 = vector.shape_cast %170 : vector<1x4x1x34xf32> to vector<4x1x34xf32>
    %172 = vector.shape_cast %171 : vector<4x1x34xf32> to vector<4x34xf32>
    %173 = vector.extract_strided_slice %172 {offsets = [0, 0], sizes = [4, 32], strides = [1, 1]} : vector<4x34xf32> to vector<4x32xf32>
    %cst_120 = arith.constant dense<0.000000e+00> : vector<16x32xf32>
    %174 = tpu.matmul %15, %173, %cst_120 {dimension_numbers = #tpu.dot_dimension_numbers<[1], [0], [0], [1], [0, 0, 1, 1], [], []>} : vector<16x4xf32>, vector<4x32xf32>, vector<16x32xf32> -> vector<16x32xf32>
    %175 = arith.addf %166, %174 : vector<16x32xf32>
    %176 = vector.extract_strided_slice %172 {offsets = [0, 1], sizes = [4, 32], strides = [1, 1]} : vector<4x34xf32> to vector<4x32xf32>
    %cst_121 = arith.constant dense<0.000000e+00> : vector<16x32xf32>
    %177 = tpu.matmul %17, %176, %cst_121 {dimension_numbers = #tpu.dot_dimension_numbers<[1], [0], [0], [1], [0, 0, 1, 1], [], []>} : vector<16x4xf32>, vector<4x32xf32>, vector<16x32xf32> -> vector<16x32xf32>
    %178 = arith.addf %175, %177 : vector<16x32xf32>
    %179 = vector.extract_strided_slice %172 {offsets = [0, 2], sizes = [4, 32], strides = [1, 1]} : vector<4x34xf32> to vector<4x32xf32>
    %cst_122 = arith.constant dense<0.000000e+00> : vector<16x32xf32>
    %180 = tpu.matmul %19, %179, %cst_122 {dimension_numbers = #tpu.dot_dimension_numbers<[1], [0], [0], [1], [0, 0, 1, 1], [], []>} : vector<16x4xf32>, vector<4x32xf32>, vector<16x32xf32> -> vector<16x32xf32>
    %181 = arith.addf %178, %180 : vector<16x32xf32>
    %182 = vector.broadcast %1 : vector<16x1xf32> to vector<16x32xf32>
    %183 = arith.addf %181, %182 : vector<16x32xf32>
    %cst_123 = arith.constant 0.000000e+00 : f32
    %184 = vector.broadcast %cst_123 : f32 to vector<16x32xf32>
    %185 = arith.maximumf %183, %184 : vector<16x32xf32>
    %186 = vector.extract_strided_slice %185 {offsets = [0, 0], sizes = [8, 32], strides = [1, 1]} : vector<16x32xf32> to vector<8x32xf32>
    %c0_124 = arith.constant 0 : index
    %c0_125 = arith.constant 0 : index
    %c4 = arith.constant 4 : index
    %c0_126 = arith.constant 0 : index
    %187 = vector.load %arg5[%c0_124, %c0_125, %c4, %c0_126] : memref<1x8x16x32xf32, #tpu.memory_space<vmem>>, vector<1x8x1x32xf32>
    %188 = vector.shape_cast %187 : vector<1x8x1x32xf32> to vector<8x32xf32>
    %189 = vector.shape_cast %186 : vector<8x32xf32> to vector<1x8x1x32xf32>
    tpu.vector_store %arg5[%c0_124, %c0_125, %c4, %c0_126], %189 {strides = array<i32>} : memref<1x8x16x32xf32, #tpu.memory_space<vmem>>, vector<1x8x1x32xf32>,
    %190 = vector.extract_strided_slice %185 {offsets = [8, 0], sizes = [8, 32], strides = [1, 1]} : vector<16x32xf32> to vector<8x32xf32>
    %c0_127 = arith.constant 0 : index
    %c0_128 = arith.constant 0 : index
    %c5 = arith.constant 5 : index
    %c0_129 = arith.constant 0 : index
    %191 = vector.load %arg5[%c0_127, %c0_128, %c5, %c0_129] : memref<1x8x16x32xf32, #tpu.memory_space<vmem>>, vector<1x8x1x32xf32>
    %192 = vector.shape_cast %191 : vector<1x8x1x32xf32> to vector<8x32xf32>
    %193 = vector.shape_cast %190 : vector<8x32xf32> to vector<1x8x1x32xf32>
    tpu.vector_store %arg5[%c0_127, %c0_128, %c5, %c0_129], %193 {strides = array<i32>} : memref<1x8x16x32xf32, #tpu.memory_space<vmem>>, vector<1x8x1x32xf32>,
    %cst_130 = arith.constant 0.000000e+00 : f32
    %194 = vector.broadcast %cst_130 : f32 to vector<16x32xf32>
    %c3_i32 = arith.constant 3 : i32
    %195 = arith.addi %0, %c3_i32 : i32
    %c0_i32_131 = arith.constant 0 : i32
    %196 = arith.addi %195, %c0_i32_131 : i32
    %c0_132 = arith.constant 0 : index
    %c0_133 = arith.constant 0 : index
    %197 = arith.index_cast %196 : i32 to index
    %c0_134 = arith.constant 0 : index
    %198 = vector.load %arg2[%c0_132, %c0_133, %197, %c0_134] : memref<1x4x18x34xf32, #tpu.memory_space<vmem>>, vector<1x4x1x34xf32>
    %199 = vector.shape_cast %198 : vector<1x4x1x34xf32> to vector<4x1x34xf32>
    %200 = vector.shape_cast %199 : vector<4x1x34xf32> to vector<4x34xf32>
    %201 = vector.extract_strided_slice %200 {offsets = [0, 0], sizes = [4, 32], strides = [1, 1]} : vector<4x34xf32> to vector<4x32xf32>
    %cst_135 = arith.constant dense<0.000000e+00> : vector<16x32xf32>
    %202 = tpu.matmul %3, %201, %cst_135 {dimension_numbers = #tpu.dot_dimension_numbers<[1], [0], [0], [1], [0, 0, 1, 1], [], []>} : vector<16x4xf32>, vector<4x32xf32>, vector<16x32xf32> -> vector<16x32xf32>
    %203 = arith.addf %194, %202 : vector<16x32xf32>
    %204 = vector.extract_strided_slice %200 {offsets = [0, 1], sizes = [4, 32], strides = [1, 1]} : vector<4x34xf32> to vector<4x32xf32>
    %cst_136 = arith.constant dense<0.000000e+00> : vector<16x32xf32>
    %205 = tpu.matmul %5, %204, %cst_136 {dimension_numbers = #tpu.dot_dimension_numbers<[1], [0], [0], [1], [0, 0, 1, 1], [], []>} : vector<16x4xf32>, vector<4x32xf32>, vector<16x32xf32> -> vector<16x32xf32>
    %206 = arith.addf %203, %205 : vector<16x32xf32>
    %207 = vector.extract_strided_slice %200 {offsets = [0, 2], sizes = [4, 32], strides = [1, 1]} : vector<4x34xf32> to vector<4x32xf32>
    %cst_137 = arith.constant dense<0.000000e+00> : vector<16x32xf32>
    %208 = tpu.matmul %7, %207, %cst_137 {dimension_numbers = #tpu.dot_dimension_numbers<[1], [0], [0], [1], [0, 0, 1, 1], [], []>} : vector<16x4xf32>, vector<4x32xf32>, vector<16x32xf32> -> vector<16x32xf32>
    %209 = arith.addf %206, %208 : vector<16x32xf32>
    %c3_i32_138 = arith.constant 3 : i32
    %210 = arith.addi %0, %c3_i32_138 : i32
    %c1_i32_139 = arith.constant 1 : i32
    %211 = arith.addi %210, %c1_i32_139 : i32
    %c0_140 = arith.constant 0 : index
    %c0_141 = arith.constant 0 : index
    %212 = arith.index_cast %211 : i32 to index
    %c0_142 = arith.constant 0 : index
    %213 = vector.load %arg2[%c0_140, %c0_141, %212, %c0_142] : memref<1x4x18x34xf32, #tpu.memory_space<vmem>>, vector<1x4x1x34xf32>
    %214 = vector.shape_cast %213 : vector<1x4x1x34xf32> to vector<4x1x34xf32>
    %215 = vector.shape_cast %214 : vector<4x1x34xf32> to vector<4x34xf32>
    %216 = vector.extract_strided_slice %215 {offsets = [0, 0], sizes = [4, 32], strides = [1, 1]} : vector<4x34xf32> to vector<4x32xf32>
    %cst_143 = arith.constant dense<0.000000e+00> : vector<16x32xf32>
    %217 = tpu.matmul %9, %216, %cst_143 {dimension_numbers = #tpu.dot_dimension_numbers<[1], [0], [0], [1], [0, 0, 1, 1], [], []>} : vector<16x4xf32>, vector<4x32xf32>, vector<16x32xf32> -> vector<16x32xf32>
    %218 = arith.addf %209, %217 : vector<16x32xf32>
    %219 = vector.extract_strided_slice %215 {offsets = [0, 1], sizes = [4, 32], strides = [1, 1]} : vector<4x34xf32> to vector<4x32xf32>
    %cst_144 = arith.constant dense<0.000000e+00> : vector<16x32xf32>
    %220 = tpu.matmul %11, %219, %cst_144 {dimension_numbers = #tpu.dot_dimension_numbers<[1], [0], [0], [1], [0, 0, 1, 1], [], []>} : vector<16x4xf32>, vector<4x32xf32>, vector<16x32xf32> -> vector<16x32xf32>
    %221 = arith.addf %218, %220 : vector<16x32xf32>
    %222 = vector.extract_strided_slice %215 {offsets = [0, 2], sizes = [4, 32], strides = [1, 1]} : vector<4x34xf32> to vector<4x32xf32>
    %cst_145 = arith.constant dense<0.000000e+00> : vector<16x32xf32>
    %223 = tpu.matmul %13, %222, %cst_145 {dimension_numbers = #tpu.dot_dimension_numbers<[1], [0], [0], [1], [0, 0, 1, 1], [], []>} : vector<16x4xf32>, vector<4x32xf32>, vector<16x32xf32> -> vector<16x32xf32>
    %224 = arith.addf %221, %223 : vector<16x32xf32>
    %c3_i32_146 = arith.constant 3 : i32
    %225 = arith.addi %0, %c3_i32_146 : i32
    %c2_i32_147 = arith.constant 2 : i32
    %226 = arith.addi %225, %c2_i32_147 : i32
    %c0_148 = arith.constant 0 : index
    %c0_149 = arith.constant 0 : index
    %227 = arith.index_cast %226 : i32 to index
    %c0_150 = arith.constant 0 : index
    %228 = vector.load %arg2[%c0_148, %c0_149, %227, %c0_150] : memref<1x4x18x34xf32, #tpu.memory_space<vmem>>, vector<1x4x1x34xf32>
    %229 = vector.shape_cast %228 : vector<1x4x1x34xf32> to vector<4x1x34xf32>
    %230 = vector.shape_cast %229 : vector<4x1x34xf32> to vector<4x34xf32>
    %231 = vector.extract_strided_slice %230 {offsets = [0, 0], sizes = [4, 32], strides = [1, 1]} : vector<4x34xf32> to vector<4x32xf32>
    %cst_151 = arith.constant dense<0.000000e+00> : vector<16x32xf32>
    %232 = tpu.matmul %15, %231, %cst_151 {dimension_numbers = #tpu.dot_dimension_numbers<[1], [0], [0], [1], [0, 0, 1, 1], [], []>} : vector<16x4xf32>, vector<4x32xf32>, vector<16x32xf32> -> vector<16x32xf32>
    %233 = arith.addf %224, %232 : vector<16x32xf32>
    %234 = vector.extract_strided_slice %230 {offsets = [0, 1], sizes = [4, 32], strides = [1, 1]} : vector<4x34xf32> to vector<4x32xf32>
    %cst_152 = arith.constant dense<0.000000e+00> : vector<16x32xf32>
    %235 = tpu.matmul %17, %234, %cst_152 {dimension_numbers = #tpu.dot_dimension_numbers<[1], [0], [0], [1], [0, 0, 1, 1], [], []>} : vector<16x4xf32>, vector<4x32xf32>, vector<16x32xf32> -> vector<16x32xf32>
    %236 = arith.addf %233, %235 : vector<16x32xf32>
    %237 = vector.extract_strided_slice %230 {offsets = [0, 2], sizes = [4, 32], strides = [1, 1]} : vector<4x34xf32> to vector<4x32xf32>
    %cst_153 = arith.constant dense<0.000000e+00> : vector<16x32xf32>
    %238 = tpu.matmul %19, %237, %cst_153 {dimension_numbers = #tpu.dot_dimension_numbers<[1], [0], [0], [1], [0, 0, 1, 1], [], []>} : vector<16x4xf32>, vector<4x32xf32>, vector<16x32xf32> -> vector<16x32xf32>
    %239 = arith.addf %236, %238 : vector<16x32xf32>
    %240 = vector.broadcast %1 : vector<16x1xf32> to vector<16x32xf32>
    %241 = arith.addf %239, %240 : vector<16x32xf32>
    %cst_154 = arith.constant 0.000000e+00 : f32
    %242 = vector.broadcast %cst_154 : f32 to vector<16x32xf32>
    %243 = arith.maximumf %241, %242 : vector<16x32xf32>
    %244 = vector.extract_strided_slice %243 {offsets = [0, 0], sizes = [8, 32], strides = [1, 1]} : vector<16x32xf32> to vector<8x32xf32>
    %c0_155 = arith.constant 0 : index
    %c0_156 = arith.constant 0 : index
    %c6 = arith.constant 6 : index
    %c0_157 = arith.constant 0 : index
    %245 = vector.load %arg5[%c0_155, %c0_156, %c6, %c0_157] : memref<1x8x16x32xf32, #tpu.memory_space<vmem>>, vector<1x8x1x32xf32>
    %246 = vector.shape_cast %245 : vector<1x8x1x32xf32> to vector<8x32xf32>
    %247 = vector.shape_cast %244 : vector<8x32xf32> to vector<1x8x1x32xf32>
    tpu.vector_store %arg5[%c0_155, %c0_156, %c6, %c0_157], %247 {strides = array<i32>} : memref<1x8x16x32xf32, #tpu.memory_space<vmem>>, vector<1x8x1x32xf32>,
    %248 = vector.extract_strided_slice %243 {offsets = [8, 0], sizes = [8, 32], strides = [1, 1]} : vector<16x32xf32> to vector<8x32xf32>
    %c0_158 = arith.constant 0 : index
    %c0_159 = arith.constant 0 : index
    %c7 = arith.constant 7 : index
    %c0_160 = arith.constant 0 : index
    %249 = vector.load %arg5[%c0_158, %c0_159, %c7, %c0_160] : memref<1x8x16x32xf32, #tpu.memory_space<vmem>>, vector<1x8x1x32xf32>
    %250 = vector.shape_cast %249 : vector<1x8x1x32xf32> to vector<8x32xf32>
    %251 = vector.shape_cast %248 : vector<8x32xf32> to vector<1x8x1x32xf32>
    tpu.vector_store %arg5[%c0_158, %c0_159, %c7, %c0_160], %251 {strides = array<i32>} : memref<1x8x16x32xf32, #tpu.memory_space<vmem>>, vector<1x8x1x32xf32>,
    %cst_161 = arith.constant 0.000000e+00 : f32
    %252 = vector.broadcast %cst_161 : f32 to vector<16x32xf32>
    %c4_i32 = arith.constant 4 : i32
    %253 = arith.addi %0, %c4_i32 : i32
    %c0_i32_162 = arith.constant 0 : i32
    %254 = arith.addi %253, %c0_i32_162 : i32
    %c0_163 = arith.constant 0 : index
    %c0_164 = arith.constant 0 : index
    %255 = arith.index_cast %254 : i32 to index
    %c0_165 = arith.constant 0 : index
    %256 = vector.load %arg2[%c0_163, %c0_164, %255, %c0_165] : memref<1x4x18x34xf32, #tpu.memory_space<vmem>>, vector<1x4x1x34xf32>
    %257 = vector.shape_cast %256 : vector<1x4x1x34xf32> to vector<4x1x34xf32>
    %258 = vector.shape_cast %257 : vector<4x1x34xf32> to vector<4x34xf32>
    %259 = vector.extract_strided_slice %258 {offsets = [0, 0], sizes = [4, 32], strides = [1, 1]} : vector<4x34xf32> to vector<4x32xf32>
    %cst_166 = arith.constant dense<0.000000e+00> : vector<16x32xf32>
    %260 = tpu.matmul %3, %259, %cst_166 {dimension_numbers = #tpu.dot_dimension_numbers<[1], [0], [0], [1], [0, 0, 1, 1], [], []>} : vector<16x4xf32>, vector<4x32xf32>, vector<16x32xf32> -> vector<16x32xf32>
    %261 = arith.addf %252, %260 : vector<16x32xf32>
    %262 = vector.extract_strided_slice %258 {offsets = [0, 1], sizes = [4, 32], strides = [1, 1]} : vector<4x34xf32> to vector<4x32xf32>
    %cst_167 = arith.constant dense<0.000000e+00> : vector<16x32xf32>
    %263 = tpu.matmul %5, %262, %cst_167 {dimension_numbers = #tpu.dot_dimension_numbers<[1], [0], [0], [1], [0, 0, 1, 1], [], []>} : vector<16x4xf32>, vector<4x32xf32>, vector<16x32xf32> -> vector<16x32xf32>
    %264 = arith.addf %261, %263 : vector<16x32xf32>
    %265 = vector.extract_strided_slice %258 {offsets = [0, 2], sizes = [4, 32], strides = [1, 1]} : vector<4x34xf32> to vector<4x32xf32>
    %cst_168 = arith.constant dense<0.000000e+00> : vector<16x32xf32>
    %266 = tpu.matmul %7, %265, %cst_168 {dimension_numbers = #tpu.dot_dimension_numbers<[1], [0], [0], [1], [0, 0, 1, 1], [], []>} : vector<16x4xf32>, vector<4x32xf32>, vector<16x32xf32> -> vector<16x32xf32>
    %267 = arith.addf %264, %266 : vector<16x32xf32>
    %c4_i32_169 = arith.constant 4 : i32
    %268 = arith.addi %0, %c4_i32_169 : i32
    %c1_i32_170 = arith.constant 1 : i32
    %269 = arith.addi %268, %c1_i32_170 : i32
    %c0_171 = arith.constant 0 : index
    %c0_172 = arith.constant 0 : index
    %270 = arith.index_cast %269 : i32 to index
    %c0_173 = arith.constant 0 : index
    %271 = vector.load %arg2[%c0_171, %c0_172, %270, %c0_173] : memref<1x4x18x34xf32, #tpu.memory_space<vmem>>, vector<1x4x1x34xf32>
    %272 = vector.shape_cast %271 : vector<1x4x1x34xf32> to vector<4x1x34xf32>
    %273 = vector.shape_cast %272 : vector<4x1x34xf32> to vector<4x34xf32>
    %274 = vector.extract_strided_slice %273 {offsets = [0, 0], sizes = [4, 32], strides = [1, 1]} : vector<4x34xf32> to vector<4x32xf32>
    %cst_174 = arith.constant dense<0.000000e+00> : vector<16x32xf32>
    %275 = tpu.matmul %9, %274, %cst_174 {dimension_numbers = #tpu.dot_dimension_numbers<[1], [0], [0], [1], [0, 0, 1, 1], [], []>} : vector<16x4xf32>, vector<4x32xf32>, vector<16x32xf32> -> vector<16x32xf32>
    %276 = arith.addf %267, %275 : vector<16x32xf32>
    %277 = vector.extract_strided_slice %273 {offsets = [0, 1], sizes = [4, 32], strides = [1, 1]} : vector<4x34xf32> to vector<4x32xf32>
    %cst_175 = arith.constant dense<0.000000e+00> : vector<16x32xf32>
    %278 = tpu.matmul %11, %277, %cst_175 {dimension_numbers = #tpu.dot_dimension_numbers<[1], [0], [0], [1], [0, 0, 1, 1], [], []>} : vector<16x4xf32>, vector<4x32xf32>, vector<16x32xf32> -> vector<16x32xf32>
    %279 = arith.addf %276, %278 : vector<16x32xf32>
    %280 = vector.extract_strided_slice %273 {offsets = [0, 2], sizes = [4, 32], strides = [1, 1]} : vector<4x34xf32> to vector<4x32xf32>
    %cst_176 = arith.constant dense<0.000000e+00> : vector<16x32xf32>
    %281 = tpu.matmul %13, %280, %cst_176 {dimension_numbers = #tpu.dot_dimension_numbers<[1], [0], [0], [1], [0, 0, 1, 1], [], []>} : vector<16x4xf32>, vector<4x32xf32>, vector<16x32xf32> -> vector<16x32xf32>
    %282 = arith.addf %279, %281 : vector<16x32xf32>
    %c4_i32_177 = arith.constant 4 : i32
    %283 = arith.addi %0, %c4_i32_177 : i32
    %c2_i32_178 = arith.constant 2 : i32
    %284 = arith.addi %283, %c2_i32_178 : i32
    %c0_179 = arith.constant 0 : index
    %c0_180 = arith.constant 0 : index
    %285 = arith.index_cast %284 : i32 to index
    %c0_181 = arith.constant 0 : index
    %286 = vector.load %arg2[%c0_179, %c0_180, %285, %c0_181] : memref<1x4x18x34xf32, #tpu.memory_space<vmem>>, vector<1x4x1x34xf32>
    %287 = vector.shape_cast %286 : vector<1x4x1x34xf32> to vector<4x1x34xf32>
    %288 = vector.shape_cast %287 : vector<4x1x34xf32> to vector<4x34xf32>
    %289 = vector.extract_strided_slice %288 {offsets = [0, 0], sizes = [4, 32], strides = [1, 1]} : vector<4x34xf32> to vector<4x32xf32>
    %cst_182 = arith.constant dense<0.000000e+00> : vector<16x32xf32>
    %290 = tpu.matmul %15, %289, %cst_182 {dimension_numbers = #tpu.dot_dimension_numbers<[1], [0], [0], [1], [0, 0, 1, 1], [], []>} : vector<16x4xf32>, vector<4x32xf32>, vector<16x32xf32> -> vector<16x32xf32>
    %291 = arith.addf %282, %290 : vector<16x32xf32>
    %292 = vector.extract_strided_slice %288 {offsets = [0, 1], sizes = [4, 32], strides = [1, 1]} : vector<4x34xf32> to vector<4x32xf32>
    %cst_183 = arith.constant dense<0.000000e+00> : vector<16x32xf32>
    %293 = tpu.matmul %17, %292, %cst_183 {dimension_numbers = #tpu.dot_dimension_numbers<[1], [0], [0], [1], [0, 0, 1, 1], [], []>} : vector<16x4xf32>, vector<4x32xf32>, vector<16x32xf32> -> vector<16x32xf32>
    %294 = arith.addf %291, %293 : vector<16x32xf32>
    %295 = vector.extract_strided_slice %288 {offsets = [0, 2], sizes = [4, 32], strides = [1, 1]} : vector<4x34xf32> to vector<4x32xf32>
    %cst_184 = arith.constant dense<0.000000e+00> : vector<16x32xf32>
    %296 = tpu.matmul %19, %295, %cst_184 {dimension_numbers = #tpu.dot_dimension_numbers<[1], [0], [0], [1], [0, 0, 1, 1], [], []>} : vector<16x4xf32>, vector<4x32xf32>, vector<16x32xf32> -> vector<16x32xf32>
    %297 = arith.addf %294, %296 : vector<16x32xf32>
    %298 = vector.broadcast %1 : vector<16x1xf32> to vector<16x32xf32>
    %299 = arith.addf %297, %298 : vector<16x32xf32>
    %cst_185 = arith.constant 0.000000e+00 : f32
    %300 = vector.broadcast %cst_185 : f32 to vector<16x32xf32>
    %301 = arith.maximumf %299, %300 : vector<16x32xf32>
    %302 = vector.extract_strided_slice %301 {offsets = [0, 0], sizes = [8, 32], strides = [1, 1]} : vector<16x32xf32> to vector<8x32xf32>
    %c0_186 = arith.constant 0 : index
    %c0_187 = arith.constant 0 : index
    %c8 = arith.constant 8 : index
    %c0_188 = arith.constant 0 : index
    %303 = vector.load %arg5[%c0_186, %c0_187, %c8, %c0_188] : memref<1x8x16x32xf32, #tpu.memory_space<vmem>>, vector<1x8x1x32xf32>
    %304 = vector.shape_cast %303 : vector<1x8x1x32xf32> to vector<8x32xf32>
    %305 = vector.shape_cast %302 : vector<8x32xf32> to vector<1x8x1x32xf32>
    tpu.vector_store %arg5[%c0_186, %c0_187, %c8, %c0_188], %305 {strides = array<i32>} : memref<1x8x16x32xf32, #tpu.memory_space<vmem>>, vector<1x8x1x32xf32>,
    %306 = vector.extract_strided_slice %301 {offsets = [8, 0], sizes = [8, 32], strides = [1, 1]} : vector<16x32xf32> to vector<8x32xf32>
    %c0_189 = arith.constant 0 : index
    %c0_190 = arith.constant 0 : index
    %c9 = arith.constant 9 : index
    %c0_191 = arith.constant 0 : index
    %307 = vector.load %arg5[%c0_189, %c0_190, %c9, %c0_191] : memref<1x8x16x32xf32, #tpu.memory_space<vmem>>, vector<1x8x1x32xf32>
    %308 = vector.shape_cast %307 : vector<1x8x1x32xf32> to vector<8x32xf32>
    %309 = vector.shape_cast %306 : vector<8x32xf32> to vector<1x8x1x32xf32>
    tpu.vector_store %arg5[%c0_189, %c0_190, %c9, %c0_191], %309 {strides = array<i32>} : memref<1x8x16x32xf32, #tpu.memory_space<vmem>>, vector<1x8x1x32xf32>,
    %cst_192 = arith.constant 0.000000e+00 : f32
    %310 = vector.broadcast %cst_192 : f32 to vector<16x32xf32>
    %c5_i32 = arith.constant 5 : i32
    %311 = arith.addi %0, %c5_i32 : i32
    %c0_i32_193 = arith.constant 0 : i32
    %312 = arith.addi %311, %c0_i32_193 : i32
    %c0_194 = arith.constant 0 : index
    %c0_195 = arith.constant 0 : index
    %313 = arith.index_cast %312 : i32 to index
    %c0_196 = arith.constant 0 : index
    %314 = vector.load %arg2[%c0_194, %c0_195, %313, %c0_196] : memref<1x4x18x34xf32, #tpu.memory_space<vmem>>, vector<1x4x1x34xf32>
    %315 = vector.shape_cast %314 : vector<1x4x1x34xf32> to vector<4x1x34xf32>
    %316 = vector.shape_cast %315 : vector<4x1x34xf32> to vector<4x34xf32>
    %317 = vector.extract_strided_slice %316 {offsets = [0, 0], sizes = [4, 32], strides = [1, 1]} : vector<4x34xf32> to vector<4x32xf32>
    %cst_197 = arith.constant dense<0.000000e+00> : vector<16x32xf32>
    %318 = tpu.matmul %3, %317, %cst_197 {dimension_numbers = #tpu.dot_dimension_numbers<[1], [0], [0], [1], [0, 0, 1, 1], [], []>} : vector<16x4xf32>, vector<4x32xf32>, vector<16x32xf32> -> vector<16x32xf32>
    %319 = arith.addf %310, %318 : vector<16x32xf32>
    %320 = vector.extract_strided_slice %316 {offsets = [0, 1], sizes = [4, 32], strides = [1, 1]} : vector<4x34xf32> to vector<4x32xf32>
    %cst_198 = arith.constant dense<0.000000e+00> : vector<16x32xf32>
    %321 = tpu.matmul %5, %320, %cst_198 {dimension_numbers = #tpu.dot_dimension_numbers<[1], [0], [0], [1], [0, 0, 1, 1], [], []>} : vector<16x4xf32>, vector<4x32xf32>, vector<16x32xf32> -> vector<16x32xf32>
    %322 = arith.addf %319, %321 : vector<16x32xf32>
    %323 = vector.extract_strided_slice %316 {offsets = [0, 2], sizes = [4, 32], strides = [1, 1]} : vector<4x34xf32> to vector<4x32xf32>
    %cst_199 = arith.constant dense<0.000000e+00> : vector<16x32xf32>
    %324 = tpu.matmul %7, %323, %cst_199 {dimension_numbers = #tpu.dot_dimension_numbers<[1], [0], [0], [1], [0, 0, 1, 1], [], []>} : vector<16x4xf32>, vector<4x32xf32>, vector<16x32xf32> -> vector<16x32xf32>
    %325 = arith.addf %322, %324 : vector<16x32xf32>
    %c5_i32_200 = arith.constant 5 : i32
    %326 = arith.addi %0, %c5_i32_200 : i32
    %c1_i32_201 = arith.constant 1 : i32
    %327 = arith.addi %326, %c1_i32_201 : i32
    %c0_202 = arith.constant 0 : index
    %c0_203 = arith.constant 0 : index
    %328 = arith.index_cast %327 : i32 to index
    %c0_204 = arith.constant 0 : index
    %329 = vector.load %arg2[%c0_202, %c0_203, %328, %c0_204] : memref<1x4x18x34xf32, #tpu.memory_space<vmem>>, vector<1x4x1x34xf32>
    %330 = vector.shape_cast %329 : vector<1x4x1x34xf32> to vector<4x1x34xf32>
    %331 = vector.shape_cast %330 : vector<4x1x34xf32> to vector<4x34xf32>
    %332 = vector.extract_strided_slice %331 {offsets = [0, 0], sizes = [4, 32], strides = [1, 1]} : vector<4x34xf32> to vector<4x32xf32>
    %cst_205 = arith.constant dense<0.000000e+00> : vector<16x32xf32>
    %333 = tpu.matmul %9, %332, %cst_205 {dimension_numbers = #tpu.dot_dimension_numbers<[1], [0], [0], [1], [0, 0, 1, 1], [], []>} : vector<16x4xf32>, vector<4x32xf32>, vector<16x32xf32> -> vector<16x32xf32>
    %334 = arith.addf %325, %333 : vector<16x32xf32>
    %335 = vector.extract_strided_slice %331 {offsets = [0, 1], sizes = [4, 32], strides = [1, 1]} : vector<4x34xf32> to vector<4x32xf32>
    %cst_206 = arith.constant dense<0.000000e+00> : vector<16x32xf32>
    %336 = tpu.matmul %11, %335, %cst_206 {dimension_numbers = #tpu.dot_dimension_numbers<[1], [0], [0], [1], [0, 0, 1, 1], [], []>} : vector<16x4xf32>, vector<4x32xf32>, vector<16x32xf32> -> vector<16x32xf32>
    %337 = arith.addf %334, %336 : vector<16x32xf32>
    %338 = vector.extract_strided_slice %331 {offsets = [0, 2], sizes = [4, 32], strides = [1, 1]} : vector<4x34xf32> to vector<4x32xf32>
    %cst_207 = arith.constant dense<0.000000e+00> : vector<16x32xf32>
    %339 = tpu.matmul %13, %338, %cst_207 {dimension_numbers = #tpu.dot_dimension_numbers<[1], [0], [0], [1], [0, 0, 1, 1], [], []>} : vector<16x4xf32>, vector<4x32xf32>, vector<16x32xf32> -> vector<16x32xf32>
    %340 = arith.addf %337, %339 : vector<16x32xf32>
    %c5_i32_208 = arith.constant 5 : i32
    %341 = arith.addi %0, %c5_i32_208 : i32
    %c2_i32_209 = arith.constant 2 : i32
    %342 = arith.addi %341, %c2_i32_209 : i32
    %c0_210 = arith.constant 0 : index
    %c0_211 = arith.constant 0 : index
    %343 = arith.index_cast %342 : i32 to index
    %c0_212 = arith.constant 0 : index
    %344 = vector.load %arg2[%c0_210, %c0_211, %343, %c0_212] : memref<1x4x18x34xf32, #tpu.memory_space<vmem>>, vector<1x4x1x34xf32>
    %345 = vector.shape_cast %344 : vector<1x4x1x34xf32> to vector<4x1x34xf32>
    %346 = vector.shape_cast %345 : vector<4x1x34xf32> to vector<4x34xf32>
    %347 = vector.extract_strided_slice %346 {offsets = [0, 0], sizes = [4, 32], strides = [1, 1]} : vector<4x34xf32> to vector<4x32xf32>
    %cst_213 = arith.constant dense<0.000000e+00> : vector<16x32xf32>
    %348 = tpu.matmul %15, %347, %cst_213 {dimension_numbers = #tpu.dot_dimension_numbers<[1], [0], [0], [1], [0, 0, 1, 1], [], []>} : vector<16x4xf32>, vector<4x32xf32>, vector<16x32xf32> -> vector<16x32xf32>
    %349 = arith.addf %340, %348 : vector<16x32xf32>
    %350 = vector.extract_strided_slice %346 {offsets = [0, 1], sizes = [4, 32], strides = [1, 1]} : vector<4x34xf32> to vector<4x32xf32>
    %cst_214 = arith.constant dense<0.000000e+00> : vector<16x32xf32>
    %351 = tpu.matmul %17, %350, %cst_214 {dimension_numbers = #tpu.dot_dimension_numbers<[1], [0], [0], [1], [0, 0, 1, 1], [], []>} : vector<16x4xf32>, vector<4x32xf32>, vector<16x32xf32> -> vector<16x32xf32>
    %352 = arith.addf %349, %351 : vector<16x32xf32>
    %353 = vector.extract_strided_slice %346 {offsets = [0, 2], sizes = [4, 32], strides = [1, 1]} : vector<4x34xf32> to vector<4x32xf32>
    %cst_215 = arith.constant dense<0.000000e+00> : vector<16x32xf32>
    %354 = tpu.matmul %19, %353, %cst_215 {dimension_numbers = #tpu.dot_dimension_numbers<[1], [0], [0], [1], [0, 0, 1, 1], [], []>} : vector<16x4xf32>, vector<4x32xf32>, vector<16x32xf32> -> vector<16x32xf32>
    %355 = arith.addf %352, %354 : vector<16x32xf32>
    %356 = vector.broadcast %1 : vector<16x1xf32> to vector<16x32xf32>
    %357 = arith.addf %355, %356 : vector<16x32xf32>
    %cst_216 = arith.constant 0.000000e+00 : f32
    %358 = vector.broadcast %cst_216 : f32 to vector<16x32xf32>
    %359 = arith.maximumf %357, %358 : vector<16x32xf32>
    %360 = vector.extract_strided_slice %359 {offsets = [0, 0], sizes = [8, 32], strides = [1, 1]} : vector<16x32xf32> to vector<8x32xf32>
    %c0_217 = arith.constant 0 : index
    %c0_218 = arith.constant 0 : index
    %c10 = arith.constant 10 : index
    %c0_219 = arith.constant 0 : index
    %361 = vector.load %arg5[%c0_217, %c0_218, %c10, %c0_219] : memref<1x8x16x32xf32, #tpu.memory_space<vmem>>, vector<1x8x1x32xf32>
    %362 = vector.shape_cast %361 : vector<1x8x1x32xf32> to vector<8x32xf32>
    %363 = vector.shape_cast %360 : vector<8x32xf32> to vector<1x8x1x32xf32>
    tpu.vector_store %arg5[%c0_217, %c0_218, %c10, %c0_219], %363 {strides = array<i32>} : memref<1x8x16x32xf32, #tpu.memory_space<vmem>>, vector<1x8x1x32xf32>,
    %364 = vector.extract_strided_slice %359 {offsets = [8, 0], sizes = [8, 32], strides = [1, 1]} : vector<16x32xf32> to vector<8x32xf32>
    %c0_220 = arith.constant 0 : index
    %c0_221 = arith.constant 0 : index
    %c11 = arith.constant 11 : index
    %c0_222 = arith.constant 0 : index
    %365 = vector.load %arg5[%c0_220, %c0_221, %c11, %c0_222] : memref<1x8x16x32xf32, #tpu.memory_space<vmem>>, vector<1x8x1x32xf32>
    %366 = vector.shape_cast %365 : vector<1x8x1x32xf32> to vector<8x32xf32>
    %367 = vector.shape_cast %364 : vector<8x32xf32> to vector<1x8x1x32xf32>
    tpu.vector_store %arg5[%c0_220, %c0_221, %c11, %c0_222], %367 {strides = array<i32>} : memref<1x8x16x32xf32, #tpu.memory_space<vmem>>, vector<1x8x1x32xf32>,
    %cst_223 = arith.constant 0.000000e+00 : f32
    %368 = vector.broadcast %cst_223 : f32 to vector<16x32xf32>
    %c6_i32 = arith.constant 6 : i32
    %369 = arith.addi %0, %c6_i32 : i32
    %c0_i32_224 = arith.constant 0 : i32
    %370 = arith.addi %369, %c0_i32_224 : i32
    %c0_225 = arith.constant 0 : index
    %c0_226 = arith.constant 0 : index
    %371 = arith.index_cast %370 : i32 to index
    %c0_227 = arith.constant 0 : index
    %372 = vector.load %arg2[%c0_225, %c0_226, %371, %c0_227] : memref<1x4x18x34xf32, #tpu.memory_space<vmem>>, vector<1x4x1x34xf32>
    %373 = vector.shape_cast %372 : vector<1x4x1x34xf32> to vector<4x1x34xf32>
    %374 = vector.shape_cast %373 : vector<4x1x34xf32> to vector<4x34xf32>
    %375 = vector.extract_strided_slice %374 {offsets = [0, 0], sizes = [4, 32], strides = [1, 1]} : vector<4x34xf32> to vector<4x32xf32>
    %cst_228 = arith.constant dense<0.000000e+00> : vector<16x32xf32>
    %376 = tpu.matmul %3, %375, %cst_228 {dimension_numbers = #tpu.dot_dimension_numbers<[1], [0], [0], [1], [0, 0, 1, 1], [], []>} : vector<16x4xf32>, vector<4x32xf32>, vector<16x32xf32> -> vector<16x32xf32>
    %377 = arith.addf %368, %376 : vector<16x32xf32>
    %378 = vector.extract_strided_slice %374 {offsets = [0, 1], sizes = [4, 32], strides = [1, 1]} : vector<4x34xf32> to vector<4x32xf32>
    %cst_229 = arith.constant dense<0.000000e+00> : vector<16x32xf32>
    %379 = tpu.matmul %5, %378, %cst_229 {dimension_numbers = #tpu.dot_dimension_numbers<[1], [0], [0], [1], [0, 0, 1, 1], [], []>} : vector<16x4xf32>, vector<4x32xf32>, vector<16x32xf32> -> vector<16x32xf32>
    %380 = arith.addf %377, %379 : vector<16x32xf32>
    %381 = vector.extract_strided_slice %374 {offsets = [0, 2], sizes = [4, 32], strides = [1, 1]} : vector<4x34xf32> to vector<4x32xf32>
    %cst_230 = arith.constant dense<0.000000e+00> : vector<16x32xf32>
    %382 = tpu.matmul %7, %381, %cst_230 {dimension_numbers = #tpu.dot_dimension_numbers<[1], [0], [0], [1], [0, 0, 1, 1], [], []>} : vector<16x4xf32>, vector<4x32xf32>, vector<16x32xf32> -> vector<16x32xf32>
    %383 = arith.addf %380, %382 : vector<16x32xf32>
    %c6_i32_231 = arith.constant 6 : i32
    %384 = arith.addi %0, %c6_i32_231 : i32
    %c1_i32_232 = arith.constant 1 : i32
    %385 = arith.addi %384, %c1_i32_232 : i32
    %c0_233 = arith.constant 0 : index
    %c0_234 = arith.constant 0 : index
    %386 = arith.index_cast %385 : i32 to index
    %c0_235 = arith.constant 0 : index
    %387 = vector.load %arg2[%c0_233, %c0_234, %386, %c0_235] : memref<1x4x18x34xf32, #tpu.memory_space<vmem>>, vector<1x4x1x34xf32>
    %388 = vector.shape_cast %387 : vector<1x4x1x34xf32> to vector<4x1x34xf32>
    %389 = vector.shape_cast %388 : vector<4x1x34xf32> to vector<4x34xf32>
    %390 = vector.extract_strided_slice %389 {offsets = [0, 0], sizes = [4, 32], strides = [1, 1]} : vector<4x34xf32> to vector<4x32xf32>
    %cst_236 = arith.constant dense<0.000000e+00> : vector<16x32xf32>
    %391 = tpu.matmul %9, %390, %cst_236 {dimension_numbers = #tpu.dot_dimension_numbers<[1], [0], [0], [1], [0, 0, 1, 1], [], []>} : vector<16x4xf32>, vector<4x32xf32>, vector<16x32xf32> -> vector<16x32xf32>
    %392 = arith.addf %383, %391 : vector<16x32xf32>
    %393 = vector.extract_strided_slice %389 {offsets = [0, 1], sizes = [4, 32], strides = [1, 1]} : vector<4x34xf32> to vector<4x32xf32>
    %cst_237 = arith.constant dense<0.000000e+00> : vector<16x32xf32>
    %394 = tpu.matmul %11, %393, %cst_237 {dimension_numbers = #tpu.dot_dimension_numbers<[1], [0], [0], [1], [0, 0, 1, 1], [], []>} : vector<16x4xf32>, vector<4x32xf32>, vector<16x32xf32> -> vector<16x32xf32>
    %395 = arith.addf %392, %394 : vector<16x32xf32>
    %396 = vector.extract_strided_slice %389 {offsets = [0, 2], sizes = [4, 32], strides = [1, 1]} : vector<4x34xf32> to vector<4x32xf32>
    %cst_238 = arith.constant dense<0.000000e+00> : vector<16x32xf32>
    %397 = tpu.matmul %13, %396, %cst_238 {dimension_numbers = #tpu.dot_dimension_numbers<[1], [0], [0], [1], [0, 0, 1, 1], [], []>} : vector<16x4xf32>, vector<4x32xf32>, vector<16x32xf32> -> vector<16x32xf32>
    %398 = arith.addf %395, %397 : vector<16x32xf32>
    %c6_i32_239 = arith.constant 6 : i32
    %399 = arith.addi %0, %c6_i32_239 : i32
    %c2_i32_240 = arith.constant 2 : i32
    %400 = arith.addi %399, %c2_i32_240 : i32
    %c0_241 = arith.constant 0 : index
    %c0_242 = arith.constant 0 : index
    %401 = arith.index_cast %400 : i32 to index
    %c0_243 = arith.constant 0 : index
    %402 = vector.load %arg2[%c0_241, %c0_242, %401, %c0_243] : memref<1x4x18x34xf32, #tpu.memory_space<vmem>>, vector<1x4x1x34xf32>
    %403 = vector.shape_cast %402 : vector<1x4x1x34xf32> to vector<4x1x34xf32>
    %404 = vector.shape_cast %403 : vector<4x1x34xf32> to vector<4x34xf32>
    %405 = vector.extract_strided_slice %404 {offsets = [0, 0], sizes = [4, 32], strides = [1, 1]} : vector<4x34xf32> to vector<4x32xf32>
    %cst_244 = arith.constant dense<0.000000e+00> : vector<16x32xf32>
    %406 = tpu.matmul %15, %405, %cst_244 {dimension_numbers = #tpu.dot_dimension_numbers<[1], [0], [0], [1], [0, 0, 1, 1], [], []>} : vector<16x4xf32>, vector<4x32xf32>, vector<16x32xf32> -> vector<16x32xf32>
    %407 = arith.addf %398, %406 : vector<16x32xf32>
    %408 = vector.extract_strided_slice %404 {offsets = [0, 1], sizes = [4, 32], strides = [1, 1]} : vector<4x34xf32> to vector<4x32xf32>
    %cst_245 = arith.constant dense<0.000000e+00> : vector<16x32xf32>
    %409 = tpu.matmul %17, %408, %cst_245 {dimension_numbers = #tpu.dot_dimension_numbers<[1], [0], [0], [1], [0, 0, 1, 1], [], []>} : vector<16x4xf32>, vector<4x32xf32>, vector<16x32xf32> -> vector<16x32xf32>
    %410 = arith.addf %407, %409 : vector<16x32xf32>
    %411 = vector.extract_strided_slice %404 {offsets = [0, 2], sizes = [4, 32], strides = [1, 1]} : vector<4x34xf32> to vector<4x32xf32>
    %cst_246 = arith.constant dense<0.000000e+00> : vector<16x32xf32>
    %412 = tpu.matmul %19, %411, %cst_246 {dimension_numbers = #tpu.dot_dimension_numbers<[1], [0], [0], [1], [0, 0, 1, 1], [], []>} : vector<16x4xf32>, vector<4x32xf32>, vector<16x32xf32> -> vector<16x32xf32>
    %413 = arith.addf %410, %412 : vector<16x32xf32>
    %414 = vector.broadcast %1 : vector<16x1xf32> to vector<16x32xf32>
    %415 = arith.addf %413, %414 : vector<16x32xf32>
    %cst_247 = arith.constant 0.000000e+00 : f32
    %416 = vector.broadcast %cst_247 : f32 to vector<16x32xf32>
    %417 = arith.maximumf %415, %416 : vector<16x32xf32>
    %418 = vector.extract_strided_slice %417 {offsets = [0, 0], sizes = [8, 32], strides = [1, 1]} : vector<16x32xf32> to vector<8x32xf32>
    %c0_248 = arith.constant 0 : index
    %c0_249 = arith.constant 0 : index
    %c12 = arith.constant 12 : index
    %c0_250 = arith.constant 0 : index
    %419 = vector.load %arg5[%c0_248, %c0_249, %c12, %c0_250] : memref<1x8x16x32xf32, #tpu.memory_space<vmem>>, vector<1x8x1x32xf32>
    %420 = vector.shape_cast %419 : vector<1x8x1x32xf32> to vector<8x32xf32>
    %421 = vector.shape_cast %418 : vector<8x32xf32> to vector<1x8x1x32xf32>
    tpu.vector_store %arg5[%c0_248, %c0_249, %c12, %c0_250], %421 {strides = array<i32>} : memref<1x8x16x32xf32, #tpu.memory_space<vmem>>, vector<1x8x1x32xf32>,
    %422 = vector.extract_strided_slice %417 {offsets = [8, 0], sizes = [8, 32], strides = [1, 1]} : vector<16x32xf32> to vector<8x32xf32>
    %c0_251 = arith.constant 0 : index
    %c0_252 = arith.constant 0 : index
    %c13 = arith.constant 13 : index
    %c0_253 = arith.constant 0 : index
    %423 = vector.load %arg5[%c0_251, %c0_252, %c13, %c0_253] : memref<1x8x16x32xf32, #tpu.memory_space<vmem>>, vector<1x8x1x32xf32>
    %424 = vector.shape_cast %423 : vector<1x8x1x32xf32> to vector<8x32xf32>
    %425 = vector.shape_cast %422 : vector<8x32xf32> to vector<1x8x1x32xf32>
    tpu.vector_store %arg5[%c0_251, %c0_252, %c13, %c0_253], %425 {strides = array<i32>} : memref<1x8x16x32xf32, #tpu.memory_space<vmem>>, vector<1x8x1x32xf32>,
    %cst_254 = arith.constant 0.000000e+00 : f32
    %426 = vector.broadcast %cst_254 : f32 to vector<16x32xf32>
    %c7_i32 = arith.constant 7 : i32
    %427 = arith.addi %0, %c7_i32 : i32
    %c0_i32_255 = arith.constant 0 : i32
    %428 = arith.addi %427, %c0_i32_255 : i32
    %c0_256 = arith.constant 0 : index
    %c0_257 = arith.constant 0 : index
    %429 = arith.index_cast %428 : i32 to index
    %c0_258 = arith.constant 0 : index
    %430 = vector.load %arg2[%c0_256, %c0_257, %429, %c0_258] : memref<1x4x18x34xf32, #tpu.memory_space<vmem>>, vector<1x4x1x34xf32>
    %431 = vector.shape_cast %430 : vector<1x4x1x34xf32> to vector<4x1x34xf32>
    %432 = vector.shape_cast %431 : vector<4x1x34xf32> to vector<4x34xf32>
    %433 = vector.extract_strided_slice %432 {offsets = [0, 0], sizes = [4, 32], strides = [1, 1]} : vector<4x34xf32> to vector<4x32xf32>
    %cst_259 = arith.constant dense<0.000000e+00> : vector<16x32xf32>
    %434 = tpu.matmul %3, %433, %cst_259 {dimension_numbers = #tpu.dot_dimension_numbers<[1], [0], [0], [1], [0, 0, 1, 1], [], []>} : vector<16x4xf32>, vector<4x32xf32>, vector<16x32xf32> -> vector<16x32xf32>
    %435 = arith.addf %426, %434 : vector<16x32xf32>
    %436 = vector.extract_strided_slice %432 {offsets = [0, 1], sizes = [4, 32], strides = [1, 1]} : vector<4x34xf32> to vector<4x32xf32>
    %cst_260 = arith.constant dense<0.000000e+00> : vector<16x32xf32>
    %437 = tpu.matmul %5, %436, %cst_260 {dimension_numbers = #tpu.dot_dimension_numbers<[1], [0], [0], [1], [0, 0, 1, 1], [], []>} : vector<16x4xf32>, vector<4x32xf32>, vector<16x32xf32> -> vector<16x32xf32>
    %438 = arith.addf %435, %437 : vector<16x32xf32>
    %439 = vector.extract_strided_slice %432 {offsets = [0, 2], sizes = [4, 32], strides = [1, 1]} : vector<4x34xf32> to vector<4x32xf32>
    %cst_261 = arith.constant dense<0.000000e+00> : vector<16x32xf32>
    %440 = tpu.matmul %7, %439, %cst_261 {dimension_numbers = #tpu.dot_dimension_numbers<[1], [0], [0], [1], [0, 0, 1, 1], [], []>} : vector<16x4xf32>, vector<4x32xf32>, vector<16x32xf32> -> vector<16x32xf32>
    %441 = arith.addf %438, %440 : vector<16x32xf32>
    %c7_i32_262 = arith.constant 7 : i32
    %442 = arith.addi %0, %c7_i32_262 : i32
    %c1_i32_263 = arith.constant 1 : i32
    %443 = arith.addi %442, %c1_i32_263 : i32
    %c0_264 = arith.constant 0 : index
    %c0_265 = arith.constant 0 : index
    %444 = arith.index_cast %443 : i32 to index
    %c0_266 = arith.constant 0 : index
    %445 = vector.load %arg2[%c0_264, %c0_265, %444, %c0_266] : memref<1x4x18x34xf32, #tpu.memory_space<vmem>>, vector<1x4x1x34xf32>
    %446 = vector.shape_cast %445 : vector<1x4x1x34xf32> to vector<4x1x34xf32>
    %447 = vector.shape_cast %446 : vector<4x1x34xf32> to vector<4x34xf32>
    %448 = vector.extract_strided_slice %447 {offsets = [0, 0], sizes = [4, 32], strides = [1, 1]} : vector<4x34xf32> to vector<4x32xf32>
    %cst_267 = arith.constant dense<0.000000e+00> : vector<16x32xf32>
    %449 = tpu.matmul %9, %448, %cst_267 {dimension_numbers = #tpu.dot_dimension_numbers<[1], [0], [0], [1], [0, 0, 1, 1], [], []>} : vector<16x4xf32>, vector<4x32xf32>, vector<16x32xf32> -> vector<16x32xf32>
    %450 = arith.addf %441, %449 : vector<16x32xf32>
    %451 = vector.extract_strided_slice %447 {offsets = [0, 1], sizes = [4, 32], strides = [1, 1]} : vector<4x34xf32> to vector<4x32xf32>
    %cst_268 = arith.constant dense<0.000000e+00> : vector<16x32xf32>
    %452 = tpu.matmul %11, %451, %cst_268 {dimension_numbers = #tpu.dot_dimension_numbers<[1], [0], [0], [1], [0, 0, 1, 1], [], []>} : vector<16x4xf32>, vector<4x32xf32>, vector<16x32xf32> -> vector<16x32xf32>
    %453 = arith.addf %450, %452 : vector<16x32xf32>
    %454 = vector.extract_strided_slice %447 {offsets = [0, 2], sizes = [4, 32], strides = [1, 1]} : vector<4x34xf32> to vector<4x32xf32>
    %cst_269 = arith.constant dense<0.000000e+00> : vector<16x32xf32>
    %455 = tpu.matmul %13, %454, %cst_269 {dimension_numbers = #tpu.dot_dimension_numbers<[1], [0], [0], [1], [0, 0, 1, 1], [], []>} : vector<16x4xf32>, vector<4x32xf32>, vector<16x32xf32> -> vector<16x32xf32>
    %456 = arith.addf %453, %455 : vector<16x32xf32>
    %c7_i32_270 = arith.constant 7 : i32
    %457 = arith.addi %0, %c7_i32_270 : i32
    %c2_i32_271 = arith.constant 2 : i32
    %458 = arith.addi %457, %c2_i32_271 : i32
    %c0_272 = arith.constant 0 : index
    %c0_273 = arith.constant 0 : index
    %459 = arith.index_cast %458 : i32 to index
    %c0_274 = arith.constant 0 : index
    %460 = vector.load %arg2[%c0_272, %c0_273, %459, %c0_274] : memref<1x4x18x34xf32, #tpu.memory_space<vmem>>, vector<1x4x1x34xf32>
    %461 = vector.shape_cast %460 : vector<1x4x1x34xf32> to vector<4x1x34xf32>
    %462 = vector.shape_cast %461 : vector<4x1x34xf32> to vector<4x34xf32>
    %463 = vector.extract_strided_slice %462 {offsets = [0, 0], sizes = [4, 32], strides = [1, 1]} : vector<4x34xf32> to vector<4x32xf32>
    %cst_275 = arith.constant dense<0.000000e+00> : vector<16x32xf32>
    %464 = tpu.matmul %15, %463, %cst_275 {dimension_numbers = #tpu.dot_dimension_numbers<[1], [0], [0], [1], [0, 0, 1, 1], [], []>} : vector<16x4xf32>, vector<4x32xf32>, vector<16x32xf32> -> vector<16x32xf32>
    %465 = arith.addf %456, %464 : vector<16x32xf32>
    %466 = vector.extract_strided_slice %462 {offsets = [0, 1], sizes = [4, 32], strides = [1, 1]} : vector<4x34xf32> to vector<4x32xf32>
    %cst_276 = arith.constant dense<0.000000e+00> : vector<16x32xf32>
    %467 = tpu.matmul %17, %466, %cst_276 {dimension_numbers = #tpu.dot_dimension_numbers<[1], [0], [0], [1], [0, 0, 1, 1], [], []>} : vector<16x4xf32>, vector<4x32xf32>, vector<16x32xf32> -> vector<16x32xf32>
    %468 = arith.addf %465, %467 : vector<16x32xf32>
    %469 = vector.extract_strided_slice %462 {offsets = [0, 2], sizes = [4, 32], strides = [1, 1]} : vector<4x34xf32> to vector<4x32xf32>
    %cst_277 = arith.constant dense<0.000000e+00> : vector<16x32xf32>
    %470 = tpu.matmul %19, %469, %cst_277 {dimension_numbers = #tpu.dot_dimension_numbers<[1], [0], [0], [1], [0, 0, 1, 1], [], []>} : vector<16x4xf32>, vector<4x32xf32>, vector<16x32xf32> -> vector<16x32xf32>
    %471 = arith.addf %468, %470 : vector<16x32xf32>
    %472 = vector.broadcast %1 : vector<16x1xf32> to vector<16x32xf32>
    %473 = arith.addf %471, %472 : vector<16x32xf32>
    %cst_278 = arith.constant 0.000000e+00 : f32
    %474 = vector.broadcast %cst_278 : f32 to vector<16x32xf32>
    %475 = arith.maximumf %473, %474 : vector<16x32xf32>
    %476 = vector.extract_strided_slice %475 {offsets = [0, 0], sizes = [8, 32], strides = [1, 1]} : vector<16x32xf32> to vector<8x32xf32>
    %c0_279 = arith.constant 0 : index
    %c0_280 = arith.constant 0 : index
    %c14 = arith.constant 14 : index
    %c0_281 = arith.constant 0 : index
    %477 = vector.load %arg5[%c0_279, %c0_280, %c14, %c0_281] : memref<1x8x16x32xf32, #tpu.memory_space<vmem>>, vector<1x8x1x32xf32>
    %478 = vector.shape_cast %477 : vector<1x8x1x32xf32> to vector<8x32xf32>
    %479 = vector.shape_cast %476 : vector<8x32xf32> to vector<1x8x1x32xf32>
    tpu.vector_store %arg5[%c0_279, %c0_280, %c14, %c0_281], %479 {strides = array<i32>} : memref<1x8x16x32xf32, #tpu.memory_space<vmem>>, vector<1x8x1x32xf32>,
    %480 = vector.extract_strided_slice %475 {offsets = [8, 0], sizes = [8, 32], strides = [1, 1]} : vector<16x32xf32> to vector<8x32xf32>
    %c0_282 = arith.constant 0 : index
    %c0_283 = arith.constant 0 : index
    %c15 = arith.constant 15 : index
    %c0_284 = arith.constant 0 : index
    %481 = vector.load %arg5[%c0_282, %c0_283, %c15, %c0_284] : memref<1x8x16x32xf32, #tpu.memory_space<vmem>>, vector<1x8x1x32xf32>
    %482 = vector.shape_cast %481 : vector<1x8x1x32xf32> to vector<8x32xf32>
    %483 = vector.shape_cast %480 : vector<8x32xf32> to vector<1x8x1x32xf32>
    tpu.vector_store %arg5[%c0_282, %c0_283, %c15, %c0_284], %483 {strides = array<i32>} : memref<1x8x16x32xf32, #tpu.memory_space<vmem>>, vector<1x8x1x32xf32>,
    return
  }
  func.func @transform_0(%arg0: i32, %arg1: i32) -> (i32, i32, i32, i32) {
    %c0_i32 = arith.constant 0 : i32
    %c0_i32_0 = arith.constant 0 : i32
    %c0_i32_1 = arith.constant 0 : i32
    %c0_i32_2 = arith.constant 0 : i32
    return %arg0, %c0_i32, %c0_i32_0, %c0_i32_1 : i32, i32, i32, i32
  }
  func.func @transform_1(%arg0: i32, %arg1: i32) -> (i32, i32, i32, i32) {
    %c0_i32 = arith.constant 0 : i32
    %c0_i32_0 = arith.constant 0 : i32
    %c0_i32_1 = arith.constant 0 : i32
    %c0_i32_2 = arith.constant 0 : i32
    %c0_i32_3 = arith.constant 0 : i32
    return %c0_i32, %c0_i32_0, %c0_i32_1, %c0_i32_2 : i32, i32, i32, i32
  }
  func.func @transform_2(%arg0: i32, %arg1: i32) -> (i32, i32) {
    %c0_i32 = arith.constant 0 : i32
    %c0_i32_0 = arith.constant 0 : i32
    %c0_i32_1 = arith.constant 0 : i32
    return %c0_i32, %c0_i32_0 : i32, i32
  }
  func.func @transform_3(%arg0: i32, %arg1: i32) -> (i32, i32, i32, i32) {
    %c0_i32 = arith.constant 0 : i32
    %c0_i32_0 = arith.constant 0 : i32
    %c0_i32_1 = arith.constant 0 : i32
    return %arg0, %c0_i32, %arg1, %c0_i32_0 : i32, i32, i32, i32
  }
}

</mosaic_0001>

<bundles_post_ra>
// kernel: tpu_custom_call.1
= control target key start
LH: loop header
LB: loop body
LE: loop exit
PB: predicated region body
PF: predicated region fallthrough
CT: control target
= control target key end

     0   :  { %8 = vsyncpa [#allocation3], 0  ;;  %s10164_s0 = inlined_call_operand.vmem [shape: f32[2,4,18,34], index: 0, kind: input, shape index: {}]   ;;  %s10165_s1 = inlined_call_operand.vmem [shape: f32[3,3,16,4], index: 1, kind: input, shape index: {}]   ;;  %s10166_s2 = inlined_call_operand.vmem [shape: f32[16,1], index: 2, kind: input, shape index: {}]   ;;  %s10167_s3 = inlined_call_operand.hbm [shape: f32[2,8,32,32], index: 3, kind: output, shape index: {}]  }
   0x1   :  { %10 = vsyncpa [#allocation3 + $0x1], 0  ;;  %s8741_s12 = smov 0   ;;  %s8743_s13 = smov 0  }
   0x2   :  { %s8745_s14 = smov 0   ;;  %s8747_s15 = smov 0  }
   0x3   :  { %s8749_s16 = smov 0   ;;  %s8751_s17 = smov 0  }
   0x4   :  { %s8753_s18 = smov 0   ;;  %s8755_s19 = smov 0  }
   0x5 LB: > { %s7622_s20 = sadd.s32 4294967295, %s8708_s19   ;;  %s7623_s21 = sadd.s32 4294967294, %s8708_s19   ;;  %s8708_s19 = sphi %s8755_s19, %s16_s19   ;;  %s8704_s18 = sphi %s8753_s18, %s10176_s18   ;;  %s8700_s17 = sphi %s8751_s17, %s10175_s17   ;;  %s8696_s16 = sphi %s8749_s16, %s10174_s16   ;;  %s8692_s15 = sphi %s8747_s15, %s10173_s15   ;;  %s8688_s14 = sphi %s8745_s14, %s10172_s14   ;;  %s8684_s13 = sphi %s8743_s13, %s10171_s13   ;;  %s8680_s12 = sphi %s8741_s12, %s10170_s12  }
   0x6   : > { %s25_s22 = sadd.s32 1, %s8700_s17  ;;  %s28_s23 = sadd.s32 1, %s8704_s18 }
   0x7   : > { %p26_p0 = scmp.ge.s32.totalorder %s25_s22, 2  ;;  %p115_p1 = scmp.ne.s32.totalorder %s8688_s14, %s8684_s13 }
   0x8   : > { %p116_p2 = scmp.eq.s32.totalorder %s7622_s20, 3  ;;  %p121_p5 = scmp.ne.s32.totalorder %s8684_s13, %s8680_s12 }
   0x9   : > { %s10178_s22 = smov (%p26_p0, %s25_s22), 0  ;;  %s10180_s23 = smov (!%p26_p0, %s28_s23), %s8704_s18 }
   0xa   : > { %s101_s24 = ssub.s32 %s8700_s17, %s10178_s22  ;;  %p8792_p3 = por %p116_p2, %p115_p1 }
   0xb   : > { %p30_p4 = scmp.ge.s32.totalorder %s10180_s23, 2  ;;  %p122_p6 = scmp.eq.s32.totalorder %s7623_s21, 3 }
   0xc   : > { %p7626_p7 = scmp.ge.s32.totalorder %s8708_s19, 1  ;;  %p154_p9 = scmp.lt.s32.totalorder %s8708_s19, 5 }
   0xd   : > { %s10182_s23 = smov (%p30_p4, %s10180_s23), 0  ;;  %p8801_p8 = por %p122_p6, %p121_p5 }
   0xe   : > { %s100_s27 = ssub.s32 %s8704_s18, %s10182_s23  ;;  %s105_s28 = sadd.s32 1, %s8688_s14 }
   0xf   : > { %s102_s29 = sor.u32 %s101_s24, %s100_s27  ;;  %p155_p10 = pnand %p7626_p7, %p154_p9 }
  0x10   : > { %p103_p11 = scmp.eq.s32.totalorder %s102_s29, 0  ;;  %p178_p12 = scmp.lt.s32.totalorder (!%p155_p10), %s8696_s16, 1 }
  0x11   : > { %158 = sbr.rel (%p155_p10) target bundleno = 519 (0x207), region = 32  ;;  %s7629_s10 = sshll.u32 (!%p155_p10), %s8692_s15, 3 }
  0x12   : > { %s8810_s30 = scalar_select %p103_p11, %s8688_s14, %s105_s28  }
  0x13   : > { %s8710_s5 = smov (!%p155_p10), 127  }
  0x16   : > { %v8816_v0 = vld [vmem:[%s10165_s1 + $0x10] sm:$0xff]  ;;  %vm233_vm0 = vcmask 31744   ;;  %v8821_v1 = vld [vmem:[%s10165_s1] sm:$0xff]  ;;  %s179_s8 = scalar_select %p178_p12, %s8696_s16, 1  ;;  %vm223_vm1 = vcmask 1041409   ;;  %vm226_vm2 = vcmask 1042434  }
  0x17   : > { %8187 = vmatprep.mubr.msk.f32.mxu0 %vm233_vm0, %v8816_v0  ;;  %8192 = vmatprep.mubr.msk.f32.mxu1 %vm233_vm0, %v8821_v1  ;;  %vm229_vm3 = vcmask 1043459   ;;  %vm240_vm4 = vcmask 1043456   ;;  %v8853_v26 = vld [vmem:[%s10165_s1 + $0x8] sm:$0xff]  ;;  %v8858_v27 = vld [vmem:[%s10165_s1 + $0x30] sm:$0xff]  ;;  %v8883_v43 = vld [vmem:[%s10165_s1 + $0x38] sm:$0xff]  ;;  %vm1110_vm5 = vcmask 253952  }
  0x18   : > { %s8545_s9 = smul.u32 96, %s179_s8  ;;  %s8711_s8 = smov 126   ;;  %v8892_v46 = vld [vmem:[%s10165_s1 + $0x50] sm:$0xff] }
  0x1a   : > { %s182_s21 = scalar_lea.vmem %s10164_s0, %s8545_s9  ;;  %s175_s9 = sand.u32 1, %s8684_s13  }
  0x1b   : > { %s8832_s24 = scalar_lea.vmem %s182_s21, %s7629_s10  ;;  %s7627_s10 = sshll.u32 %s175_s9, 7 }
  0x1c   : > { %v214_v2 = vld [vmem:[%s8832_s24] sm:$0x1]  ;;  %v215_v3 = vld [vmem:[%s8832_s24 + $0x18] sm:$0x1]  ;;  %v216_v4 = vld [vmem:[%s8832_s24 + $0x30] sm:$0x1] }
  0x1d   : > { %v217_v5 = vld [vmem:[%s8832_s24 + $0x48] sm:$0x1]  ;;  %v222_v6 = vrot.slane %v215_v3, 7  ;;  %v225_v7 = vrot.slane %v216_v4, 6  ;;  %v7656_v8 = vld [vmem:[%s8832_s24 + $0x1] sm:$0x1] }
  0x1e   : > { %v228_v9 = vrot.slane %v217_v5, 5  ;;  %v7657_v10 = vld [vmem:[%s8832_s24 + $0x19] sm:$0x1]  ;;  %v7658_v11 = vld [vmem:[%s8832_s24 + $0x31] sm:$0x1]  ;;  %s9752_s11 = scalar_lea.vmem [#allocation2], %s7627_s10 }
  0x1f   : > { %v224_v12 = vsel %vm223_vm1, %v222_v6, %v214_v2  ;;  %v7659_v13 = vld [vmem:[%s8832_s24 + $0x49] sm:$0x1]  ;;  %v498_v14 = vrot.slane %v7657_v10, 7  ;;  %v500_v15 = vrot.slane %v7658_v11, 6  ;;  %v7670_v16 = vld [vmem:[%s8832_s24 + $0x2] sm:$0x1] }
  0x20   : > { %v227_v17 = vsel %vm226_vm2, %v225_v7, %v224_v12  ;;  %v502_v18 = vrot.slane %v7659_v13, 5  ;;  %v7671_v19 = vld [vmem:[%s8832_s24 + $0x1a] sm:$0x1]  ;;  %v7672_v20 = vld [vmem:[%s8832_s24 + $0x32] sm:$0x1]  ;;  %s7479_s20 = scalar_lea.sflag [#allocation3], %s175_s9 }
  0x21   : > { %v230_v21 = vsel %vm229_vm3, %v228_v9, %v227_v17  ;;  %v499_v22 = vsel %vm223_vm1, %v498_v14, %v7656_v8  ;;  %v7673_v23 = vld [vmem:[%s8832_s24 + $0x4a] sm:$0x1]  ;;  %v773_v24 = vrot.slane %v7671_v19, 7  ;;  %v775_v25 = vrot.slane %v7672_v20, 6  ;;  %v7683_v29 = vld [vmem:[%s8832_s24 + $0x1] sm:$0x1] }
  0x22   : > { %231 = vrot.lane.b32.xlu0 %v230_v21, %s8710_s5  ;;  %v501_v28 = vsel %vm226_vm2, %v500_v15, %v499_v22  ;;  %v7684_v30 = vld [vmem:[%s8832_s24 + $0x19] sm:$0x1]  ;;  %v7685_v31 = vld [vmem:[%s8832_s24 + $0x31] sm:$0x1]  ;;  %8190 = vmatprep.subr.msk.mxu1 %vm240_vm4, %v230_v21  ;;  %v777_v34 = vrot.slane %v7673_v23, 5 }
  0x23   : > { %v503_v32 = vsel %vm229_vm3, %v502_v18, %v501_v28  ;;  %v774_v33 = vsel %vm223_vm1, %v773_v24, %v7670_v16  ;;  %v1193_v35 = vrot.slane %v7684_v30, 7  ;;  %8191 = vmatpush3.msk.msra.mxu1 %vm240_vm4, %v230_v21  ;;  %v7686_v37 = vld [vmem:[%s8832_s24 + $0x49] sm:$0x1]  ;;  %v1195_v38 = vrot.slane %v7685_v31, 6  ;;  %v7697_v39 = vld [vmem:[%s8832_s24 + $0x1a] sm:$0x1] }
  0x24   : > { %589 = vrot.lane.b32.xlu1 %v503_v32, %s8710_s5  ;;  %v776_v36 = vsel %vm226_vm2, %v775_v25, %v774_v33  ;;  %8193 = vmatmul.mubr.msk.f32.vlgmr.msra.gmra.mxu1 %vm233_vm0, %v8853_v26  ;;  %v7698_v41 = vld [vmem:[%s8832_s24 + $0x32] sm:$0x1]  ;;  %v1444_v42 = vrot.slane %v7697_v39, 7  ;;  %v7696_v44 = vld [vmem:[%s8832_s24 + $0x2] sm:$0x1]  ;;  %v1197_v48 = vrot.slane %v7686_v37, 5 }
  0x25   : > { %v1194_v40 = vsel %vm223_vm1, %v1193_v35, %v7683_v29  ;;  %8200 = vmatprep.subr.msk.mxu1 %vm240_vm4, %v503_v32  ;;  %8202 = vmatprep.mubr.msk.f32.mxu1 %vm233_vm0, %v8858_v27  ;;  %v7711_v45 = vld [vmem:[%s8832_s24 + $0x1b] sm:$0x1]  ;;  %v8895_v47 = vsel %vm229_vm3, %v777_v34, %v776_v36  ;;  %v7699_v50 = vld [vmem:[%s8832_s24 + $0x4a] sm:$0x1]  ;;  %v1446_v51 = vrot.slane %v7698_v41, 6 }
  0x26   : > { %401 = vrot.lane.b32.xlu0 %v230_v21, %s8711_s8  ;;  %8201 = vmatpush3.msk.msra.mxu1 %vm240_vm4, %v503_v32  ;;  %v1196_v49 = vsel %vm226_vm2, %v1195_v38, %v1194_v40  ;;  %v1445_v52 = vsel %vm223_vm1, %v1444_v42, %v7696_v44  ;;  %v7712_v53 = vld [vmem:[%s8832_s24 + $0x33] sm:$0x1]  ;;  %v1701_v54 = vrot.slane %v7711_v45, 7  ;;  %v7710_v55 = vld [vmem:[%s8832_s24 + $0x3] sm:$0x1]  ;;  %v1448_v58 = vrot.slane %v7699_v50, 5 }
  0x27   : > { %v7724_v56 = vld [vmem:[%s8832_s24 + $0x1a] sm:$0x1]  ;;  %v8911_v57 = vsel %vm229_vm3, %v1197_v48, %v1196_v49  ;;  %v1447_v59 = vsel %vm226_vm2, %v1446_v51, %v1445_v52  ;;  %v7713_v60 = vld [vmem:[%s8832_s24 + $0x4b] sm:$0x1]  ;;  %v1703_v61 = vrot.slane %v7712_v53, 6 }
  0x28   : > { %676 = vrot.lane.b32.xlu1 %v503_v32, %s8711_s8  ;;  %8203 = vmatmul.mubr.msk.f32.vlgmr.msra.gmra.mxu1 %vm233_vm0, %v8883_v43  ;;  %v1702_v62 = vsel %vm223_vm1, %v1701_v54, %v7710_v55  ;;  %v7725_v63 = vld [vmem:[%s8832_s24 + $0x32] sm:$0x1]  ;;  %v2092_v2 = vrot.slane %v7724_v56, 7  ;;  %v7723_v3 = vld [vmem:[%s8832_s24 + $0x2] sm:$0x1]  ;;  %v8924_v5 = vsel %vm229_vm3, %v1448_v58, %v1447_v59  ;;  %v1705_v6 = vrot.slane %v7713_v60, 5 }
  0x29   : > { %8212 = vmatprep.mubr.msk.f32.mxu1 %vm233_vm0, %v8892_v46  ;;  %v7737_v4 = vld [vmem:[%s8832_s24 + $0x1b] sm:$0x1]  ;;  %v1704_v7 = vsel %vm226_vm2, %v1703_v61, %v1702_v62  ;;  %v7726_v8 = vld [vmem:[%s8832_s24 + $0x4a] sm:$0x1]  ;;  %v2094_v9 = vrot.slane %v7725_v63, 6 }
  0x2a   : > { %864 = vrot.lane.b32.xlu0 %v8895_v47, %s8710_s5  ;;  %v2093_v10 = vsel %vm223_vm1, %v2092_v2, %v7723_v3  ;;  %v7738_v11 = vld [vmem:[%s8832_s24 + $0x33] sm:$0x1]  ;;  %v2343_v12 = vrot.slane %v7737_v4, 7  ;;  %v7751_v13 = vld [vmem:[%s8832_s24 + $0x1c] sm:$0x1]  ;;  %v8938_v16 = vsel %vm229_vm3, %v1705_v6, %v1704_v7  ;;  %v2096_v17 = vrot.slane %v7726_v8, 5 }
  0x2b   : > { %v7736_v14 = vld [vmem:[%s8832_s24 + $0x3] sm:$0x1]  ;;  %v7764_v15 = vld [vmem:[%s8832_s24 + $0x1b] sm:$0x1]  ;;  %v2095_v18 = vsel %vm226_vm2, %v2094_v9, %v2093_v10  ;;  %v7739_v19 = vld [vmem:[%s8832_s24 + $0x4b] sm:$0x1] }
  0x2c   : > { %951 = vrot.lane.b32.xlu1 %v8895_v47, %s8711_s8  ;;  %v2345_v20 = vrot.slane %v7738_v11, 6  ;;  %v7752_v21 = vld [vmem:[%s8832_s24 + $0x34] sm:$0x1]  ;;  %v2600_v22 = vrot.slane %v7751_v13, 7  ;;  %v2344_v23 = vsel %vm223_vm1, %v2343_v12, %v7736_v14  ;;  %v7750_v24 = vld [vmem:[%s8832_s24 + $0x4] sm:$0x1]  ;;  %v8953_v31 = vsel %vm229_vm3, %v2096_v17, %v2095_v18 }
  0x2d   : > { %v7765_v25 = vld [vmem:[%s8832_s24 + $0x33] sm:$0x1]  ;;  %v2991_v28 = vrot.slane %v7764_v15, 7  ;;  %v7763_v29 = vld [vmem:[%s8832_s24 + $0x3] sm:$0x1]  ;;  %v2347_v32 = vrot.slane %v7739_v19, 5 }
  0x2e   : > { %1199 = vrot.lane.b32.xlu0 %v8911_v57, %s8710_s5  ;;  %v7777_v30 = vld [vmem:[%s8832_s24 + $0x1c] sm:$0x1]  ;;  %v7753_v33 = vld [vmem:[%s8832_s24 + $0x4c] sm:$0x1]  ;;  %v2602_v34 = vrot.slane %v7752_v21, 6  ;;  %v2346_v36 = vsel %vm226_vm2, %v2345_v20, %v2344_v23  ;;  %v2601_v37 = vsel %vm223_vm1, %v2600_v22, %v7750_v24  ;;  %v2993_v38 = vrot.slane %v7765_v25, 6 }
  0x2f   : > { %v7766_v35 = vld [vmem:[%s8832_s24 + $0x4b] sm:$0x1]  ;;  %v7778_v39 = vld [vmem:[%s8832_s24 + $0x34] sm:$0x1]  ;;  %v8963_v40 = vld [vmem:[%s8832_s24 + $0x4c] sm:$0x1]  ;;  %v2992_v41 = vsel %vm223_vm1, %v2991_v28, %v7763_v29  ;;  %v8970_v49 = vsel %vm229_vm3, %v2347_v32, %v2346_v36 }
  0x30   : > { %1355 = vrot.lane.b32.xlu1 %v8911_v57, %s8711_s8  ;;  %v3242_v42 = vrot.slane %v7777_v30, 7  ;;  %v2604_v44 = vrot.slane %v7753_v33, 5  ;;  %v2995_v45 = vrot.slane %v7766_v35, 5  ;;  %v7776_v48 = vld [vmem:[%s8832_s24 + $0x4] sm:$0x1]  ;;  %v2603_v50 = vsel %vm226_vm2, %v2602_v34, %v2601_v37 }
  0x31   : > { %v3244_v51 = vrot.slane %v7778_v39, 6  ;;  %v3246_v52 = vrot.slane %v8963_v40, 5  ;;  %v7791_v53 = vld [vmem:[%s8832_s24 + $0x1d] sm:$0x1]  ;;  %v8976_v54 = vld [vmem:[%s8832_s24 + $0x35] sm:$0x1]  ;;  %v2994_v55 = vsel %vm226_vm2, %v2993_v38, %v2992_v41 }
  0x32   : > { %1529 = vrot.lane.b32.xlu0 %v8924_v5, %s8710_s5  ;;  %v7856_v56 = vld [vmem:[%s8832_s24 + $0x6] sm:$0x1]  ;;  %v7857_v58 = vld [vmem:[%s8832_s24 + $0x1e] sm:$0x1]  ;;  %v7858_v59 = vld [vmem:[%s8832_s24 + $0x36] sm:$0x1]  ;;  %v3243_v60 = vsel %vm223_vm1, %v3242_v42, %v7776_v48  ;;  %v8994_v6 = vsel %vm229_vm3, %v2604_v44, %v2603_v50  ;;  %v8999_v11 = vsel %vm229_vm3, %v2995_v45, %v2994_v55 }
  0x33   : > { %v7790_v61 = vld [vmem:[%s8832_s24 + $0x5] sm:$0x1]  ;;  %v8987_v62 = vld [vmem:[%s8832_s24 + $0x4d] sm:$0x1]  ;;  %v7859_v63 = vld [vmem:[%s8832_s24 + $0x4e] sm:$0x1]  ;;  %v3245_v19 = vsel %vm226_vm2, %v3244_v51, %v3243_v60 }
  0x34   : > { %1610 = vrot.lane.b32.xlu1 %v8924_v5, %s8711_s8  ;;  %v5040_v2 = vrot.slane %v7857_v58, 7  ;;  %v5042_v3 = vrot.slane %v7858_v59, 6  ;;  %v7870_v4 = vld [vmem:[%s8832_s24 + $0x7] sm:$0x1]  ;;  %v3499_v7 = vrot.slane %v7791_v53, 7  ;;  %v5044_v8 = vrot.slane %v7859_v63, 5 }
  0x35   : > { %v7871_v9 = vld [vmem:[%s8832_s24 + $0x1f] sm:$0x1]  ;;  %v7872_v10 = vld [vmem:[%s8832_s24 + $0x37] sm:$0x1]  ;;  %v9002_v12 = vld [vmem:[%s8832_s24 + $0x1c] sm:$0x1] }
  0x36   : > { %1786 = vrot.lane.b32.xlu0 %v8938_v16, %s8710_s5  ;;  %v5041_v13 = vsel %vm223_vm1, %v5040_v2, %v7856_v56  ;;  %v7873_v14 = vld [vmem:[%s8832_s24 + $0x4f] sm:$0x1]  ;;  %v5297_v15 = vrot.slane %v7871_v9, 7  ;;  %v5299_v17 = vrot.slane %v7872_v10, 6  ;;  %v7883_v18 = vld [vmem:[%s8832_s24 + $0x6] sm:$0x1]  ;;  %v3500_v35 = vsel %vm223_vm1, %v3499_v7, %v7790_v61 }
  0x37   : > { %v3501_v20 = vrot.slane %v8976_v54, 6  ;;  %v5043_v21 = vsel %vm226_vm2, %v5042_v3, %v5041_v13  ;;  %v5301_v22 = vrot.slane %v7873_v14, 5  ;;  %v7884_v23 = vld [vmem:[%s8832_s24 + $0x1e] sm:$0x1]  ;;  %v7885_v24 = vld [vmem:[%s8832_s24 + $0x36] sm:$0x1]  ;;  %v9043_v54 = vsel %vm229_vm3, %v3246_v52, %v3245_v19 }
  0x38   : > { %1867 = vrot.lane.b32.xlu1 %v8938_v16, %s8711_s8  ;;  %v9015_v25 = vld [vmem:[%s8832_s24 + $0x34] sm:$0x1]  ;;  %v9018_v28 = vsel %vm229_vm3, %v5044_v8, %v5043_v21  ;;  %v5298_v29 = vsel %vm223_vm1, %v5297_v15, %v7870_v4  ;;  %v7886_v30 = vld [vmem:[%s8832_s24 + $0x4e] sm:$0x1]  ;;  %v5688_v32 = vrot.slane %v7884_v23, 7  ;;  %v5690_v33 = vrot.slane %v7885_v24, 6 }
  0x39   : > { %v7896_v34 = vld [vmem:[%s8832_s24 + $0x7] sm:$0x1]  ;;  %v3503_v36 = vrot.slane %v8987_v62, 5  ;;  %v5300_v37 = vsel %vm226_vm2, %v5299_v17, %v5298_v29  ;;  %v5692_v38 = vrot.slane %v7886_v30, 5  ;;  %v7897_v39 = vld [vmem:[%s8832_s24 + $0x1f] sm:$0x1]  ;;  %v3502_v7 = vsel %vm226_vm2, %v3501_v20, %v3500_v35 }
  0x3a   : > { %2098 = vrot.lane.b32.xlu0 %v8953_v31, %s8710_s5  ;;  %v7898_v40 = vld [vmem:[%s8832_s24 + $0x37] sm:$0x1]  ;;  %v7803_v41 = vld [vmem:[%s8832_s24 + $0x4] sm:$0x1]  ;;  %v9032_v42 = vld [vmem:[%s8832_s24 + $0x1d] sm:$0x1]  ;;  %v9035_v44 = vsel %vm229_vm3, %v5301_v22, %v5300_v37  ;;  %v5689_v45 = vsel %vm223_vm1, %v5688_v32, %v7883_v18 }
  0x3b   : > { %v7899_v48 = vld [vmem:[%s8832_s24 + $0x4f] sm:$0x1]  ;;  %v5939_v50 = vrot.slane %v7897_v39, 7  ;;  %v5941_v51 = vrot.slane %v7898_v40, 6  ;;  %v7910_v53 = vld [vmem:[%s8832_s24 + $0x8] sm:$0x1]  ;;  %v5691_v56 = vsel %vm226_vm2, %v5690_v33, %v5689_v45 }
  0x3c   : > { %2254 = vrot.lane.b32.xlu1 %v8953_v31, %s8711_s8  ;;  %v3890_v55 = vrot.slane %v9002_v12, 7  ;;  %v5943_v58 = vrot.slane %v7899_v48, 5  ;;  %v7911_v59 = vld [vmem:[%s8832_s24 + $0x20] sm:$0x1]  ;;  %v7912_v60 = vld [vmem:[%s8832_s24 + $0x38] sm:$0x1]  ;;  %v9053_v62 = vsel %vm229_vm3, %v5692_v38, %v5691_v56 }
  0x3d   : > { %v9050_v61 = vld [vmem:[%s8832_s24 + $0x4c] sm:$0x1]  ;;  %v5940_v63 = vsel %vm223_vm1, %v5939_v50, %v7896_v34  ;;  %v7913_v52 = vld [vmem:[%s8832_s24 + $0x50] sm:$0x1]  ;;  %v6196_v2 = vrot.slane %v7911_v59, 7  ;;  %v6198_v3 = vrot.slane %v7912_v60, 6 }
  0x3e   : > { %2428 = vrot.lane.b32.xlu0 %v8970_v49, %s8710_s5  ;;  %v7923_v4 = vld [vmem:[%s8832_s24 + $0x7] sm:$0x1]  ;;  %v3892_v8 = vrot.slane %v9015_v25, 6  ;;  %v5942_v9 = vsel %vm226_vm2, %v5941_v51, %v5940_v63  ;;  %v6200_v10 = vrot.slane %v7913_v52, 5  ;;  %v7924_v12 = vld [vmem:[%s8832_s24 + $0x1f] sm:$0x1]  ;;  %v3891_v22 = vsel %vm223_vm1, %v3890_v55, %v7803_v41 }
  0x3f   : > { %v7925_v13 = vld [vmem:[%s8832_s24 + $0x37] sm:$0x1]  ;;  %v7818_v14 = vld [vmem:[%s8832_s24 + $0x35] sm:$0x1]  ;;  %v9067_v15 = vsel %vm229_vm3, %v5943_v58, %v5942_v9  ;;  %v6197_v17 = vsel %vm223_vm1, %v6196_v2, %v7910_v53  ;;  %v7926_v18 = vld [vmem:[%s8832_s24 + $0x4f] sm:$0x1]  ;;  %v9090_v41 = vsel %vm229_vm3, %v3503_v36, %v3502_v7 }
  0x40   : > { %2509 = vrot.lane.b32.xlu1 %v8970_v49, %s8711_s8  ;;  %v6587_v19 = vrot.slane %v7924_v12, 7  ;;  %v6589_v20 = vrot.slane %v7925_v13, 6  ;;  %v7936_v21 = vld [vmem:[%s8832_s24 + $0x8] sm:$0x1]  ;;  %v7816_v23 = vld [vmem:[%s8832_s24 + $0x5] sm:$0x1]  ;;  %v6199_v29 = vsel %vm226_vm2, %v6198_v3, %v6197_v17  ;;  %v3893_v36 = vsel %vm226_vm2, %v3892_v8, %v3891_v22 }
  0x41   : > { %v4141_v24 = vrot.slane %v9032_v42, 7  ;;  %v7831_v25 = vld [vmem:[%s8832_s24 + $0x1e] sm:$0x1]  ;;  %v6591_v30 = vrot.slane %v7926_v18, 5  ;;  %v7937_v32 = vld [vmem:[%s8832_s24 + $0x20] sm:$0x1]  ;;  %v9082_v34 = vsel %vm229_vm3, %v6200_v10, %v6199_v29 }
  0x42   : > { %2685 = vrot.lane.b32.xlu0 %v8994_v6, %s8710_s5  ;;  %v7938_v33 = vld [vmem:[%s8832_s24 + $0x38] sm:$0x1]  ;;  %v6588_v35 = vsel %vm223_vm1, %v6587_v19, %v7923_v4  ;;  %v7939_v37 = vld [vmem:[%s8832_s24 + $0x50] sm:$0x1]  ;;  %v6838_v38 = vrot.slane %v7937_v32, 7  ;;  %v3894_v42 = vrot.slane %v9050_v61, 5 }
  0x43   : > { %v6840_v39 = vrot.slane %v7938_v33, 6  ;;  %v7950_v40 = vld [vmem:[%s8832_s24 + $0x9] sm:$0x1]  ;;  %v6590_v45 = vsel %vm226_vm2, %v6589_v20, %v6588_v35  ;;  %v6842_v48 = vrot.slane %v7939_v37, 5  ;;  %v7951_v50 = vld [vmem:[%s8832_s24 + $0x21] sm:$0x1]  ;;  %v4142_v2 = vsel %vm223_vm1, %v4141_v24, %v7816_v23 }
  0x44   : > { %2766 = vrot.lane.b32.xlu1 %v8994_v6, %s8711_s8  ;;  %v7952_v51 = vld [vmem:[%s8832_s24 + $0x39] sm:$0x1]  ;;  %v9097_v53 = vsel %vm229_vm3, %v6591_v30, %v6590_v45  ;;  %v6839_v55 = vsel %vm223_vm1, %v6838_v38, %v7936_v21  ;;  %v7953_v56 = vld [vmem:[%s8832_s24 + $0x51] sm:$0x1]  ;;  %v7095_v58 = vrot.slane %v7951_v50, 7  ;;  %v4143_v61 = vrot.slane %v7818_v14, 6 }
  0x45   : > { %v7097_v59 = vrot.slane %v7952_v51, 6  ;;  %v7819_v60 = vld [vmem:[%s8832_s24 + $0x4d] sm:$0x1]  ;;  %v6841_v63 = vsel %vm226_vm2, %v6840_v39, %v6839_v55  ;;  %v7099_v52 = vrot.slane %v7953_v56, 5  ;;  %v7832_v3 = vld [vmem:[%s8832_s24 + $0x36] sm:$0x1]  ;;  %v9118_v13 = vsel %vm229_vm3, %v3894_v42, %v3893_v36 }
  0x46   : > { %2997 = vrot.lane.b32.xlu0 %v8999_v11, %s8710_s5  ;;  %v4398_v4 = vrot.slane %v7831_v25, 7  ;;  %v9109_v7 = vsel %vm229_vm3, %v6842_v48, %v6841_v63  ;;  %v7096_v9 = vsel %vm223_vm1, %v7095_v58, %v7950_v40  ;;  %v7830_v8 = vld [vmem:[%s8832_s24 + $0x6] sm:$0x1]  ;;  %v7844_v10 = vld [vmem:[%s8832_s24 + $0x1d] sm:$0x1]  ;;  %v4145_v14 = vrot.slane %v7819_v60, 5 }
  0x47   : > { %v7098_v12 = vsel %vm226_vm2, %v7097_v59, %v7096_v9  ;;  %v4144_v18 = vsel %vm226_vm2, %v4143_v61, %v4142_v2  ;;  %v7833_v19 = vld [vmem:[%s8832_s24 + $0x4e] sm:$0x1]  ;;  %v4400_v20 = vrot.slane %v7832_v3, 6  ;;  %v7845_v22 = vld [vmem:[%s8832_s24 + $0x35] sm:$0x1]  ;;  %v4789_v23 = vrot.slane %v7844_v10, 7 }
  0x48   : > { %3153 = vrot.lane.b32.xlu1 %v8999_v11, %s8711_s8  ;;  %v9121_v17 = vsel %vm229_vm3, %v7099_v52, %v7098_v12  ;;  %v4399_v21 = vsel %vm223_vm1, %v4398_v4, %v7830_v8  ;;  %v7843_v24 = vld [vmem:[%s8832_s24 + $0x5] sm:$0x1]  ;;  %v9133_v25 = vsel %vm229_vm3, %v4145_v14, %v4144_v18  ;;  %v4402_v29 = vrot.slane %v7833_v19, 5  ;;  %v7846_v32 = vld [vmem:[%s8832_s24 + $0x4d] sm:$0x1]  ;;  %v9200_v51 = vld [vmem:[%s10165_s1 + $0x18] sm:$0xff] }
  0x49   : > { %v4401_v30 = vsel %vm226_vm2, %v4400_v20, %v4399_v21  ;;  %v4791_v33 = vrot.slane %v7845_v22, 6  ;;  %v4790_v35 = vsel %vm223_vm1, %v4789_v23, %v7843_v24  ;;  %v4793_v38 = vrot.slane %v7846_v32, 5  ;;  %v185_v45 = vld [vmem:[%s10166_s2] sm:$0xff]  ;;  %v186_v48 = vld [vmem:[%s10166_s2 + $0x8] sm:$0xff]  ;;  %v9239_v63 = vld [vmem:[%s10165_s1 + $0x58] sm:$0xff] }
  0x4a   : > { %3327 = vrot.lane.b32.xlu0 %v9043_v54, %s8710_s5  ;;  %v9143_v37 = vsel %vm229_vm3, %v4402_v29, %v4401_v30  ;;  %v8712_v42 = vmov 0   ;;  %v9206_v55 = vld [vmem:[%s10165_s1 + $0x20] sm:$0xff]  ;;  %v9216_v59 = vld [vmem:[%s10165_s1 + $0x28] sm:$0xff]  ;;  %v9253_v3 = vld [vmem:[%s10165_s1 + $0x70] sm:$0xff] }
  0x4b   : > { %v4792_v39 = vsel %vm226_vm2, %v4791_v33, %v4790_v35  ;;  %8635 = vset.pattern.permute.xlu1 %v8712_v42  ;;  %8634 = vset.pattern.permute.xlu0 %v8712_v42  ;;  %v9222_v36 = vld [vmem:[%s10165_s1 + $0x40] sm:$0xff]  ;;  %v9234_v61 = vld [vmem:[%s10165_s1 + $0x48] sm:$0xff]  ;;  %v9271_v8 = vld [vmem:[%s10165_s1 + $0x78] sm:$0xff] }
  0x4c   : > { %3408 = vrot.lane.b32.xlu1 %v9043_v54, %s8711_s8  ;;  %v9151_v40 = vsel %vm229_vm3, %v4793_v38, %v4792_v39  ;;  %v9247_v2 = vld [vmem:[%s10165_s1 + $0x60] sm:$0xff]  ;;  %v9266_v9 = vld [vmem:[%s10165_s1 + $0x68] sm:$0xff]  ;;  %v9574_v39 = vld [vmem:[%s10165_s1 + $0x30] sm:$0xff] }
  0x4d   : > { %v9293_v12 = vld [vmem:[%s10165_s1 + $0x88] sm:$0xff]  ;;  %v9555_v35 = vld [vmem:[%s10165_s1] sm:$0xff]  ;;  %v8640_v42 = vld [vmem:[%s10165_s1 + $0x38] sm:$0xff] }
  0x4e   : > { %3584 = vrot.lane.b32.xlu0 %v9090_v41, %s8710_s5 }
  0x50   : > { %3665 = vrot.lane.b32.xlu1 %v9090_v41, %s8711_s8 }
  0x52   : > { %3896 = vrot.lane.b32.xlu0 %v9118_v13, %s8710_s5 }
  0x54   : > { %4052 = vrot.lane.b32.xlu1 %v9118_v13, %s8711_s8 }
  0x56   : > { %4226 = vrot.lane.b32.xlu0 %v9133_v25, %s8710_s5 }
  0x58   : > { %4307 = vrot.lane.b32.xlu1 %v9133_v25, %s8711_s8 }
  0x5a   : > { %4483 = vrot.lane.b32.xlu0 %v9143_v37, %s8710_s5 }
  0x5c   : > { %4564 = vrot.lane.b32.xlu1 %v9143_v37, %s8711_s8 }
  0x5e   : > { %4795 = vrot.lane.b32.xlu0 %v9151_v40, %s8710_s5 }
  0x60   : > { %4951 = vrot.lane.b32.xlu1 %v9151_v40, %s8711_s8 }
  0x62   : > { %5125 = vrot.lane.b32.xlu0 %v9018_v28, %s8710_s5 }
  0x64   : > { %5206 = vrot.lane.b32.xlu1 %v9018_v28, %s8711_s8 }
  0x66   : > { %5382 = vrot.lane.b32.xlu0 %v9035_v44, %s8710_s5 }
  0x68   : > { %5463 = vrot.lane.b32.xlu1 %v9035_v44, %s8711_s8 }
  0x6a   : > { %5694 = vrot.lane.b32.xlu0 %v9053_v62, %s8710_s5 }
  0x6c   : > { %5850 = vrot.lane.b32.xlu1 %v9053_v62, %s8711_s8 }
  0x6e   : > { %6024 = vrot.lane.b32.xlu0 %v9067_v15, %s8710_s5 }
  0x70   : > { %6105 = vrot.lane.b32.xlu1 %v9067_v15, %s8711_s8 }
  0x72   : > { %6281 = vrot.lane.b32.xlu0 %v9082_v34, %s8710_s5 }
  0x74   : > { %6362 = vrot.lane.b32.xlu1 %v9082_v34, %s8711_s8 }
  0x76   : > { %6593 = vrot.lane.b32.xlu0 %v9097_v53, %s8710_s5 }
  0x78   : > { %6749 = vrot.lane.b32.xlu1 %v9097_v53, %s8711_s8 }
  0x7a   : > { %6923 = vrot.lane.b32.xlu0 %v9109_v7, %s8710_s5 }
  0x7c   : > { %7004 = vrot.lane.b32.xlu1 %v9109_v7, %s8711_s8 }
  0x7e   : > { %7180 = vrot.lane.b32.xlu0 %v9121_v17, %s8710_s5 }
  0x80   : > { %7261 = vrot.lane.b32.xlu1 %v9121_v17, %s8711_s8 }
  0x82   : > { %1040 = vperm.xlu0 %8634, %v185_v45  }
  0x84   : > { %1045 = vperm.xlu1 %8635, %v186_v48  }
  0x94   : > { %v232_v50 = vpop.permute.xlu0 %231 }
  0x95   : > { %8185 = vmatprep.subr.msk.mxu0 %vm240_vm4, %v232_v50 }
  0x96   : > { %8186 = vmatpush3.msk.msra.mxu0 %vm240_vm4, %v232_v50  ;;  %v590_v56 = vpop.permute.xlu1 %589 }
  0x97   : > { %8188 = vmatmul.mubr.msk.f32.vlgmr.msra.gmra.mxu0 %vm233_vm0, %v9200_v51 }
  0x98   : > { %v402_v58 = vpop.permute.xlu0 %401  ;;  %8197 = vmatprep.mubr.msk.f32.mxu0 %vm233_vm0, %v9206_v55 }
  0x99   : > { %8195 = vmatprep.subr.msk.mxu0 %vm240_vm4, %v402_v58 }
  0x9a   : > { %8196 = vmatpush3.msk.msra.mxu0 %vm240_vm4, %v402_v58  ;;  %v677_v60 = vpop.permute.xlu1 %676 }
  0x9b   : > { %8198 = vmatmul.mubr.msk.f32.vlgmr.msra.gmra.mxu0 %vm233_vm0, %v9216_v59  ;;  %8205 = vmatprep.subr.msk.mxu0 %vm240_vm4, %v590_v56 }
  0x9c   : > { %8206 = vmatpush3.msk.msra.mxu0 %vm240_vm4, %v590_v56  ;;  %8207 = vmatprep.mubr.msk.f32.mxu0 %vm233_vm0, %v9222_v36  ;;  %v865_v52 = vpop.permute.xlu0 %864 }
  0x9d   : > { %8210 = vmatprep.subr.msk.mxu1 %vm240_vm4, %v677_v60  ;;  %8215 = vmatprep.subr.msk.mxu0 %vm240_vm4, %v8895_v47 }
  0x9e   : > { %8211 = vmatpush3.msk.msra.mxu1 %vm240_vm4, %v677_v60  ;;  %v952_v4 = vpop.permute.xlu1 %951 }
  0x9f   : > { %8208 = vmatmul.mubr.msk.f32.vlgmr.msra.gmra.mxu0 %vm233_vm0, %v9234_v61  ;;  %8213 = vmatmul.mubr.msk.f32.vlgmr.msra.gmra.mxu1 %vm233_vm0, %v9239_v63 }
  0xa0   : > { %8216 = vmatpush3.msk.msra.mxu0 %vm240_vm4, %v8895_v47  ;;  %8217 = vmatprep.mubr.msk.f32.mxu0 %vm233_vm0, %v9247_v2  ;;  %v9279_v47 = vld [vmem:[%s10165_s1 + $0x80] sm:$0xff]  ;;  %v1200_v10 = vpop.permute.xlu0 %1199 }
  0xa1   : > { %8220 = vmatprep.subr.msk.mxu1 %vm240_vm4, %v865_v52  ;;  %8222 = vmatprep.mubr.msk.f32.mxu1 %vm233_vm0, %v9253_v3 }
  0xa2   : > { %8221 = vmatpush3.msk.msra.mxu1 %vm240_vm4, %v865_v52  ;;  %8225 = vmatprep.subr.msk.mxu0 %vm240_vm4, %v952_v4  ;;  %v1356_v14 = vpop.permute.xlu1 %1355 }
  0xa3   : > { %8218 = vmatmul.mubr.msk.f32.vlgmr.msra.gmra.mxu0 %vm233_vm0, %v9266_v9  ;;  %8223 = vmatmul.mubr.msk.f32.vlgmr.msra.gmra.mxu1 %vm233_vm0, %v9271_v8 }
  0xa4   : > { %8226 = vmatpush3.msk.msra.mxu0 %vm240_vm4, %v952_v4  ;;  %8227 = vmatprep.mubr.msk.f32.mxu0 %vm233_vm0, %v9279_v47  ;;  %v1530_v18 = vpop.permute.xlu0 %1529 }
  0xa5   : > { %8230 = vmatprep.subr.msk.mxu1 %vm240_vm4, %v1200_v10  ;;  %8232 = vmatprep.mubr.msk.f32.mxu1 %vm233_vm0, %v8816_v0 }
  0xa6   : > { %8231 = vmatpush3.msk.msra.mxu1 %vm240_vm4, %v1200_v10  ;;  %8235 = vmatprep.subr.msk.mxu0 %vm240_vm4, %v8911_v57 }
  0xa7   : > { %8228 = vmatmul.mubr.msk.f32.vlgmr.msra.gmra.mxu0 %vm233_vm0, %v9293_v12  ;;  %8233 = vmatmul.mubr.msk.f32.vlgmr.msra.gmra.mxu1 %vm233_vm0, %v9200_v51 }
  0xa8   : > { %8236 = vmatpush3.msk.msra.mxu0 %vm240_vm4, %v8911_v57  ;;  %8237 = vmatprep.mubr.msk.f32.mxu0 %vm233_vm0, %v8821_v1  ;;  %v1611_v57 = vpop.permute.xlu1 %1610  ;;  %v1787_v19 = vpop.permute.xlu0 %1786 }
  0xa9   : > { %8240 = vmatprep.subr.msk.mxu1 %vm240_vm4, %v1356_v14  ;;  %8242 = vmatprep.mubr.msk.f32.mxu1 %vm233_vm0, %v9206_v55 }
  0xaa   : > { %8241 = vmatpush3.msk.msra.mxu1 %vm240_vm4, %v1356_v14  ;;  %8245 = vmatprep.subr.msk.mxu0 %vm240_vm4, %v8924_v5 }
  0xab   : > { %8238 = vmatmul.mubr.msk.f32.vlgmr.msra.gmra.mxu0 %vm233_vm0, %v8853_v26  ;;  %8243 = vmatmul.mubr.msk.f32.vlgmr.msra.gmra.mxu1 %vm233_vm0, %v9216_v59 }
  0xac   : > { %8246 = vmatpush3.msk.msra.mxu0 %vm240_vm4, %v8924_v5  ;;  %8247 = vmatprep.mubr.msk.f32.mxu0 %vm233_vm0, %v8858_v27  ;;  %v1868_v5 = vpop.permute.xlu1 %1867  ;;  %v2099_v20 = vpop.permute.xlu0 %2098 }
  0xad   : > { %8250 = vmatprep.subr.msk.mxu1 %vm240_vm4, %v1530_v18  ;;  %8252 = vmatprep.mubr.msk.f32.mxu1 %vm233_vm0, %v9222_v36 }
  0xae   : > { %8251 = vmatpush3.msk.msra.mxu1 %vm240_vm4, %v1530_v18  ;;  %8255 = vmatprep.subr.msk.mxu0 %vm240_vm4, %v1611_v57 }
  0xaf   : > { %8248 = vmatmul.mubr.msk.f32.vlgmr.msra.gmra.mxu0 %vm233_vm0, %v8883_v43  ;;  %8253 = vmatmul.mubr.msk.f32.vlgmr.msra.gmra.mxu1 %vm233_vm0, %v9234_v61 }
  0xb0   : > { %8256 = vmatpush3.msk.msra.mxu0 %vm240_vm4, %v1611_v57  ;;  %8257 = vmatprep.mubr.msk.f32.mxu0 %vm233_vm0, %v8892_v46  ;;  %v2429_v21 = vpop.permute.xlu0 %2428 }
  0xb1   : > { %8260 = vmatprep.subr.msk.mxu1 %vm240_vm4, %v8938_v16  ;;  %8262 = vmatprep.mubr.msk.f32.mxu1 %vm233_vm0, %v9247_v2 }
  0xb2   : > { %8261 = vmatpush3.msk.msra.mxu1 %vm240_vm4, %v8938_v16  ;;  %8265 = vmatprep.subr.msk.mxu0 %vm240_vm4, %v1787_v19  ;;  %v2255_v16 = vpop.permute.xlu1 %2254 }
  0xb3   : > { %8258 = vmatmul.mubr.msk.f32.vlgmr.msra.gmra.mxu0 %vm233_vm0, %v9239_v63  ;;  %8263 = vmatmul.mubr.msk.f32.vlgmr.msra.gmra.mxu1 %vm233_vm0, %v9266_v9 }
  0xb4   : > { %8266 = vmatpush3.msk.msra.mxu0 %vm240_vm4, %v1787_v19  ;;  %8267 = vmatprep.mubr.msk.f32.mxu0 %vm233_vm0, %v9253_v3  ;;  %v2686_v22 = vpop.permute.xlu0 %2685 }
  0xb5   : > { %8270 = vmatprep.subr.msk.mxu1 %vm240_vm4, %v1868_v5  ;;  %8272 = vmatprep.mubr.msk.f32.mxu1 %vm233_vm0, %v9279_v47 }
  0xb6   : > { %8271 = vmatpush3.msk.msra.mxu1 %vm240_vm4, %v1868_v5  ;;  %8275 = vmatprep.subr.msk.mxu0 %vm240_vm4, %v2099_v20  ;;  %v8713_v5 = vmov 1966171168  }
  0xb7   : > { %8268 = vmatmul.mubr.msk.f32.vlgmr.msra.gmra.mxu0 %vm233_vm0, %v9271_v8  ;;  %8273 = vmatmul.mubr.msk.f32.vlgmr.msra.gmra.mxu1 %vm233_vm0, %v9293_v12 }
  0xb8   : > { %8276 = vmatpush3.msk.msra.mxu0 %vm240_vm4, %v2099_v20  ;;  %8277 = vmatprep.mubr.msk.f32.mxu0 %vm233_vm0, %v8816_v0  ;;  %v2998_v23 = vpop.permute.xlu0 %2997  ;;  %v1055_v20 = vunpack.c.l.s4 %v8713_v5 }
  0xb9   : > { %8280 = vmatprep.subr.msk.mxu1 %vm240_vm4, %v8953_v31  ;;  %8282 = vmatprep.mubr.msk.f32.mxu1 %vm233_vm0, %v8821_v1 }
  0xba   : > { %8281 = vmatpush3.msk.msra.mxu1 %vm240_vm4, %v8953_v31  ;;  %8285 = vmatprep.subr.msk.mxu0 %vm240_vm4, %v2255_v16  ;;  %v2510_v31 = vpop.permute.xlu1 %2509 }
  0xbb   : > { %8278 = vmatmul.mubr.msk.f32.vlgmr.msra.gmra.mxu0 %vm233_vm0, %v9200_v51  ;;  %8283 = vmatmul.mubr.msk.f32.vlgmr.msra.gmra.mxu1 %vm233_vm0, %v8853_v26 }
  0xbc   : > { %8286 = vmatpush3.msk.msra.mxu0 %vm240_vm4, %v2255_v16  ;;  %8287 = vmatprep.mubr.msk.f32.mxu0 %vm233_vm0, %v9206_v55  ;;  %v3328_v24 = vpop.permute.xlu0 %3327  ;;  %v1057_v16 = vlaneseq }
  0xbd   : > { %8290 = vmatprep.subr.msk.mxu1 %vm240_vm4, %v8970_v49  ;;  %8292 = vmatprep.mubr.msk.f32.mxu1 %vm233_vm0, %v8858_v27 }
  0xbe   : > { %8291 = vmatpush3.msk.msra.mxu1 %vm240_vm4, %v8970_v49  ;;  %8295 = vmatprep.subr.msk.mxu0 %vm240_vm4, %v2429_v21  ;;  %v2767_v49 = vpop.permute.xlu1 %2766 }
  0xbf   : > { %8288 = vmatmul.mubr.msk.f32.vlgmr.msra.gmra.mxu0 %vm233_vm0, %v9216_v59  ;;  %8293 = vmatmul.mubr.msk.f32.vlgmr.msra.gmra.mxu1 %vm233_vm0, %v8883_v43 }
  0xc0   : > { %8296 = vmatpush3.msk.msra.mxu0 %vm240_vm4, %v2429_v21  ;;  %8297 = vmatprep.mubr.msk.f32.mxu0 %vm233_vm0, %v9222_v36  ;;  %v3585_v29 = vpop.permute.xlu0 %3584 }
  0xc1   : > { %8300 = vmatprep.subr.msk.mxu1 %vm240_vm4, %v2510_v31  ;;  %8302 = vmatprep.mubr.msk.f32.mxu1 %vm233_vm0, %v8892_v46 }
  0xc2   : > { %8301 = vmatpush3.msk.msra.mxu1 %vm240_vm4, %v2510_v31  ;;  %8305 = vmatprep.subr.msk.mxu0 %vm240_vm4, %v8994_v6 }
  0xc3   : > { %8298 = vmatmul.mubr.msk.f32.vlgmr.msra.gmra.mxu0 %vm233_vm0, %v9234_v61  ;;  %8303 = vmatmul.mubr.msk.f32.vlgmr.msra.gmra.mxu1 %vm233_vm0, %v9239_v63 }
  0xc4   : > { %8306 = vmatpush3.msk.msra.mxu0 %vm240_vm4, %v8994_v6  ;;  %8307 = vmatprep.mubr.msk.f32.mxu0 %vm233_vm0, %v9247_v2  ;;  %v3154_v6 = vpop.permute.xlu1 %3153  ;;  %v3897_v30 = vpop.permute.xlu0 %3896 }
  0xc5   : > { %8310 = vmatprep.subr.msk.mxu1 %vm240_vm4, %v2686_v22  ;;  %8312 = vmatprep.mubr.msk.f32.mxu1 %vm233_vm0, %v9253_v3 }
  0xc6   : > { %8311 = vmatpush3.msk.msra.mxu1 %vm240_vm4, %v2686_v22  ;;  %8315 = vmatprep.subr.msk.mxu0 %vm240_vm4, %v2767_v49 }
  0xc7   : > { %8308 = vmatmul.mubr.msk.f32.vlgmr.msra.gmra.mxu0 %vm233_vm0, %v9266_v9  ;;  %8313 = vmatmul.mubr.msk.f32.vlgmr.msra.gmra.mxu1 %vm233_vm0, %v9271_v8 }
  0xc8   : > { %8316 = vmatpush3.msk.msra.mxu0 %vm240_vm4, %v2767_v49  ;;  %8317 = vmatprep.mubr.msk.f32.mxu0 %vm233_vm0, %v9279_v47  ;;  %v4227_v32 = vpop.permute.xlu0 %4226 }
  0xc9   : > { %8320 = vmatprep.subr.msk.mxu1 %vm240_vm4, %v2998_v23  ;;  %8322 = vmatprep.mubr.msk.f32.mxu1 %vm233_vm0, %v8816_v0 }
  0xca   : > { %8321 = vmatpush3.msk.msra.mxu1 %vm240_vm4, %v2998_v23  ;;  %8325 = vmatprep.subr.msk.mxu0 %vm240_vm4, %v8999_v11 }
  0xcb   : > { %8318 = vmatmul.mubr.msk.f32.vlgmr.msra.gmra.mxu0 %vm233_vm0, %v9293_v12  ;;  %8323 = vmatmul.mubr.msk.f32.vlgmr.msra.gmra.mxu1 %vm233_vm0, %v9200_v51 }
  0xcc   : > { %8326 = vmatpush3.msk.msra.mxu0 %vm240_vm4, %v8999_v11  ;;  %8327 = vmatprep.mubr.msk.f32.mxu0 %vm233_vm0, %v8821_v1  ;;  %v3409_v11 = vpop.permute.xlu1 %3408 }
  0xcd   : > { %8330 = vmatprep.subr.msk.mxu1 %vm240_vm4, %v3154_v6  ;;  %8332 = vmatprep.mubr.msk.f32.mxu1 %vm233_vm0, %v9206_v55 }
  0xce   : > { %8331 = vmatpush3.msk.msra.mxu1 %vm240_vm4, %v3154_v6  ;;  %8335 = vmatprep.subr.msk.mxu0 %vm240_vm4, %v9043_v54 }
  0xcf   : > { %8328 = vmatmul.mubr.msk.f32.vlgmr.msra.gmra.mxu0 %vm233_vm0, %v8853_v26  ;;  %8333 = vmatmul.mubr.msk.f32.vlgmr.msra.gmra.mxu1 %vm233_vm0, %v9216_v59 }
  0xd0   : > { %8336 = vmatpush3.msk.msra.mxu0 %vm240_vm4, %v9043_v54  ;;  %8337 = vmatprep.mubr.msk.f32.mxu0 %vm233_vm0, %v8858_v27  ;;  %v3666_v54 = vpop.permute.xlu1 %3665 }
  0xd1   : > { %8340 = vmatprep.subr.msk.mxu1 %vm240_vm4, %v3328_v24  ;;  %8342 = vmatprep.mubr.msk.f32.mxu1 %vm233_vm0, %v9222_v36 }
  0xd2   : > { %8341 = vmatpush3.msk.msra.mxu1 %vm240_vm4, %v3328_v24  ;;  %8345 = vmatprep.subr.msk.mxu0 %vm240_vm4, %v3409_v11 }
  0xd3   : > { %8338 = vmatmul.mubr.msk.f32.vlgmr.msra.gmra.mxu0 %vm233_vm0, %v8883_v43  ;;  %8343 = vmatmul.mubr.msk.f32.vlgmr.msra.gmra.mxu1 %vm233_vm0, %v9234_v61 }
  0xd4   : > { %8346 = vmatpush3.msk.msra.mxu0 %vm240_vm4, %v3409_v11  ;;  %8347 = vmatprep.mubr.msk.f32.mxu0 %vm233_vm0, %v8892_v46 }
  0xd5   : > { %8350 = vmatprep.subr.msk.mxu1 %vm240_vm4, %v9090_v41  ;;  %8352 = vmatprep.mubr.msk.f32.mxu1 %vm233_vm0, %v9247_v2 }
  0xd6   : > { %8351 = vmatpush3.msk.msra.mxu1 %vm240_vm4, %v9090_v41  ;;  %8355 = vmatprep.subr.msk.mxu0 %vm240_vm4, %v3585_v29  ;;  %v4053_v41 = vpop.permute.xlu1 %4052 }
  0xd7   : > { %8348 = vmatmul.mubr.msk.f32.vlgmr.msra.gmra.mxu0 %vm233_vm0, %v9239_v63  ;;  %8353 = vmatmul.mubr.msk.f32.vlgmr.msra.gmra.mxu1 %vm233_vm0, %v9266_v9 }
  0xd8   : > { %8356 = vmatpush3.msk.msra.mxu0 %vm240_vm4, %v3585_v29  ;;  %8357 = vmatprep.mubr.msk.f32.mxu0 %vm233_vm0, %v9253_v3  ;;  %v1056_v29 = vunpack.c.0.s8 %v1055_v20 }
  0xd9   : > { %8360 = vmatprep.subr.msk.mxu1 %vm240_vm4, %v3666_v54  ;;  %8362 = vmatprep.mubr.msk.f32.mxu1 %vm233_vm0, %v9279_v47 }
  0xda   : > { %8361 = vmatpush3.msk.msra.mxu1 %vm240_vm4, %v3666_v54  ;;  %8365 = vmatprep.subr.msk.mxu0 %vm240_vm4, %v3897_v30  ;;  %v1058_v54 = vshrl.u32 %v1057_v16, 7 }
  0xdb   : > { %8358 = vmatmul.mubr.msk.f32.vlgmr.msra.gmra.mxu0 %vm233_vm0, %v9271_v8  ;;  %8363 = vmatmul.mubr.msk.f32.vlgmr.msra.gmra.mxu1 %vm233_vm0, %v9293_v12 }
  0xdc   : > { %8366 = vmatpush3.msk.msra.mxu0 %vm240_vm4, %v3897_v30  ;;  %8367 = vmatprep.mubr.msk.f32.mxu0 %vm233_vm0, %v8816_v0  ;;  %v4308_v0 = vpop.permute.xlu1 %4307 }
  0xdd   : > { %8370 = vmatprep.subr.msk.mxu1 %vm240_vm4, %v9118_v13  ;;  %8372 = vmatprep.mubr.msk.f32.mxu1 %vm233_vm0, %v8821_v1  ;;  %v4484_v1 = vpop.permute.xlu0 %4483 }
  0xde   : > { %8371 = vmatpush3.msk.msra.mxu1 %vm240_vm4, %v9118_v13  ;;  %8375 = vmatprep.subr.msk.mxu0 %vm240_vm4, %v4053_v41 }
  0xdf   : > { %8368 = vmatmul.mubr.msk.f32.vlgmr.msra.gmra.mxu0 %vm233_vm0, %v9200_v51  ;;  %8373 = vmatmul.mubr.msk.f32.vlgmr.msra.gmra.mxu1 %vm233_vm0, %v8853_v26 }
  0xe0   : > { %8376 = vmatpush3.msk.msra.mxu0 %vm240_vm4, %v4053_v41  ;;  %8377 = vmatprep.mubr.msk.f32.mxu0 %vm233_vm0, %v9206_v55 }
  0xe1   : > { %8380 = vmatprep.subr.msk.mxu1 %vm240_vm4, %v9133_v25  ;;  %8382 = vmatprep.mubr.msk.f32.mxu1 %vm233_vm0, %v8858_v27  ;;  %v4565_v27 = vpop.permute.xlu1 %4564  ;;  %v4796_v13 = vpop.permute.xlu0 %4795 }
  0xe2   : > { %8381 = vmatpush3.msk.msra.mxu1 %vm240_vm4, %v9133_v25  ;;  %8385 = vmatprep.subr.msk.mxu0 %vm240_vm4, %v4227_v32  ;;  %v9539_v25 = vld [vmem:[%s10165_s1 + $0x10] sm:$0xff] }
  0xe3   : > { %8378 = vmatmul.mubr.msk.f32.vlgmr.msra.gmra.mxu0 %vm233_vm0, %v9216_v59  ;;  %8383 = vmatmul.mubr.msk.f32.vlgmr.msra.gmra.mxu1 %vm233_vm0, %v8883_v43 }
  0xe4   : > { %8386 = vmatpush3.msk.msra.mxu0 %vm240_vm4, %v4227_v32  ;;  %8387 = vmatprep.mubr.msk.f32.mxu0 %vm233_vm0, %v9222_v36 }
  0xe5   : > { %8390 = vmatprep.subr.msk.mxu1 %vm240_vm4, %v4308_v0  ;;  %8392 = vmatprep.mubr.msk.f32.mxu1 %vm233_vm0, %v8892_v46  ;;  %v4952_v33 = vpop.permute.xlu1 %4951 }
  0xe6   : > { %8391 = vmatpush3.msk.msra.mxu1 %vm240_vm4, %v4308_v0  ;;  %8395 = vmatprep.subr.msk.mxu0 %vm240_vm4, %v9143_v37 }
  0xe7   : > { %8388 = vmatmul.mubr.msk.f32.vlgmr.msra.gmra.mxu0 %vm233_vm0, %v9234_v61  ;;  %8393 = vmatmul.mubr.msk.f32.vlgmr.msra.gmra.mxu1 %vm233_vm0, %v9239_v63 }
  0xe8   : > { %8396 = vmatpush3.msk.msra.mxu0 %vm240_vm4, %v9143_v37  ;;  %8397 = vmatprep.mubr.msk.f32.mxu0 %vm233_vm0, %v9247_v2  ;;  %v5126_v37 = vpop.permute.xlu0 %5125 }
  0xe9   : > { %8400 = vmatprep.subr.msk.mxu1 %vm240_vm4, %v4484_v1  ;;  %8402 = vmatprep.mubr.msk.f32.mxu1 %vm233_vm0, %v9253_v3  ;;  %v5207_v38 = vpop.permute.xlu1 %5206 }
  0xea   : > { %8401 = vmatpush3.msk.msra.mxu1 %vm240_vm4, %v4484_v1  ;;  %8405 = vmatprep.subr.msk.mxu0 %vm240_vm4, %v4565_v27 }
  0xeb   : > { %8398 = vmatmul.mubr.msk.f32.vlgmr.msra.gmra.mxu0 %vm233_vm0, %v9266_v9  ;;  %8403 = vmatmul.mubr.msk.f32.vlgmr.msra.gmra.mxu1 %vm233_vm0, %v9271_v8 }
  0xec   : > { %8406 = vmatpush3.msk.msra.mxu0 %vm240_vm4, %v4565_v27  ;;  %8407 = vmatprep.mubr.msk.f32.mxu0 %vm233_vm0, %v9279_v47 }
  0xed   : > { %8410 = vmatprep.subr.msk.mxu1 %vm240_vm4, %v4796_v13  ;;  %8412 = vmatprep.mubr.msk.f32.mxu1 %vm233_vm0, %v9539_v25 }
  0xee   : > { %8411 = vmatpush3.msk.msra.mxu1 %vm240_vm4, %v4796_v13  ;;  %8415 = vmatprep.subr.msk.mxu0 %vm240_vm4, %v9151_v40 }
  0xef   : > { %8408 = vmatmul.mubr.msk.f32.vlgmr.msra.gmra.mxu0 %vm233_vm0, %v9293_v12  ;;  %8413 = vmatmul.mubr.msk.f32.vlgmr.msra.gmra.mxu1 %vm233_vm0, %v9200_v51 }
  0xf0   : > { %8416 = vmatpush3.msk.msra.mxu0 %vm240_vm4, %v9151_v40  ;;  %8417 = vmatprep.mubr.msk.f32.mxu0 %vm233_vm0, %v9555_v35  ;;  %v8639_v40 = vld [vmem:[%s10165_s1 + $0x8] sm:$0xff] }
  0xf1   : > { %8420 = vmatprep.subr.msk.mxu1 %vm240_vm4, %v4952_v33  ;;  %8422 = vmatprep.mubr.msk.f32.mxu1 %vm233_vm0, %v9206_v55 }
  0xf2   : > { %8421 = vmatpush3.msk.msra.mxu1 %vm240_vm4, %v4952_v33  ;;  %8425 = vmatprep.subr.msk.mxu0 %vm240_vm4, %v9018_v28 }
  0xf3   : > { %8418 = vmatmul.mubr.msk.f32.vlgmr.msra.gmra.mxu0 %vm233_vm0, %v8853_v26  ;;  %8423 = vmatmul.mubr.msk.f32.vlgmr.msra.gmra.mxu1 %vm233_vm0, %v9216_v59  ;;  %v5383_v26 = vpop.permute.xlu0 %5382 }
  0xf4   : > { %8426 = vmatpush3.msk.msra.mxu0 %vm240_vm4, %v9018_v28  ;;  %8427 = vmatprep.mubr.msk.f32.mxu0 %vm233_vm0, %v9574_v39 }
  0xf5   : > { %8430 = vmatprep.subr.msk.mxu1 %vm240_vm4, %v5126_v37  ;;  %8432 = vmatprep.mubr.msk.f32.mxu1 %vm233_vm0, %v9222_v36 }
  0xf6   : > { %8431 = vmatpush3.msk.msra.mxu1 %vm240_vm4, %v5126_v37  ;;  %8435 = vmatprep.subr.msk.mxu0 %vm240_vm4, %v5207_v38 }
  0xf7   : > { %8428 = vmatmul.mubr.msk.f32.vlgmr.msra.gmra.mxu0 %vm233_vm0, %v8883_v43  ;;  %8433 = vmatmul.mubr.msk.f32.vlgmr.msra.gmra.mxu1 %vm233_vm0, %v9234_v61  ;;  %v5464_v43 = vpop.permute.xlu1 %5463  ;;  %v5695_v28 = vpop.permute.xlu0 %5694 }
  0xf8   : > { %8436 = vmatpush3.msk.msra.mxu0 %vm240_vm4, %v5207_v38  ;;  %8437 = vmatprep.mubr.msk.f32.mxu0 %vm233_vm0, %v8892_v46 }
  0xf9   : > { %8440 = vmatprep.subr.msk.mxu1 %vm240_vm4, %v9035_v44  ;;  %8442 = vmatprep.mubr.msk.f32.mxu1 %vm233_vm0, %v9247_v2 }
  0xfa   : > { %8441 = vmatpush3.msk.msra.mxu1 %vm240_vm4, %v9035_v44  ;;  %8445 = vmatprep.subr.msk.mxu0 %vm240_vm4, %v5383_v26 }
  0xfb   : > { %8438 = vmatmul.mubr.msk.f32.vlgmr.msra.gmra.mxu0 %vm233_vm0, %v9239_v63  ;;  %8443 = vmatmul.mubr.msk.f32.vlgmr.msra.gmra.mxu1 %vm233_vm0, %v9266_v9  ;;  %v5851_v46 = vpop.permute.xlu1 %5850  ;;  %v6025_v44 = vpop.permute.xlu0 %6024 }
  0xfc   : > { %8446 = vmatpush3.msk.msra.mxu0 %vm240_vm4, %v5383_v26  ;;  %8447 = vmatprep.mubr.msk.f32.mxu0 %vm233_vm0, %v9253_v3 }
  0xfd   : > { %8450 = vmatprep.subr.msk.mxu1 %vm240_vm4, %v5464_v43  ;;  %8452 = vmatprep.mubr.msk.f32.mxu1 %vm233_vm0, %v9279_v47 }
  0xfe   : > { %8451 = vmatpush3.msk.msra.mxu1 %vm240_vm4, %v5464_v43  ;;  %8455 = vmatprep.subr.msk.mxu0 %vm240_vm4, %v5695_v28 }
  0xff   : > { %8448 = vmatmul.mubr.msk.f32.vlgmr.msra.gmra.mxu0 %vm233_vm0, %v9271_v8  ;;  %8453 = vmatmul.mubr.msk.f32.vlgmr.msra.gmra.mxu1 %vm233_vm0, %v9293_v12  ;;  %v6282_v45 = vpop.permute.xlu0 %6281 }
 0x100   : > { %8456 = vmatpush3.msk.msra.mxu0 %vm240_vm4, %v5695_v28  ;;  %8457 = vmatprep.mubr.msk.f32.mxu0 %vm233_vm0, %v9539_v25 }
 0x101   : > { %8460 = vmatprep.subr.msk.mxu1 %vm240_vm4, %v9053_v62  ;;  %8462 = vmatprep.mubr.msk.f32.mxu1 %vm233_vm0, %v9555_v35 }
 0x102   : > { %8461 = vmatpush3.msk.msra.mxu1 %vm240_vm4, %v9053_v62  ;;  %8465 = vmatprep.subr.msk.mxu0 %vm240_vm4, %v5851_v46  ;;  %v6106_v62 = vpop.permute.xlu1 %6105 }
 0x103   : > { %8458 = vmatmul.mubr.msk.f32.vlgmr.msra.gmra.mxu0 %vm233_vm0, %v9200_v51  ;;  %8463 = vmatmul.mubr.msk.f32.vlgmr.msra.gmra.mxu1 %vm233_vm0, %v8639_v40  ;;  %v6594_v50 = vpop.permute.xlu0 %6593 }
 0x104   : > { %8466 = vmatpush3.msk.msra.mxu0 %vm240_vm4, %v5851_v46  ;;  %8467 = vmatprep.mubr.msk.f32.mxu0 %vm233_vm0, %v9206_v55 }
 0x105   : > { %8470 = vmatprep.subr.msk.mxu1 %vm240_vm4, %v9067_v15  ;;  %8472 = vmatprep.mubr.msk.f32.mxu1 %vm233_vm0, %v9574_v39 }
 0x106   : > { %8471 = vmatpush3.msk.msra.mxu1 %vm240_vm4, %v9067_v15  ;;  %8475 = vmatprep.subr.msk.mxu0 %vm240_vm4, %v6025_v44  ;;  %v8641_v15 = vld [vmem:[%s10165_s1 + $0x50] sm:$0xff]  ;;  %v6363_v48 = vpop.permute.xlu1 %6362 }
 0x107   : > { %8468 = vmatmul.mubr.msk.f32.vlgmr.msra.gmra.mxu0 %vm233_vm0, %v9216_v59  ;;  %8473 = vmatmul.mubr.msk.f32.vlgmr.msra.gmra.mxu1 %vm233_vm0, %v8640_v42  ;;  %v6924_v56 = vpop.permute.xlu0 %6923 }
 0x108   : > { %8476 = vmatpush3.msk.msra.mxu0 %vm240_vm4, %v6025_v44  ;;  %8477 = vmatprep.mubr.msk.f32.mxu0 %vm233_vm0, %v9222_v36 }
 0x109   : > { %8480 = vmatprep.subr.msk.mxu1 %vm240_vm4, %v6106_v62  ;;  %8482 = vmatprep.mubr.msk.f32.mxu1 %vm233_vm0, %v8641_v15 }
 0x10a   : > { %8481 = vmatpush3.msk.msra.mxu1 %vm240_vm4, %v6106_v62  ;;  %8485 = vmatprep.subr.msk.mxu0 %vm240_vm4, %v9082_v34 }
 0x10b   : > { %8478 = vmatmul.mubr.msk.f32.vlgmr.msra.gmra.mxu0 %vm233_vm0, %v9234_v61  ;;  %8483 = vmatmul.mubr.msk.f32.vlgmr.msra.gmra.mxu1 %vm233_vm0, %v9239_v63 }
 0x10c   : > { %8486 = vmatpush3.msk.msra.mxu0 %vm240_vm4, %v9082_v34  ;;  %8487 = vmatprep.mubr.msk.f32.mxu0 %vm233_vm0, %v9247_v2  ;;  %v6750_v34 = vpop.permute.xlu1 %6749 }
 0x10d   : > { %8490 = vmatprep.subr.msk.mxu1 %vm240_vm4, %v6282_v45  ;;  %8492 = vmatprep.mubr.msk.f32.mxu1 %vm233_vm0, %v9253_v3 }
 0x10e   : > { %8491 = vmatpush3.msk.msra.mxu1 %vm240_vm4, %v6282_v45  ;;  %8495 = vmatprep.subr.msk.mxu0 %vm240_vm4, %v6363_v48 }
 0x10f   : > { %8488 = vmatmul.mubr.msk.f32.vlgmr.msra.gmra.mxu0 %vm233_vm0, %v9266_v9  ;;  %8493 = vmatmul.mubr.msk.f32.vlgmr.msra.gmra.mxu1 %vm233_vm0, %v9271_v8 }
 0x110   : > { %8496 = vmatpush3.msk.msra.mxu0 %vm240_vm4, %v6363_v48  ;;  %8497 = vmatprep.mubr.msk.f32.mxu0 %vm233_vm0, %v9279_v47 }
 0x111   : > { %8500 = vmatprep.subr.msk.mxu1 %vm240_vm4, %v6594_v50  ;;  %8502 = vmatprep.mubr.msk.f32.mxu1 %vm233_vm0, %v9539_v25 }
 0x112   : > { %8501 = vmatpush3.msk.msra.mxu1 %vm240_vm4, %v6594_v50  ;;  %8505 = vmatprep.subr.msk.mxu0 %vm240_vm4, %v9097_v53 }
 0x113   : > { %8498 = vmatmul.mubr.msk.f32.vlgmr.msra.gmra.mxu0 %vm233_vm0, %v9293_v12  ;;  %8503 = vmatmul.mubr.msk.f32.vlgmr.msra.gmra.mxu1 %vm233_vm0, %v9200_v51  ;;  %v7181_v51 = vpop.permute.xlu0 %7180 }
 0x114   : > { %8506 = vmatpush3.msk.msra.mxu0 %vm240_vm4, %v9097_v53  ;;  %8507 = vmatprep.mubr.msk.f32.mxu0 %vm233_vm0, %v9555_v35  ;;  %v7005_v53 = vpop.permute.xlu1 %7004  ;;  %v9740_v35 = vsub.s32 %v1056_v29, %v1058_v54 }
 0x115   : > { %8510 = vmatprep.subr.msk.mxu1 %vm240_vm4, %v6750_v34  ;;  %8512 = vmatprep.mubr.msk.f32.mxu1 %vm233_vm0, %v9206_v55 }
 0x116   : > { %8511 = vmatpush3.msk.msra.mxu1 %vm240_vm4, %v6750_v34  ;;  %8515 = vmatprep.subr.msk.mxu0 %vm240_vm4, %v9109_v7 }
 0x117   : > { %8508 = vmatmul.mubr.msk.f32.vlgmr.msra.gmra.mxu0 %vm233_vm0, %v8639_v40  ;;  %8513 = vmatmul.mubr.msk.f32.vlgmr.msra.gmra.mxu1 %vm233_vm0, %v9216_v59  ;;  %v9738_v27 = vpop.permute.xlu0 %1040 }
 0x118   : > { %8516 = vmatpush3.msk.msra.mxu0 %vm240_vm4, %v9109_v7  ;;  %8517 = vmatprep.mubr.msk.f32.mxu0 %vm233_vm0, %v9574_v39  ;;  %v7262_v7 = vpop.permute.xlu1 %7261 }
 0x119   : > { %8520 = vmatprep.subr.msk.mxu1 %vm240_vm4, %v6924_v56  ;;  %8522 = vmatprep.mubr.msk.f32.mxu1 %vm233_vm0, %v9222_v36 }
 0x11a   : > { %8521 = vmatpush3.msk.msra.mxu1 %vm240_vm4, %v6924_v56  ;;  %8525 = vmatprep.subr.msk.mxu0 %vm240_vm4, %v7005_v53 }
 0x11b   : > { %8518 = vmatmul.mubr.msk.f32.vlgmr.msra.gmra.mxu0 %vm233_vm0, %v8640_v42  ;;  %8523 = vmatmul.mubr.msk.f32.vlgmr.msra.gmra.mxu1 %vm233_vm0, %v9234_v61 }
 0x11c   : > { %8526 = vmatpush3.msk.msra.mxu0 %vm240_vm4, %v7005_v53  ;;  %8527 = vmatprep.mubr.msk.f32.mxu0 %vm233_vm0, %v8641_v15  ;;  %v9736_v30 = vpop.permute.xlu1 %1045 }
 0x11d   : > { %8530 = vmatprep.subr.msk.mxu1 %vm240_vm4, %v9121_v17  ;;  %8532 = vmatprep.mubr.msk.f32.mxu1 %vm233_vm0, %v9247_v2 }
 0x11e   : > { %8531 = vmatpush3.msk.msra.mxu1 %vm240_vm4, %v9121_v17  ;;  %8535 = vmatprep.subr.msk.mxu0 %vm240_vm4, %v7181_v51  ;;  %v8194_v17 = vpop.f32.mrf.mxu1 }
 0x11f   : > { %8528 = vmatmul.mubr.msk.f32.vlgmr.msra.gmra.mxu0 %vm233_vm0, %v9239_v63  ;;  %8533 = vmatmul.mubr.msk.f32.vlgmr.msra.gmra.mxu1 %vm233_vm0, %v9266_v9 }
 0x120   : > { %8536 = vmatpush3.msk.msra.mxu0 %vm240_vm4, %v7181_v51  ;;  %8537 = vmatprep.mubr.msk.f32.mxu0 %vm233_vm0, %v9253_v3  ;;  %v392_v55 = vpop.f32.mrf.mxu1 }
 0x121   : > { %8540 = vmatprep.subr.msk.mxu1 %vm240_vm4, %v7262_v7  ;;  %8542 = vmatprep.mubr.msk.f32.mxu1 %vm233_vm0, %v9279_v47 }
 0x122   : > { %8541 = vmatpush3.msk.msra.mxu1 %vm240_vm4, %v7262_v7  ;;  %v8204_v59 = vpop.f32.mrf.mxu1 }
 0x123   : > { %8538 = vmatmul.mubr.msk.f32.vlgmr.msra.gmra.mxu0 %vm233_vm0, %v9271_v8  ;;  %8543 = vmatmul.mubr.msk.f32.vlgmr.msra.gmra.mxu1 %vm233_vm0, %v9293_v12 }
 0x124   : > { %v578_v63 = vpop.f32.mrf.mxu1 }
 0x157   : > { %v8189_v58 = vpop.f32.mrf.mxu0 }
 0x158   : > { %v398_v60 = vadd.f32 %v8194_v17, %v8189_v58 }
 0x159   : > { %v309_v36 = vpop.f32.mrf.mxu0 }
 0x15a   : > { %v393_v52 = vadd.f32 %v392_v55, %v309_v36 }
 0x15b   : > { %v8199_v61 = vpop.f32.mrf.mxu0 }
 0x15c   : > { %v487_v2 = vadd.f32 %v8199_v61, %v398_v60 }
 0x15d   : > { %v477_v3 = vpop.f32.mrf.mxu0 }
 0x15e   : > { %v588_v4 = vadd.f32 %v8204_v59, %v487_v2  ;;  %v486_v9 = vadd.f32 %v477_v3, %v393_v52 }
 0x15f   : > { %v8209_v47 = vpop.f32.mrf.mxu0  ;;  %v8214_v10 = vpop.f32.mrf.mxu1 }
 0x160   : > { %v587_v14 = vadd.f32 %v578_v63, %v486_v9  ;;  %v675_v8 = vadd.f32 %v8209_v47, %v588_v4 }
 0x161   : > { %v665_v18 = vpop.f32.mrf.mxu0  ;;  %v752_v57 = vpop.f32.mrf.mxu1 }
 0x162   : > { %v762_v12 = vadd.f32 %v8214_v10, %v675_v8  ;;  %v674_v19 = vadd.f32 %v665_v18, %v587_v14 }
 0x163   : > { %v8219_v21 = vpop.f32.mrf.mxu0  ;;  %v8224_v31 = vpop.f32.mrf.mxu1 }
 0x164   : > { %v761_v22 = vadd.f32 %v752_v57, %v674_v19  ;;  %v863_v49 = vadd.f32 %v8219_v21, %v762_v12 }
 0x165   : > { %v853_v23 = vpop.f32.mrf.mxu0  ;;  %v940_v6 = vpop.f32.mrf.mxu1 }
 0x166   : > { %v950_v24 = vadd.f32 %v8224_v31, %v863_v49  ;;  %v862_v11 = vadd.f32 %v853_v23, %v761_v22 }
 0x167   : > { %v8229_v41 = vpop.f32.mrf.mxu0  ;;  %v8234_v32 = vpop.f32.mrf.mxu1 }
 0x168   : > { %v949_v0 = vadd.f32 %v940_v6, %v862_v11  ;;  %v1037_v1 = vadd.f32 %v8229_v41, %v950_v24 }
 0x169   : > { %v1027_v13 = vpop.f32.mrf.mxu0  ;;  %v1269_v25 = vpop.f32.mrf.mxu1 }
 0x16a   : > { %v1036_v33 = vadd.f32 %v1027_v13, %v949_v0  ;;  %v1049_v37 = vadd.f32 %v9736_v30, %v1037_v1 }
 0x16b   : > { %v8239_v38 = vpop.f32.mrf.mxu0  ;;  %v8244_v39 = vpop.f32.mrf.mxu1 }
 0x16c   : > { %v1051_v26 = vmax.f32 %v1049_v37, 0.0  ;;  %v1352_v43 = vadd.f32 %v8239_v38, %v8234_v32  ;;  %v1048_v28 = vadd.f32 %v9738_v27, %v1036_v33 }
 0x16d   : > { %v1346_v46 = vpop.f32.mrf.mxu0  ;;  %v1425_v44 = vpop.f32.mrf.mxu1 }
 0x16e   : > { %v1120_v40 = vcombine.high %v1051_v26, %v1051_v26  ;;  %v1127_v62 = vrot.slane %v1051_v26, %v9740_v35  ;;  %v1050_v42 = vmax.f32 %v1048_v28, 0.0  ;;  %v1435_v45 = vadd.f32 %v8244_v39, %v1352_v43 }
 0x16f   : > { %v1347_v15 = vadd.f32 %v1346_v46, %v1269_v25  ;;  %v8249_v48 = vpop.f32.mrf.mxu0  ;;  %v8254_v50 = vpop.f32.mrf.mxu1 }
 0x170   : > { %v1134_v34 = vrot.slane %v1120_v40, %v9740_v35  ;;  %v1135_v56 = vcombine.high %v1127_v62, %v1127_v62  ;;  %v1143_v53 = vrot.slane %v1127_v62, %v9740_v35  ;;  %v1053_v51 = vcombine.high %v1050_v42, %v1050_v42 }
 0x171   : > { %v1060_v7 = vrot.slane %v1050_v42, %v9740_v35  ;;  %v1434_v17 = vadd.f32 %v1425_v44, %v1347_v15  ;;  %v1528_v55 = vadd.f32 %v8249_v48, %v1435_v45  ;;  %v1518_v58 = vpop.f32.mrf.mxu0  ;;  %v1599_v59 = vpop.f32.mrf.mxu1 }
 0x172   : > { %v1136_v36 = vcombine.high %v1134_v34, %v1134_v34  ;;  %v1150_v60 = vrot.slane %v1134_v34, %v9740_v35  ;;  %v1157_v61 = vrot.slane %v1135_v56, %v9740_v35  ;;  %v1165_v63 = vcombine.high %v1143_v53, %v1143_v53  ;;  %1177 = vst.msk [vmem:[%s9752_s11 + $0x1] sm:$0x1] %vm1110_vm5, %v1143_v53 }
 0x173   : > { %v1067_v52 = vrot.slane %v1053_v51, %v9740_v35  ;;  %v1068_v2 = vcombine.high %v1060_v7, %v1060_v7  ;;  %v1076_v3 = vrot.slane %v1060_v7, %v9740_v35  ;;  %v1609_v4 = vadd.f32 %v8254_v50, %v1528_v55  ;;  %v8259_v9 = vpop.f32.mrf.mxu0  ;;  %v8264_v47 = vpop.f32.mrf.mxu1 }
 0x174   : > { %v1164_v10 = vrot.slane %v1136_v36, %v9740_v35  ;;  %v1166_v14 = vcombine.high %v1150_v60, %v1150_v60  ;;  %v1167_v8 = vcombine.high %v1157_v61, %v1157_v61  ;;  %1178 = vst.msk [vmem:[%s9752_s11 + $0x11] sm:$0x1] %vm1110_vm5, %v1157_v61  ;;  %1179 = vst.msk [vmem:[%s9752_s11 + $0x21] sm:$0x1] %vm1110_vm5, %v1165_v63 }
 0x175   : > { %1181 = vst.msk [vmem:[%s9752_s11 + $0x41] sm:$0x1] %vm1110_vm5, %v1150_v60  ;;  %v1527_v18 = vadd.f32 %v1518_v58, %v1434_v17  ;;  %v1069_v57 = vcombine.high %v1067_v52, %v1067_v52  ;;  %v1083_v12 = vrot.slane %v1067_v52, %v9740_v35  ;;  %v1090_v19 = vrot.slane %v1068_v2, %v9740_v35  ;;  %v1680_v20 = vpop.f32.mrf.mxu0  ;;  %v1775_v16 = vpop.f32.mrf.mxu1 }
 0x176   : > { %v1098_v5 = vcombine.high %v1076_v3, %v1076_v3  ;;  %1111 = vst.msk [vmem:[%s9752_s11] sm:$0x1] %vm1110_vm5, %v1076_v3  ;;  %v1168_v21 = vcombine.high %v1164_v10, %v1164_v10  ;;  %1180 = vst.msk [vmem:[%s9752_s11 + $0x31] sm:$0x1] %vm1110_vm5, %v1167_v8  ;;  %v1690_v22 = vadd.f32 %v8259_v9, %v1609_v4 }
 0x177   : > { %1182 = vst.msk [vmem:[%s9752_s11 + $0x51] sm:$0x1] %vm1110_vm5, %v1164_v10  ;;  %1183 = vst.msk [vmem:[%s9752_s11 + $0x61] sm:$0x1] %vm1110_vm5, %v1166_v14  ;;  %v1608_v31 = vadd.f32 %v1599_v59, %v1527_v18  ;;  %v1097_v49 = vrot.slane %v1069_v57, %v9740_v35  ;;  %v1099_v23 = vcombine.high %v1083_v12, %v1083_v12  ;;  %v8269_v24 = vpop.f32.mrf.mxu0  ;;  %v8274_v11 = vpop.f32.mrf.mxu1 }
 0x178   : > { %v1100_v6 = vcombine.high %v1090_v19, %v1090_v19  ;;  %1112 = vst.msk [vmem:[%s9752_s11 + $0x10] sm:$0x1] %vm1110_vm5, %v1090_v19  ;;  %1113 = vst.msk [vmem:[%s9752_s11 + $0x20] sm:$0x1] %vm1110_vm5, %v1098_v5  ;;  %v1785_v29 = vadd.f32 %v8264_v47, %v1690_v22 }
 0x179   : > { %1115 = vst.msk [vmem:[%s9752_s11 + $0x40] sm:$0x1] %vm1110_vm5, %v1083_v12  ;;  %1184 = vst.msk [vmem:[%s9752_s11 + $0x71] sm:$0x1] %vm1110_vm5, %v1168_v21  ;;  %v1689_v54 = vadd.f32 %v1680_v20, %v1608_v31  ;;  %v1101_v41 = vcombine.high %v1097_v49, %v1097_v49  ;;  %v1856_v32 = vpop.f32.mrf.mxu0  ;;  %v1937_v0 = vpop.f32.mrf.mxu1 }
 0x17a   : > { %1114 = vst.msk [vmem:[%s9752_s11 + $0x30] sm:$0x1] %vm1110_vm5, %v1100_v6  ;;  %1116 = vst.msk [vmem:[%s9752_s11 + $0x50] sm:$0x1] %vm1110_vm5, %v1097_v49  ;;  %v1866_v13 = vadd.f32 %v8269_v24, %v1785_v29 }
 0x17b   : > { %1117 = vst.msk [vmem:[%s9752_s11 + $0x60] sm:$0x1] %vm1110_vm5, %v1099_v23  ;;  %v1784_v1 = vadd.f32 %v1775_v16, %v1689_v54  ;;  %1118 = vst.msk [vmem:[%s9752_s11 + $0x70] sm:$0x1] %vm1110_vm5, %v1101_v41  ;;  %v8279_v25 = vpop.f32.mrf.mxu0  ;;  %v8284_v33 = vpop.f32.mrf.mxu1 }
 0x17c   : > { %v1947_v37 = vadd.f32 %v8274_v11, %v1866_v13  ;;  %v2251_v46 = vadd.f32 %v8284_v33, %v8279_v25 }
 0x17d   : > { %v1865_v38 = vadd.f32 %v1856_v32, %v1784_v1  ;;  %v2168_v39 = vpop.f32.mrf.mxu0  ;;  %v2245_v26 = vpop.f32.mrf.mxu1 }
 0x17e   : > { %v1949_v43 = vadd.f32 %v1947_v37, %v9736_v30  ;;  %v2246_v15 = vadd.f32 %v2245_v26, %v2168_v39 }
 0x17f   : > { %v1946_v28 = vadd.f32 %v1937_v0, %v1865_v38  ;;  %v8289_v44 = vpop.f32.mrf.mxu0  ;;  %v8294_v40 = vpop.f32.mrf.mxu1 }
 0x180   : > { %v1951_v62 = vmax.f32 %v1949_v43, 0.0  ;;  %v2334_v45 = vadd.f32 %v8289_v44, %v2251_v46 }
 0x181   : > { %v1948_v42 = vadd.f32 %v1946_v28, %v9738_v27  ;;  %v2324_v48 = vpop.f32.mrf.mxu0  ;;  %v2417_v50 = vpop.f32.mrf.mxu1 }
 0x182   : > { %v2019_v34 = vcombine.high %v1951_v62, %v1951_v62  ;;  %v2026_v56 = vrot.slane %v1951_v62, %v9740_v35  ;;  %v2427_v51 = vadd.f32 %v8294_v40, %v2334_v45  ;;  %v2333_v7 = vadd.f32 %v2324_v48, %v2246_v15 }
 0x183   : > { %v1950_v53 = vmax.f32 %v1948_v42, 0.0  ;;  %v8299_v17 = vpop.f32.mrf.mxu0  ;;  %v8304_v55 = vpop.f32.mrf.mxu1 }
 0x184   : > { %v2033_v58 = vrot.slane %v2019_v34, %v9740_v35  ;;  %v2034_v59 = vcombine.high %v2026_v56, %v2026_v56  ;;  %v2042_v36 = vrot.slane %v2026_v56, %v9740_v35  ;;  %v2426_v63 = vadd.f32 %v2417_v50, %v2333_v7 }
 0x185   : > { %v1953_v60 = vcombine.high %v1950_v53, %v1950_v53  ;;  %v1960_v61 = vrot.slane %v1950_v53, %v9740_v35  ;;  %v2508_v52 = vadd.f32 %v8299_v17, %v2427_v51  ;;  %v2498_v2 = vpop.f32.mrf.mxu0  ;;  %v2579_v3 = vpop.f32.mrf.mxu1 }
 0x186   : > { %v2035_v4 = vcombine.high %v2033_v58, %v2033_v58  ;;  %v2049_v9 = vrot.slane %v2033_v58, %v9740_v35  ;;  %v2056_v47 = vrot.slane %v2034_v59, %v9740_v35  ;;  %v2064_v10 = vcombine.high %v2042_v36, %v2042_v36  ;;  %2076 = vst.msk [vmem:[%s9752_s11 + $0x3] sm:$0x1] %vm1110_vm5, %v2042_v36 }
 0x187   : > { %v1967_v14 = vrot.slane %v1953_v60, %v9740_v35  ;;  %v1968_v8 = vcombine.high %v1960_v61, %v1960_v61  ;;  %v1976_v18 = vrot.slane %v1960_v61, %v9740_v35  ;;  %v2589_v57 = vadd.f32 %v8304_v55, %v2508_v52  ;;  %v8309_v12 = vpop.f32.mrf.mxu0  ;;  %v8314_v19 = vpop.f32.mrf.mxu1 }
 0x188   : > { %v2063_v5 = vrot.slane %v2035_v4, %v9740_v35  ;;  %v2065_v20 = vcombine.high %v2049_v9, %v2049_v9  ;;  %v2066_v16 = vcombine.high %v2056_v47, %v2056_v47  ;;  %2077 = vst.msk [vmem:[%s9752_s11 + $0x13] sm:$0x1] %vm1110_vm5, %v2056_v47  ;;  %2078 = vst.msk [vmem:[%s9752_s11 + $0x23] sm:$0x1] %vm1110_vm5, %v2064_v10 }
 0x189   : > { %2080 = vst.msk [vmem:[%s9752_s11 + $0x43] sm:$0x1] %vm1110_vm5, %v2049_v9  ;;  %v2507_v21 = vadd.f32 %v2498_v2, %v2426_v63  ;;  %v1969_v31 = vcombine.high %v1967_v14, %v1967_v14  ;;  %v1983_v22 = vrot.slane %v1967_v14, %v9740_v35  ;;  %v1990_v49 = vrot.slane %v1968_v8, %v9740_v35  ;;  %v2674_v6 = vpop.f32.mrf.mxu0  ;;  %v2755_v24 = vpop.f32.mrf.mxu1 }
 0x18a   : > { %v1998_v23 = vcombine.high %v1976_v18, %v1976_v18  ;;  %2010 = vst.msk [vmem:[%s9752_s11 + $0x2] sm:$0x1] %vm1110_vm5, %v1976_v18  ;;  %v2067_v11 = vcombine.high %v2063_v5, %v2063_v5  ;;  %2079 = vst.msk [vmem:[%s9752_s11 + $0x33] sm:$0x1] %vm1110_vm5, %v2066_v16  ;;  %v2684_v54 = vadd.f32 %v8309_v12, %v2589_v57 }
 0x18b   : > { %2081 = vst.msk [vmem:[%s9752_s11 + $0x53] sm:$0x1] %vm1110_vm5, %v2063_v5  ;;  %2082 = vst.msk [vmem:[%s9752_s11 + $0x63] sm:$0x1] %vm1110_vm5, %v2065_v20  ;;  %v2588_v29 = vadd.f32 %v2579_v3, %v2507_v21  ;;  %v1997_v41 = vrot.slane %v1969_v31, %v9740_v35  ;;  %v1999_v32 = vcombine.high %v1983_v22, %v1983_v22  ;;  %v8319_v1 = vpop.f32.mrf.mxu0  ;;  %v8324_v13 = vpop.f32.mrf.mxu1 }
 0x18c   : > { %v2000_v0 = vcombine.high %v1990_v49, %v1990_v49  ;;  %2011 = vst.msk [vmem:[%s9752_s11 + $0x12] sm:$0x1] %vm1110_vm5, %v1990_v49  ;;  %2012 = vst.msk [vmem:[%s9752_s11 + $0x22] sm:$0x1] %vm1110_vm5, %v1998_v23  ;;  %v2765_v25 = vadd.f32 %v8314_v19, %v2684_v54 }
 0x18d   : > { %2014 = vst.msk [vmem:[%s9752_s11 + $0x42] sm:$0x1] %vm1110_vm5, %v1983_v22  ;;  %2083 = vst.msk [vmem:[%s9752_s11 + $0x73] sm:$0x1] %vm1110_vm5, %v2067_v11  ;;  %v2683_v33 = vadd.f32 %v2674_v6, %v2588_v29  ;;  %v2001_v37 = vcombine.high %v1997_v41, %v1997_v41  ;;  %v2836_v38 = vpop.f32.mrf.mxu0  ;;  %v3067_v39 = vpop.f32.mrf.mxu1 }
 0x18e   : > { %2013 = vst.msk [vmem:[%s9752_s11 + $0x32] sm:$0x1] %vm1110_vm5, %v2000_v0  ;;  %2015 = vst.msk [vmem:[%s9752_s11 + $0x52] sm:$0x1] %vm1110_vm5, %v1997_v41  ;;  %v2846_v43 = vadd.f32 %v8319_v1, %v2765_v25 }
 0x18f   : > { %2016 = vst.msk [vmem:[%s9752_s11 + $0x62] sm:$0x1] %vm1110_vm5, %v1999_v32  ;;  %v2764_v26 = vadd.f32 %v2755_v24, %v2683_v33  ;;  %2017 = vst.msk [vmem:[%s9752_s11 + $0x72] sm:$0x1] %vm1110_vm5, %v2001_v37  ;;  %v8329_v28 = vpop.f32.mrf.mxu0  ;;  %v8334_v46 = vpop.f32.mrf.mxu1 }
 0x190   : > { %v2848_v44 = vadd.f32 %v2846_v43, %v9736_v30  ;;  %v3150_v62 = vadd.f32 %v8329_v28, %v8324_v13 }
 0x191   : > { %v2845_v40 = vadd.f32 %v2836_v38, %v2764_v26  ;;  %v3144_v42 = vpop.f32.mrf.mxu0  ;;  %v3223_v45 = vpop.f32.mrf.mxu1 }
 0x192   : > { %v2850_v15 = vmax.f32 %v2848_v44, 0.0  ;;  %v3233_v50 = vadd.f32 %v8334_v46, %v3150_v62  ;;  %v3145_v34 = vadd.f32 %v3144_v42, %v3067_v39 }
 0x193   : > { %v2847_v48 = vadd.f32 %v2845_v40, %v9738_v27  ;;  %v8339_v56 = vpop.f32.mrf.mxu0  ;;  %v8344_v53 = vpop.f32.mrf.mxu1 }
 0x194   : > { %v2918_v51 = vcombine.high %v2850_v15, %v2850_v15  ;;  %v2925_v7 = vrot.slane %v2850_v15, %v9740_v35  ;;  %v3232_v55 = vadd.f32 %v3223_v45, %v3145_v34  ;;  %v3326_v58 = vadd.f32 %v8339_v56, %v3233_v50 }
 0x195   : > { %v2849_v17 = vmax.f32 %v2847_v48, 0.0  ;;  %v3316_v59 = vpop.f32.mrf.mxu0  ;;  %v3397_v36 = vpop.f32.mrf.mxu1 }
 0x196   : > { %v2932_v60 = vrot.slane %v2918_v51, %v9740_v35  ;;  %v2933_v61 = vcombine.high %v2925_v7, %v2925_v7  ;;  %v2941_v63 = vrot.slane %v2925_v7, %v9740_v35  ;;  %v3407_v3 = vadd.f32 %v8344_v53, %v3326_v58 }
 0x197   : > { %v2852_v52 = vcombine.high %v2849_v17, %v2849_v17  ;;  %v2859_v2 = vrot.slane %v2849_v17, %v9740_v35  ;;  %v3325_v4 = vadd.f32 %v3316_v59, %v3232_v55  ;;  %v8349_v9 = vpop.f32.mrf.mxu0  ;;  %v8354_v47 = vpop.f32.mrf.mxu1 }
 0x198   : > { %v2934_v10 = vcombine.high %v2932_v60, %v2932_v60  ;;  %v2948_v14 = vrot.slane %v2932_v60, %v9740_v35  ;;  %v2955_v8 = vrot.slane %v2933_v61, %v9740_v35  ;;  %v2963_v18 = vcombine.high %v2941_v63, %v2941_v63  ;;  %2975 = vst.msk [vmem:[%s9752_s11 + $0x5] sm:$0x1] %vm1110_vm5, %v2941_v63 }
 0x199   : > { %v2866_v57 = vrot.slane %v2852_v52, %v9740_v35  ;;  %v2867_v12 = vcombine.high %v2859_v2, %v2859_v2  ;;  %v2875_v19 = vrot.slane %v2859_v2, %v9740_v35  ;;  %v3406_v5 = vadd.f32 %v3397_v36, %v3325_v4  ;;  %v3478_v20 = vpop.f32.mrf.mxu0  ;;  %v3573_v16 = vpop.f32.mrf.mxu1 }
 0x19a   : > { %v2962_v21 = vrot.slane %v2934_v10, %v9740_v35  ;;  %v2964_v31 = vcombine.high %v2948_v14, %v2948_v14  ;;  %v2965_v22 = vcombine.high %v2955_v8, %v2955_v8  ;;  %2976 = vst.msk [vmem:[%s9752_s11 + $0x15] sm:$0x1] %vm1110_vm5, %v2955_v8  ;;  %2977 = vst.msk [vmem:[%s9752_s11 + $0x25] sm:$0x1] %vm1110_vm5, %v2963_v18 }
 0x19b   : > { %2979 = vst.msk [vmem:[%s9752_s11 + $0x45] sm:$0x1] %vm1110_vm5, %v2948_v14  ;;  %v3488_v49 = vadd.f32 %v8349_v9, %v3407_v3  ;;  %v2868_v23 = vcombine.high %v2866_v57, %v2866_v57  ;;  %v2882_v6 = vrot.slane %v2866_v57, %v9740_v35  ;;  %v2889_v24 = vrot.slane %v2867_v12, %v9740_v35  ;;  %v8359_v29 = vpop.f32.mrf.mxu0  ;;  %v8364_v54 = vpop.f32.mrf.mxu1 }
 0x19c   : > { %v2897_v11 = vcombine.high %v2875_v19, %v2875_v19  ;;  %2909 = vst.msk [vmem:[%s9752_s11 + $0x4] sm:$0x1] %vm1110_vm5, %v2875_v19  ;;  %v2966_v41 = vcombine.high %v2962_v21, %v2962_v21  ;;  %2978 = vst.msk [vmem:[%s9752_s11 + $0x35] sm:$0x1] %vm1110_vm5, %v2965_v22  ;;  %v3487_v0 = vadd.f32 %v3478_v20, %v3406_v5 }
 0x19d   : > { %2980 = vst.msk [vmem:[%s9752_s11 + $0x55] sm:$0x1] %vm1110_vm5, %v2962_v21  ;;  %2981 = vst.msk [vmem:[%s9752_s11 + $0x65] sm:$0x1] %vm1110_vm5, %v2964_v31  ;;  %v3583_v32 = vadd.f32 %v8354_v47, %v3488_v49  ;;  %v2896_v1 = vrot.slane %v2868_v23, %v9740_v35  ;;  %v2898_v13 = vcombine.high %v2882_v6, %v2882_v6  ;;  %v3654_v33 = vpop.f32.mrf.mxu0  ;;  %v3735_v37 = vpop.f32.mrf.mxu1 }
 0x19e   : > { %v2899_v25 = vcombine.high %v2889_v24, %v2889_v24  ;;  %2910 = vst.msk [vmem:[%s9752_s11 + $0x14] sm:$0x1] %vm1110_vm5, %v2889_v24  ;;  %2911 = vst.msk [vmem:[%s9752_s11 + $0x24] sm:$0x1] %vm1110_vm5, %v2897_v11  ;;  %v3582_v38 = vadd.f32 %v3573_v16, %v3487_v0 }
 0x19f   : > { %2913 = vst.msk [vmem:[%s9752_s11 + $0x44] sm:$0x1] %vm1110_vm5, %v2882_v6  ;;  %2982 = vst.msk [vmem:[%s9752_s11 + $0x75] sm:$0x1] %vm1110_vm5, %v2966_v41  ;;  %v3664_v39 = vadd.f32 %v8359_v29, %v3583_v32  ;;  %v2900_v26 = vcombine.high %v2896_v1, %v2896_v1  ;;  %v8369_v43 = vpop.f32.mrf.mxu0  ;;  %v8374_v28 = vpop.f32.mrf.mxu1 }
 0x1a0   : > { %2912 = vst.msk [vmem:[%s9752_s11 + $0x34] sm:$0x1] %vm1110_vm5, %v2899_v25  ;;  %2914 = vst.msk [vmem:[%s9752_s11 + $0x54] sm:$0x1] %vm1110_vm5, %v2896_v1  ;;  %v3663_v44 = vadd.f32 %v3654_v33, %v3582_v38  ;;  %v4049_v15 = vadd.f32 %v8374_v28, %v8369_v43 }
 0x1a1   : > { %2915 = vst.msk [vmem:[%s9752_s11 + $0x64] sm:$0x1] %vm1110_vm5, %v2898_v13  ;;  %v3745_v46 = vadd.f32 %v8364_v54, %v3664_v39  ;;  %2916 = vst.msk [vmem:[%s9752_s11 + $0x74] sm:$0x1] %vm1110_vm5, %v2900_v26  ;;  %v3966_v40 = vpop.f32.mrf.mxu0  ;;  %v4043_v62 = vpop.f32.mrf.mxu1 }
 0x1a2   : > { %v3744_v45 = vadd.f32 %v3735_v37, %v3663_v44  ;;  %v4044_v51 = vadd.f32 %v4043_v62, %v3966_v40 }
 0x1a3   : > { %v3747_v42 = vadd.f32 %v3745_v46, %v9736_v30  ;;  %v8379_v48 = vpop.f32.mrf.mxu0  ;;  %v8384_v50 = vpop.f32.mrf.mxu1 }
 0x1a4   : > { %v3746_v56 = vadd.f32 %v3744_v45, %v9738_v27  ;;  %v4132_v53 = vadd.f32 %v8379_v48, %v4049_v15 }
 0x1a5   : > { %v3749_v34 = vmax.f32 %v3747_v42, 0.0  ;;  %v4122_v7 = vpop.f32.mrf.mxu0  ;;  %v4215_v17 = vpop.f32.mrf.mxu1 }
 0x1a6   : > { %v3748_v59 = vmax.f32 %v3746_v56, 0.0  ;;  %v4225_v36 = vadd.f32 %v8384_v50, %v4132_v53  ;;  %v4131_v60 = vadd.f32 %v4122_v7, %v4044_v51 }
 0x1a7   : > { %v3817_v55 = vcombine.high %v3749_v34, %v3749_v34  ;;  %v3824_v58 = vrot.slane %v3749_v34, %v9740_v35  ;;  %v8389_v61 = vpop.f32.mrf.mxu0  ;;  %v8394_v63 = vpop.f32.mrf.mxu1 }
 0x1a8   : > { %v3751_v4 = vcombine.high %v3748_v59, %v3748_v59  ;;  %v3758_v9 = vrot.slane %v3748_v59, %v9740_v35  ;;  %v4224_v47 = vadd.f32 %v4215_v17, %v4131_v60  ;;  %v4306_v10 = vadd.f32 %v8389_v61, %v4225_v36 }
 0x1a9   : > { %v3831_v52 = vrot.slane %v3817_v55, %v9740_v35  ;;  %v3832_v2 = vcombine.high %v3824_v58, %v3824_v58  ;;  %v3840_v3 = vrot.slane %v3824_v58, %v9740_v35  ;;  %v4296_v14 = vpop.f32.mrf.mxu0  ;;  %v4377_v8 = vpop.f32.mrf.mxu1 }
 0x1aa   : > { %v3765_v5 = vrot.slane %v3751_v4, %v9740_v35  ;;  %v3766_v20 = vcombine.high %v3758_v9, %v3758_v9  ;;  %v3774_v16 = vrot.slane %v3758_v9, %v9740_v35  ;;  %v4387_v21 = vadd.f32 %v8394_v63, %v4306_v10 }
 0x1ab   : > { %v3833_v18 = vcombine.high %v3831_v52, %v3831_v52  ;;  %v3847_v57 = vrot.slane %v3831_v52, %v9740_v35  ;;  %v3854_v12 = vrot.slane %v3832_v2, %v9740_v35  ;;  %v3862_v19 = vcombine.high %v3840_v3, %v3840_v3  ;;  %3874 = vst.msk [vmem:[%s9752_s11 + $0x7] sm:$0x1] %vm1110_vm5, %v3840_v3  ;;  %v8399_v31 = vpop.f32.mrf.mxu0  ;;  %v8404_v22 = vpop.f32.mrf.mxu1 }
 0x1ac   : > { %v4305_v24 = vadd.f32 %v4296_v14, %v4224_v47  ;;  %v3767_v11 = vcombine.high %v3765_v5, %v3765_v5  ;;  %v3781_v29 = vrot.slane %v3765_v5, %v9740_v35  ;;  %v3788_v54 = vrot.slane %v3766_v20, %v9740_v35  ;;  %3808 = vst.msk [vmem:[%s9752_s11 + $0x6] sm:$0x1] %vm1110_vm5, %v3774_v16 }
 0x1ad   : > { %v3861_v49 = vrot.slane %v3833_v18, %v9740_v35  ;;  %v3863_v23 = vcombine.high %v3847_v57, %v3847_v57  ;;  %v3864_v6 = vcombine.high %v3854_v12, %v3854_v12  ;;  %3875 = vst.msk [vmem:[%s9752_s11 + $0x17] sm:$0x1] %vm1110_vm5, %v3854_v12  ;;  %3876 = vst.msk [vmem:[%s9752_s11 + $0x27] sm:$0x1] %vm1110_vm5, %v3862_v19  ;;  %v4472_v32 = vpop.f32.mrf.mxu0  ;;  %v4553_v0 = vpop.f32.mrf.mxu1 }
 0x1ae   : > { %3878 = vst.msk [vmem:[%s9752_s11 + $0x47] sm:$0x1] %vm1110_vm5, %v3847_v57  ;;  %v3796_v41 = vcombine.high %v3774_v16, %v3774_v16  ;;  %v4386_v13 = vadd.f32 %v4377_v8, %v4305_v24  ;;  %v4482_v25 = vadd.f32 %v8399_v31, %v4387_v21  ;;  %v3795_v33 = vrot.slane %v3767_v11, %v9740_v35 }
 0x1af   : > { %v3865_v1 = vcombine.high %v3861_v49, %v3861_v49  ;;  %3877 = vst.msk [vmem:[%s9752_s11 + $0x37] sm:$0x1] %vm1110_vm5, %v3864_v6  ;;  %3879 = vst.msk [vmem:[%s9752_s11 + $0x57] sm:$0x1] %vm1110_vm5, %v3861_v49  ;;  %v3797_v37 = vcombine.high %v3781_v29, %v3781_v29  ;;  %v3798_v38 = vcombine.high %v3788_v54, %v3788_v54  ;;  %v8409_v39 = vpop.f32.mrf.mxu0  ;;  %v8414_v26 = vpop.f32.mrf.mxu1 }
 0x1b0   : > { %3880 = vst.msk [vmem:[%s9752_s11 + $0x67] sm:$0x1] %vm1110_vm5, %v3863_v23  ;;  %3809 = vst.msk [vmem:[%s9752_s11 + $0x16] sm:$0x1] %vm1110_vm5, %v3788_v54  ;;  %v4563_v43 = vadd.f32 %v8404_v22, %v4482_v25  ;;  %v4481_v28 = vadd.f32 %v4472_v32, %v4386_v13  ;;  %v3799_v46 = vcombine.high %v3795_v33, %v3795_v33 }
 0x1b1   : > { %3810 = vst.msk [vmem:[%s9752_s11 + $0x26] sm:$0x1] %vm1110_vm5, %v3796_v41  ;;  %3812 = vst.msk [vmem:[%s9752_s11 + $0x46] sm:$0x1] %vm1110_vm5, %v3781_v29  ;;  %v4634_v44 = vpop.f32.mrf.mxu0  ;;  %v4865_v40 = vpop.f32.mrf.mxu1 }
 0x1b2   : > { %3881 = vst.msk [vmem:[%s9752_s11 + $0x77] sm:$0x1] %vm1110_vm5, %v3865_v1  ;;  %3811 = vst.msk [vmem:[%s9752_s11 + $0x36] sm:$0x1] %vm1110_vm5, %v3798_v38  ;;  %v4562_v62 = vadd.f32 %v4553_v0, %v4481_v28  ;;  %v4644_v42 = vadd.f32 %v8409_v39, %v4563_v43 }
 0x1b3   : > { %3813 = vst.msk [vmem:[%s9752_s11 + $0x56] sm:$0x1] %vm1110_vm5, %v3795_v33  ;;  %3814 = vst.msk [vmem:[%s9752_s11 + $0x66] sm:$0x1] %vm1110_vm5, %v3797_v37  ;;  %v8419_v45 = vpop.f32.mrf.mxu0  ;;  %v8424_v15 = vpop.f32.mrf.mxu1 }
 0x1b4   : > { %3815 = vst.msk [vmem:[%s9752_s11 + $0x76] sm:$0x1] %vm1110_vm5, %v3799_v46  ;;  %v4646_v48 = vadd.f32 %v4644_v42, %v9736_v30  ;;  %v4643_v50 = vadd.f32 %v4634_v44, %v4562_v62  ;;  %v4948_v34 = vadd.f32 %v8419_v45, %v8414_v26 }
 0x1b5   : > { %v4942_v56 = vpop.f32.mrf.mxu0  ;;  %v5021_v53 = vpop.f32.mrf.mxu1 }
 0x1b6   : > { %v4648_v51 = vmax.f32 %v4646_v48, 0.0  ;;  %v4645_v7 = vadd.f32 %v4643_v50, %v9738_v27  ;;  %v5031_v17 = vadd.f32 %v8424_v15, %v4948_v34  ;;  %v4943_v55 = vadd.f32 %v4942_v56, %v4865_v40 }
 0x1b7   : > { %v8429_v58 = vpop.f32.mrf.mxu0  ;;  %v8434_v59 = vpop.f32.mrf.mxu1 }
 0x1b8   : > { %v4716_v36 = vcombine.high %v4648_v51, %v4648_v51  ;;  %v4723_v60 = vrot.slane %v4648_v51, %v9740_v35  ;;  %v4647_v61 = vmax.f32 %v4645_v7, 0.0  ;;  %v5030_v63 = vadd.f32 %v5021_v53, %v4943_v55 }
 0x1b9   : > { %v5124_v52 = vadd.f32 %v8429_v58, %v5031_v17  ;;  %v5114_v2 = vpop.f32.mrf.mxu0  ;;  %v5195_v3 = vpop.f32.mrf.mxu1 }
 0x1ba   : > { %v4730_v4 = vrot.slane %v4716_v36, %v9740_v35  ;;  %v4731_v9 = vcombine.high %v4723_v60, %v4723_v60  ;;  %v4739_v47 = vrot.slane %v4723_v60, %v9740_v35  ;;  %v4650_v10 = vcombine.high %v4647_v61, %v4647_v61 }
 0x1bb   : > { %v4657_v14 = vrot.slane %v4647_v61, %v9740_v35  ;;  %v5205_v8 = vadd.f32 %v8434_v59, %v5124_v52  ;;  %v5123_v18 = vadd.f32 %v5114_v2, %v5030_v63  ;;  %v8439_v57 = vpop.f32.mrf.mxu0  ;;  %v8444_v12 = vpop.f32.mrf.mxu1 }
 0x1bc   : > { %v4732_v19 = vcombine.high %v4730_v4, %v4730_v4  ;;  %v4746_v5 = vrot.slane %v4730_v4, %v9740_v35  ;;  %v4753_v20 = vrot.slane %v4731_v9, %v9740_v35  ;;  %v4761_v16 = vcombine.high %v4739_v47, %v4739_v47  ;;  %4773 = vst.msk [vmem:[%s9752_s11 + $0x9] sm:$0x1] %vm1110_vm5, %v4739_v47 }
 0x1bd   : > { %v4664_v21 = vrot.slane %v4650_v10, %v9740_v35  ;;  %v4665_v31 = vcombine.high %v4657_v14, %v4657_v14  ;;  %v4673_v22 = vrot.slane %v4657_v14, %v9740_v35  ;;  %v5204_v49 = vadd.f32 %v5195_v3, %v5123_v18  ;;  %v5276_v23 = vpop.f32.mrf.mxu0  ;;  %v5371_v6 = vpop.f32.mrf.mxu1 }
 0x1be   : > { %v4760_v24 = vrot.slane %v4732_v19, %v9740_v35  ;;  %v4762_v11 = vcombine.high %v4746_v5, %v4746_v5  ;;  %v4763_v29 = vcombine.high %v4753_v20, %v4753_v20  ;;  %4774 = vst.msk [vmem:[%s9752_s11 + $0x19] sm:$0x1] %vm1110_vm5, %v4753_v20  ;;  %4775 = vst.msk [vmem:[%s9752_s11 + $0x29] sm:$0x1] %vm1110_vm5, %v4761_v16 }
 0x1bf   : > { %4777 = vst.msk [vmem:[%s9752_s11 + $0x49] sm:$0x1] %vm1110_vm5, %v4746_v5  ;;  %v5286_v54 = vadd.f32 %v8439_v57, %v5205_v8  ;;  %v4666_v41 = vcombine.high %v4664_v21, %v4664_v21  ;;  %v4680_v32 = vrot.slane %v4664_v21, %v9740_v35  ;;  %v4687_v0 = vrot.slane %v4665_v31, %v9740_v35  ;;  %v8449_v13 = vpop.f32.mrf.mxu0  ;;  %v8454_v25 = vpop.f32.mrf.mxu1 }
 0x1c0   : > { %v4695_v1 = vcombine.high %v4673_v22, %v4673_v22  ;;  %4707 = vst.msk [vmem:[%s9752_s11 + $0x8] sm:$0x1] %vm1110_vm5, %v4673_v22  ;;  %v4764_v33 = vcombine.high %v4760_v24, %v4760_v24  ;;  %4776 = vst.msk [vmem:[%s9752_s11 + $0x39] sm:$0x1] %vm1110_vm5, %v4763_v29  ;;  %v5285_v38 = vadd.f32 %v5276_v23, %v5204_v49 }
 0x1c1   : > { %4778 = vst.msk [vmem:[%s9752_s11 + $0x59] sm:$0x1] %vm1110_vm5, %v4760_v24  ;;  %4779 = vst.msk [vmem:[%s9752_s11 + $0x69] sm:$0x1] %vm1110_vm5, %v4762_v11  ;;  %v5381_v37 = vadd.f32 %v8444_v12, %v5286_v54  ;;  %v4694_v39 = vrot.slane %v4666_v41, %v9740_v35  ;;  %v4696_v26 = vcombine.high %v4680_v32, %v4680_v32  ;;  %v5452_v28 = vpop.f32.mrf.mxu0  ;;  %v5533_v46 = vpop.f32.mrf.mxu1 }
 0x1c2   : > { %v4697_v43 = vcombine.high %v4687_v0, %v4687_v0  ;;  %4708 = vst.msk [vmem:[%s9752_s11 + $0x18] sm:$0x1] %vm1110_vm5, %v4687_v0  ;;  %4709 = vst.msk [vmem:[%s9752_s11 + $0x28] sm:$0x1] %vm1110_vm5, %v4695_v1  ;;  %v5380_v44 = vadd.f32 %v5371_v6, %v5285_v38 }
 0x1c3   : > { %4711 = vst.msk [vmem:[%s9752_s11 + $0x48] sm:$0x1] %vm1110_vm5, %v4680_v32  ;;  %4780 = vst.msk [vmem:[%s9752_s11 + $0x79] sm:$0x1] %vm1110_vm5, %v4764_v33  ;;  %v5462_v40 = vadd.f32 %v8449_v13, %v5381_v37  ;;  %v4698_v62 = vcombine.high %v4694_v39, %v4694_v39  ;;  %v8459_v42 = vpop.f32.mrf.mxu0  ;;  %v8464_v45 = vpop.f32.mrf.mxu1 }
 0x1c4   : > { %4710 = vst.msk [vmem:[%s9752_s11 + $0x38] sm:$0x1] %vm1110_vm5, %v4697_v43  ;;  %4712 = vst.msk [vmem:[%s9752_s11 + $0x58] sm:$0x1] %vm1110_vm5, %v4694_v39  ;;  %v5461_v48 = vadd.f32 %v5452_v28, %v5380_v44  ;;  %v5847_v51 = vadd.f32 %v8464_v45, %v8459_v42 }
 0x1c5   : > { %4713 = vst.msk [vmem:[%s9752_s11 + $0x68] sm:$0x1] %vm1110_vm5, %v4696_v26  ;;  %v5543_v15 = vadd.f32 %v8454_v25, %v5462_v40  ;;  %4714 = vst.msk [vmem:[%s9752_s11 + $0x78] sm:$0x1] %vm1110_vm5, %v4698_v62  ;;  %v5764_v50 = vpop.f32.mrf.mxu0  ;;  %v5841_v34 = vpop.f32.mrf.mxu1 }
 0x1c6   : > { %v5542_v53 = vadd.f32 %v5533_v46, %v5461_v48  ;;  %v5842_v59 = vadd.f32 %v5841_v34, %v5764_v50 }
 0x1c7   : > { %v5545_v56 = vadd.f32 %v5543_v15, %v9736_v30  ;;  %v8469_v7 = vpop.f32.mrf.mxu0  ;;  %v8474_v17 = vpop.f32.mrf.mxu1 }
 0x1c8   : > { %v5544_v58 = vadd.f32 %v5542_v53, %v9738_v27  ;;  %v5930_v36 = vadd.f32 %v8469_v7, %v5847_v51 }
 0x1c9   : > { %v5547_v55 = vmax.f32 %v5545_v56, 0.0  ;;  %v5920_v60 = vpop.f32.mrf.mxu0  ;;  %v6013_v61 = vpop.f32.mrf.mxu1 }
 0x1ca   : > { %v5546_v2 = vmax.f32 %v5544_v58, 0.0  ;;  %v5929_v3 = vadd.f32 %v5920_v60, %v5842_v59  ;;  %v6023_v4 = vadd.f32 %v8474_v17, %v5930_v36 }
 0x1cb   : > { %v5615_v63 = vcombine.high %v5547_v55, %v5547_v55  ;;  %v5622_v52 = vrot.slane %v5547_v55, %v9740_v35  ;;  %v8479_v9 = vpop.f32.mrf.mxu0  ;;  %v8484_v47 = vpop.f32.mrf.mxu1 }
 0x1cc   : > { %v5549_v18 = vcombine.high %v5546_v2, %v5546_v2  ;;  %v5556_v57 = vrot.slane %v5546_v2, %v9740_v35  ;;  %v6022_v12 = vadd.f32 %v6013_v61, %v5929_v3  ;;  %v6104_v19 = vadd.f32 %v8479_v9, %v6023_v4 }
 0x1cd   : > { %v5629_v10 = vrot.slane %v5615_v63, %v9740_v35  ;;  %v5630_v14 = vcombine.high %v5622_v52, %v5622_v52  ;;  %v5638_v8 = vrot.slane %v5622_v52, %v9740_v35  ;;  %v6094_v5 = vpop.f32.mrf.mxu0  ;;  %v6175_v20 = vpop.f32.mrf.mxu1 }
 0x1ce   : > { %v5563_v49 = vrot.slane %v5549_v18, %v9740_v35  ;;  %v5564_v23 = vcombine.high %v5556_v57, %v5556_v57  ;;  %v5572_v6 = vrot.slane %v5556_v57, %v9740_v35  ;;  %v6103_v24 = vadd.f32 %v6094_v5, %v6022_v12 }
 0x1cf   : > { %v5631_v16 = vcombine.high %v5629_v10, %v5629_v10  ;;  %v5645_v21 = vrot.slane %v5629_v10, %v9740_v35  ;;  %v5652_v31 = vrot.slane %v5630_v14, %v9740_v35  ;;  %v5660_v22 = vcombine.high %v5638_v8, %v5638_v8  ;;  %5672 = vst.msk [vmem:[%s9752_s11 + $0xb] sm:$0x1] %vm1110_vm5, %v5638_v8  ;;  %v8489_v11 = vpop.f32.mrf.mxu0  ;;  %v8494_v29 = vpop.f32.mrf.mxu1 }
 0x1d0   : > { %v6185_v0 = vadd.f32 %v8484_v47, %v6104_v19  ;;  %v5565_v1 = vcombine.high %v5563_v49, %v5563_v49  ;;  %v5579_v13 = vrot.slane %v5563_v49, %v9740_v35  ;;  %v5586_v25 = vrot.slane %v5564_v23, %v9740_v35  ;;  %5606 = vst.msk [vmem:[%s9752_s11 + $0xa] sm:$0x1] %vm1110_vm5, %v5572_v6 }
 0x1d1   : > { %v5659_v54 = vrot.slane %v5631_v16, %v9740_v35  ;;  %v5661_v41 = vcombine.high %v5645_v21, %v5645_v21  ;;  %v5662_v32 = vcombine.high %v5652_v31, %v5652_v31  ;;  %5673 = vst.msk [vmem:[%s9752_s11 + $0x1b] sm:$0x1] %vm1110_vm5, %v5652_v31  ;;  %5674 = vst.msk [vmem:[%s9752_s11 + $0x2b] sm:$0x1] %vm1110_vm5, %v5660_v22  ;;  %v6270_v37 = vpop.f32.mrf.mxu0  ;;  %v6351_v38 = vpop.f32.mrf.mxu1 }
 0x1d2   : > { %5676 = vst.msk [vmem:[%s9752_s11 + $0x4b] sm:$0x1] %vm1110_vm5, %v5645_v21  ;;  %v5594_v33 = vcombine.high %v5572_v6, %v5572_v6  ;;  %v6184_v26 = vadd.f32 %v6175_v20, %v6103_v24  ;;  %v6280_v43 = vadd.f32 %v8489_v11, %v6185_v0  ;;  %v5593_v28 = vrot.slane %v5565_v1, %v9740_v35 }
 0x1d3   : > { %v5663_v39 = vcombine.high %v5659_v54, %v5659_v54  ;;  %5675 = vst.msk [vmem:[%s9752_s11 + $0x3b] sm:$0x1] %vm1110_vm5, %v5662_v32  ;;  %5677 = vst.msk [vmem:[%s9752_s11 + $0x5b] sm:$0x1] %vm1110_vm5, %v5659_v54  ;;  %v5595_v46 = vcombine.high %v5579_v13, %v5579_v13  ;;  %v5596_v44 = vcombine.high %v5586_v25, %v5586_v25  ;;  %v8499_v40 = vpop.f32.mrf.mxu0  ;;  %v8504_v62 = vpop.f32.mrf.mxu1 }
 0x1d4   : > { %5678 = vst.msk [vmem:[%s9752_s11 + $0x6b] sm:$0x1] %vm1110_vm5, %v5661_v41  ;;  %5607 = vst.msk [vmem:[%s9752_s11 + $0x1a] sm:$0x1] %vm1110_vm5, %v5586_v25  ;;  %v6279_v42 = vadd.f32 %v6270_v37, %v6184_v26  ;;  %v6361_v45 = vadd.f32 %v8494_v29, %v6280_v43  ;;  %v5597_v15 = vcombine.high %v5593_v28, %v5593_v28 }
 0x1d5   : > { %5608 = vst.msk [vmem:[%s9752_s11 + $0x2a] sm:$0x1] %vm1110_vm5, %v5594_v33  ;;  %5610 = vst.msk [vmem:[%s9752_s11 + $0x4a] sm:$0x1] %vm1110_vm5, %v5579_v13  ;;  %v6432_v48 = vpop.f32.mrf.mxu0  ;;  %v6663_v50 = vpop.f32.mrf.mxu1 }
 0x1d6   : > { %5679 = vst.msk [vmem:[%s9752_s11 + $0x7b] sm:$0x1] %vm1110_vm5, %v5663_v39  ;;  %5609 = vst.msk [vmem:[%s9752_s11 + $0x3a] sm:$0x1] %vm1110_vm5, %v5596_v44  ;;  %v6360_v34 = vadd.f32 %v6351_v38, %v6279_v42  ;;  %v6442_v56 = vadd.f32 %v8499_v40, %v6361_v45 }
 0x1d7   : > { %5611 = vst.msk [vmem:[%s9752_s11 + $0x5a] sm:$0x1] %vm1110_vm5, %v5593_v28  ;;  %5612 = vst.msk [vmem:[%s9752_s11 + $0x6a] sm:$0x1] %vm1110_vm5, %v5595_v46  ;;  %v8509_v53 = vpop.f32.mrf.mxu0  ;;  %v8514_v51 = vpop.f32.mrf.mxu1 }
 0x1d8   : > { %5613 = vst.msk [vmem:[%s9752_s11 + $0x7a] sm:$0x1] %vm1110_vm5, %v5597_v15  ;;  %v6444_v7 = vadd.f32 %v6442_v56, %v9736_v30  ;;  %v6441_v17 = vadd.f32 %v6432_v48, %v6360_v34  ;;  %v6746_v55 = vadd.f32 %v8509_v53, %v8504_v62 }
 0x1d9   : > { %v6740_v58 = vpop.f32.mrf.mxu0  ;;  %v6819_v59 = vpop.f32.mrf.mxu1 }
 0x1da   : > { %v6446_v36 = vmax.f32 %v6444_v7, 0.0  ;;  %v6443_v60 = vadd.f32 %v6441_v17, %v9738_v27  ;;  %v6741_v61 = vadd.f32 %v6740_v58, %v6663_v50  ;;  %v6829_v63 = vadd.f32 %v8514_v51, %v6746_v55 }
 0x1db   : > { %v8519_v52 = vpop.f32.mrf.mxu0  ;;  %v8524_v2 = vpop.f32.mrf.mxu1 }
 0x1dc   : > { %v6514_v3 = vcombine.high %v6446_v36, %v6446_v36  ;;  %v6521_v4 = vrot.slane %v6446_v36, %v9740_v35  ;;  %v6445_v9 = vmax.f32 %v6443_v60, 0.0  ;;  %v6828_v47 = vadd.f32 %v6819_v59, %v6741_v61 }
 0x1dd   : > { %v6922_v10 = vadd.f32 %v8519_v52, %v6829_v63  ;;  %v6912_v14 = vpop.f32.mrf.mxu0  ;;  %v6993_v8 = vpop.f32.mrf.mxu1 }
 0x1de   : > { %v6528_v18 = vrot.slane %v6514_v3, %v9740_v35  ;;  %v6529_v57 = vcombine.high %v6521_v4, %v6521_v4  ;;  %v6537_v12 = vrot.slane %v6521_v4, %v9740_v35  ;;  %v6448_v19 = vcombine.high %v6445_v9, %v6445_v9 }
 0x1df   : > { %v6455_v5 = vrot.slane %v6445_v9, %v9740_v35  ;;  %v6921_v20 = vadd.f32 %v6912_v14, %v6828_v47  ;;  %v7003_v16 = vadd.f32 %v8524_v2, %v6922_v10  ;;  %v8529_v21 = vpop.f32.mrf.mxu0  ;;  %v8534_v31 = vpop.f32.mrf.mxu1 }
 0x1e0   : > { %v6530_v22 = vcombine.high %v6528_v18, %v6528_v18  ;;  %v6544_v49 = vrot.slane %v6528_v18, %v9740_v35  ;;  %v6551_v23 = vrot.slane %v6529_v57, %v9740_v35  ;;  %v6559_v6 = vcombine.high %v6537_v12, %v6537_v12  ;;  %6571 = vst.msk [vmem:[%s9752_s11 + $0xd] sm:$0x1] %vm1110_vm5, %v6537_v12 }
 0x1e1   : > { %v6462_v24 = vrot.slane %v6448_v19, %v9740_v35  ;;  %v6463_v11 = vcombine.high %v6455_v5, %v6455_v5  ;;  %v6471_v29 = vrot.slane %v6455_v5, %v9740_v35  ;;  %v7002_v54 = vadd.f32 %v6993_v8, %v6921_v20  ;;  %v7074_v41 = vpop.f32.mrf.mxu0  ;;  %v7169_v32 = vpop.f32.mrf.mxu1 }
 0x1e2   : > { %v6558_v0 = vrot.slane %v6530_v22, %v9740_v35  ;;  %v6560_v1 = vcombine.high %v6544_v49, %v6544_v49  ;;  %v6561_v13 = vcombine.high %v6551_v23, %v6551_v23  ;;  %6572 = vst.msk [vmem:[%s9752_s11 + $0x1d] sm:$0x1] %vm1110_vm5, %v6551_v23  ;;  %6573 = vst.msk [vmem:[%s9752_s11 + $0x2d] sm:$0x1] %vm1110_vm5, %v6559_v6 }
 0x1e3   : > { %6575 = vst.msk [vmem:[%s9752_s11 + $0x4d] sm:$0x1] %vm1110_vm5, %v6544_v49  ;;  %v7084_v25 = vadd.f32 %v8529_v21, %v7003_v16  ;;  %v6464_v33 = vcombine.high %v6462_v24, %v6462_v24  ;;  %v6478_v37 = vrot.slane %v6462_v24, %v9740_v35  ;;  %v6485_v38 = vrot.slane %v6463_v11, %v9740_v35  ;;  %v8539_v26 = vpop.f32.mrf.mxu0  ;;  %v8544_v45 = vpop.f32.mrf.mxu1 }
 0x1e4   : > { %v6493_v39 = vcombine.high %v6471_v29, %v6471_v29  ;;  %6505 = vst.msk [vmem:[%s9752_s11 + $0xc] sm:$0x1] %vm1110_vm5, %v6471_v29  ;;  %v6562_v43 = vcombine.high %v6558_v0, %v6558_v0  ;;  %6574 = vst.msk [vmem:[%s9752_s11 + $0x3d] sm:$0x1] %vm1110_vm5, %v6561_v13  ;;  %v7083_v28 = vadd.f32 %v7074_v41, %v7002_v54 }
 0x1e5   : > { %6576 = vst.msk [vmem:[%s9752_s11 + $0x5d] sm:$0x1] %vm1110_vm5, %v6558_v0  ;;  %6577 = vst.msk [vmem:[%s9752_s11 + $0x6d] sm:$0x1] %vm1110_vm5, %v6560_v1  ;;  %v7179_v46 = vadd.f32 %v8534_v31, %v7084_v25  ;;  %v6492_v44 = vrot.slane %v6464_v33, %v9740_v35  ;;  %v6494_v40 = vcombine.high %v6478_v37, %v6478_v37  ;;  %v7250_v42 = vpop.f32.mrf.mxu0  ;;  %v7331_v53 = vpop.f32.mrf.mxu1 }
 0x1e6   : > { %v6495_v62 = vcombine.high %v6485_v38, %v6485_v38  ;;  %6506 = vst.msk [vmem:[%s9752_s11 + $0x1c] sm:$0x1] %vm1110_vm5, %v6485_v38  ;;  %6507 = vst.msk [vmem:[%s9752_s11 + $0x2c] sm:$0x1] %vm1110_vm5, %v6493_v39  ;;  %v7178_v15 = vadd.f32 %v7169_v32, %v7083_v28 }
 0x1e7   : > { %6509 = vst.msk [vmem:[%s9752_s11 + $0x4c] sm:$0x1] %vm1110_vm5, %v6478_v37  ;;  %6578 = vst.msk [vmem:[%s9752_s11 + $0x7d] sm:$0x1] %vm1110_vm5, %v6562_v43  ;;  %v7260_v48 = vadd.f32 %v8539_v26, %v7179_v46  ;;  %v6496_v50 = vcombine.high %v6492_v44, %v6492_v44 }
 0x1e8   : > { %6508 = vst.msk [vmem:[%s9752_s11 + $0x3c] sm:$0x1] %vm1110_vm5, %v6495_v62  ;;  %6510 = vst.msk [vmem:[%s9752_s11 + $0x5c] sm:$0x1] %vm1110_vm5, %v6492_v44  ;;  %v7259_v34 = vadd.f32 %v7250_v42, %v7178_v15 }
 0x1e9   : > { %6511 = vst.msk [vmem:[%s9752_s11 + $0x6c] sm:$0x1] %vm1110_vm5, %v6494_v40  ;;  %v7341_v56 = vadd.f32 %v8544_v45, %v7260_v48  ;;  %6512 = vst.msk [vmem:[%s9752_s11 + $0x7c] sm:$0x1] %vm1110_vm5, %v6496_v50 }
 0x1ea   : > { %v7340_v7 = vadd.f32 %v7331_v53, %v7259_v34 }
 0x1eb   : > { %v7343_v51 = vadd.f32 %v7341_v56, %v9736_v30 }
 0x1ec   : > { %v7342_v55 = vadd.f32 %v7340_v7, %v9738_v27 }
 0x1ed   : > { %v7345_v17 = vmax.f32 %v7343_v51, 0.0 }
 0x1ee   : > { %v7344_v36 = vmax.f32 %v7342_v55, 0.0 }
 0x1ef   : > { %v7413_v58 = vcombine.high %v7345_v17, %v7345_v17  ;;  %v7420_v59 = vrot.slane %v7345_v17, %v9740_v35 }
 0x1f0   : > { %v7347_v52 = vcombine.high %v7344_v36, %v7344_v36  ;;  %v7354_v30 = vrot.slane %v7344_v36, %v9740_v35 }
 0x1f1   : > { %v7427_v60 = vrot.slane %v7413_v58, %v9740_v35  ;;  %v7428_v61 = vcombine.high %v7420_v59, %v7420_v59  ;;  %v7436_v63 = vrot.slane %v7420_v59, %v9740_v35 }
 0x1f2   : > { %v7361_v9 = vrot.slane %v7347_v52, %v9740_v35  ;;  %v7362_v47 = vcombine.high %v7354_v30, %v7354_v30  ;;  %v7370_v10 = vrot.slane %v7354_v30, %v9740_v35 }
 0x1f3   : > { %v7429_v2 = vcombine.high %v7427_v60, %v7427_v60  ;;  %v7443_v3 = vrot.slane %v7427_v60, %v9740_v35  ;;  %v7450_v27 = vrot.slane %v7428_v61, %v9740_v35  ;;  %v7458_v4 = vcombine.high %v7436_v63, %v7436_v63  ;;  %7470 = vst.msk [vmem:[%s9752_s11 + $0xf] sm:$0x1] %vm1110_vm5, %v7436_v63 }
 0x1f4   : > { %v7363_v57 = vcombine.high %v7361_v9, %v7361_v9  ;;  %v7377_v12 = vrot.slane %v7361_v9, %v9740_v35  ;;  %v7384_v19 = vrot.slane %v7362_v47, %v9740_v35  ;;  %v7392_v5 = vcombine.high %v7370_v10, %v7370_v10  ;;  %7404 = vst.msk [vmem:[%s9752_s11 + $0xe] sm:$0x1] %vm1110_vm5, %v7370_v10 }
 0x1f5   : > { %v7457_v14 = vrot.slane %v7429_v2, %v9740_v35  ;;  %v7459_v8 = vcombine.high %v7443_v3, %v7443_v3  ;;  %v7460_v18 = vcombine.high %v7450_v27, %v7450_v27  ;;  %7471 = vst.msk [vmem:[%s9752_s11 + $0x1f] sm:$0x1] %vm1110_vm5, %v7450_v27  ;;  %7472 = vst.msk [vmem:[%s9752_s11 + $0x2f] sm:$0x1] %vm1110_vm5, %v7458_v4 }
 0x1f6   : > { %7474 = vst.msk [vmem:[%s9752_s11 + $0x4f] sm:$0x1] %vm1110_vm5, %v7443_v3  ;;  %v7391_v16 = vrot.slane %v7363_v57, %v9740_v35  ;;  %v7393_v21 = vcombine.high %v7377_v12, %v7377_v12  ;;  %v7394_v31 = vcombine.high %v7384_v19, %v7384_v19  ;;  %7405 = vst.msk [vmem:[%s9752_s11 + $0x1e] sm:$0x1] %vm1110_vm5, %v7384_v19 }
 0x1f7   : > { %v7461_v20 = vcombine.high %v7457_v14, %v7457_v14  ;;  %7473 = vst.msk [vmem:[%s9752_s11 + $0x3f] sm:$0x1] %vm1110_vm5, %v7460_v18  ;;  %7475 = vst.msk [vmem:[%s9752_s11 + $0x5f] sm:$0x1] %vm1110_vm5, %v7457_v14 }
 0x1f8   : > { %7476 = vst.msk [vmem:[%s9752_s11 + $0x6f] sm:$0x1] %vm1110_vm5, %v7459_v8  ;;  %7406 = vst.msk [vmem:[%s9752_s11 + $0x2e] sm:$0x1] %vm1110_vm5, %v7392_v5  ;;  %v7395_v22 = vcombine.high %v7391_v16, %v7391_v16 }
 0x1f9   : > { %7408 = vst.msk [vmem:[%s9752_s11 + $0x4e] sm:$0x1] %vm1110_vm5, %v7377_v12  ;;  %7477 = vst.msk [vmem:[%s9752_s11 + $0x7f] sm:$0x1] %vm1110_vm5, %v7461_v20 }
 0x1fa   : > { %7407 = vst.msk [vmem:[%s9752_s11 + $0x3e] sm:$0x1] %vm1110_vm5, %v7394_v31  ;;  %7409 = vst.msk [vmem:[%s9752_s11 + $0x5e] sm:$0x1] %vm1110_vm5, %v7391_v16 }
 0x1fb   : > { %7410 = vst.msk [vmem:[%s9752_s11 + $0x6e] sm:$0x1] %vm1110_vm5, %v7393_v21  ;;  %7411 = vst.msk [vmem:[%s9752_s11 + $0x7e] sm:$0x1] %vm1110_vm5, %v7395_v22 }
 0x1fc   : > { %s7964_s21 = sshll.u32 %s8692_s15, 1  ;;  %s7965_s24 = sshll.u32 %s8696_s16, 5 }
 0x1fd   : > { %s7491_s27 = sadd.s32 %s7965_s24, %s7964_s21  ;;  %s7504_s28 = sshll.u32 %s9752_s11, 4  ;;  %s7505_s28 = int_to_ptr.vmem [resolvable:$true] %s7504_s28 }
 0x1fe   : > { %s7966_s29 = sshll.u32 %s7491_s27, 7  ;;  %s8714_s7 = smov 256  }
 0x1ff   : > { %s7493_s6 = scalar_lea.hbm %s10167_s3, %s7966_s29  ;;  %8546 = sst [smem:[#allocation5]] (%p8792_p3), %s8714_s7 }
 0x200   : > { %s8715_s8 = smov 512   ;;  %s8716_s9 = smov 2  }
 0x201   : > { %8547 = sst [smem:[#allocation5 + $0x1]] (%p8792_p3), %s8715_s8  ;;  %s8717_s15 = smov 128  }
 0x202   : > { %8548 = sst [smem:[#allocation5 + $0x2]] (%p8792_p3), %s8716_s9  ;;  %s8718_s16 = smov 8  }
 0x203   : > { %8549 = sst [smem:[#allocation5 + $0x3]] (%p8792_p3), %s8717_s15  ;;  %s8719_s10 = smov 131072  }
 0x204   : > { %8550 = sst [smem:[#allocation5 + $0x4]] (%p8792_p3), %s8717_s15  ;;  %s8720_s11 = smov 0  }
 0x205   : > { %8551 = sst [smem:[#allocation5 + $0x5]] (%p8792_p3), %s8718_s16 }
 0x206   : > { %8552 = dma.general (%p8792_p3), %s7505_s28, 2048, %s7493_s6, %s7479_s20, %s8719_s10, [#allocation5], %s8720_s11, 0  }
 0x207 PF: > { %p8558_p13 = scmp.ge.s32.totalorder %s8708_s19, 2  ;;  %s7532_s21 = sand.u32 1, %s8680_s12  }
 0x208   : > { %s7533_s24 = scalar_lea.sflag [#allocation3], %s7532_s21 }
 0x209   : > { %p8555_p0 = pnand %p8558_p13, %p8801_p8 }
 0x20b   : > { %p8556_p1 = pneg %p8555_p0 }
 0x20d   : > { %8675 = dma.done.wait (%p8556_p1), %s7533_s24, 2048  }
 0x20e   : > { %8677 = vsyncadd (%p8556_p1), %s7533_s24, 4294965248  ;;  %s16_s19 = sadd.s32 1, %s8708_s19   ;;  %s10170_s12 = smov %s8684_s13 }
 0x20f   : > { %p13_p2 = scmp.ge.s32.totalorder %s16_s19, 6   ;;  %s10171_s13 = smov %s8688_s14 }
 0x210   : > { %s10172_s14 = smov %s8810_s30  ;;  %s10173_s15 = smov %s8700_s17 }
 0x211   : > { %s10174_s16 = smov %s8704_s18  ;;  %s10175_s17 = smov %s10178_s22 }
 0x212   : > { %s10176_s18 = smov %s10182_s23  ;;  %15 = sbr.rel (!%p13_p2) target bundleno = 5 (0x5), region = 90 }
 0x217   :  { %7538 = vsyncpa [#allocation3], 1 }
 0x218   :  { %7540 = vsyncpa [#allocation3 + $0x1], 1 }

</bundles_post_ra>
